<compile_context>
chip_gen: v5e
topology: v5e:2x2
jax: 0.10.0
libtpu: 0.0.40
codegen_flags: <defaults>
</compile_context>

<pallas_src>
import functools

import jax
import jax.numpy as jnp
from jax import lax
from jax.experimental import pallas as pl
from jax.experimental.pallas import tpu as pltpu


# ---------------------------------------------------------------------------
# Small helpers
# ---------------------------------------------------------------------------
def _round_up(v, m):
    return (v + m - 1) // m * m


def _cdiv(a, b):
    return -(-a // b)


def _taps(k):
    return tuple((i, j) for i in range(k) for j in range(k))


def _physical_vmem_bytes():
    try:
        return int(pltpu.get_tpu_info().vmem_capacity_bytes)
    except Exception:
        return 64 * 1024 * 1024          # v7x per-TensorCore capacity (safe floor)


def _vmem_limit_bytes(workset_bytes):
    """Scoped-VMEM limit: ~1.5x the per-step working set, >= 32 MiB, clamped to
    90% of physical VMEM *last* (the previous version could exceed the cap)."""
    phys = _physical_vmem_bytes()
    want = max(32 * 1024 * 1024, int(1.5 * workset_bytes))
    return min(want, int(0.9 * phys))


def _default_vmem_budget():
    # Per-step working-set budget for the tile picker.  Conservative enough for
    # v7x (64 MiB VMEM); on v5e/v6e (128 MiB) larger tiles or Buffered(3) on
    # the activation stream are affordable (act_buffer_count knob below).
    return min(24 * 1024 * 1024, int(0.4 * _physical_vmem_bytes()))


def _block_spec(shape, index_map, buffer_count=None):
    """BlockSpec with an optional explicit buffer count (used to single-buffer
    the grid-invariant weights / shift)."""
    if buffer_count is None:
        return pl.BlockSpec(shape, index_map)
    return pl.BlockSpec(shape, index_map, pipeline_mode=pl.Buffered(buffer_count))


# ---------------------------------------------------------------------------
# Pallas kernel: direct conv (+ folded BN) (+ folded residual branch) (+ relu)
# ---------------------------------------------------------------------------
def _conv_kernel(*refs, taps, stride, rows_per_phase, tile_rows, wo, relu,
                 fold_k, has_skip):
    """Direct convolution for one (image, output-row-tile) grid step.

    refs (in order):
      x_ref       (1, 1, s*s*L, wq, cin)      phase-split activation slab (+halo)
      w_ref       (T*cin, cp) | (T, cin, cp)  BN-scale-folded weights
      shift_ref   (1, cp)                     f32 per-channel shift (bias + BN)
      [skip_ref   (1, 1, m, c_skip)]          residual activations (f32)
      [skip_w_ref (c_skip, cp)]               identity-embedding / 1x1-conv weights
      o_ref       (1, 1, m, cp)
    """
    if has_skip:
        x_ref, w_ref, shift_ref, skip_ref, skip_w_ref, o_ref = refs
    else:
        x_ref, w_ref, shift_ref, o_ref = refs

    x = x_ref[0, 0]                               # (s*s*L, wq, cin)
    cin = x.shape[-1]
    cp = o_ref.shape[-1]
    m = tile_rows * wo
    L = rows_per_phase

    def tap_slice(i, j):
        base = ((i % stride) * stride + (j % stride)) * L + i // stride
        joff = j // stride
        return x[base:base + tile_rows, joff:joff + wo, :].reshape(m, cin)

    if fold_k:
        # Fold all taps into the contraction dimension: one K = T*cin matmul
        # (fills the 128/256-deep MXU) instead of T K=cin matmuls plus T-1
        # full-width f32 accumulation adds.  The concat offsets are lane-aligned
        # because cin is a multiple of 128 on this path.
        lhs = jnp.concatenate([tap_slice(i, j) for (i, j) in taps], axis=-1)
        acc = jnp.dot(lhs, w_ref[...], preferred_element_type=jnp.float32)
    else:
        # Lane-unaligned channel counts (e.g. the block's raw input channels):
        # keep the per-tap loop; an unaligned in-kernel concat would just trade
        # the adds for XLU relayout work.
        acc = jnp.zeros((m, cp), jnp.float32)
        for t, (i, j) in enumerate(taps):
            acc = acc + jnp.dot(tap_slice(i, j), w_ref[t],
                                preferred_element_type=jnp.float32)

    y = acc + shift_ref[...]                      # f32 epilogue
    if has_skip:
        # Residual branch as one small f32 matmul: identity embedding for the
        # plain skip, or the 1x1-conv projection (its bias is already folded
        # into shift_ref).  Keeps the residual add in f32.
        # TODO(synk): training-mode dropout on the main branch would go here via
        # pltpu.prng_seed / pltpu.prng_random_bits (identity in eval mode).
        y = y + jnp.dot(skip_ref[0, 0], skip_w_ref[...],
                        preferred_element_type=jnp.float32)
    if relu:
        y = jnp.maximum(y, 0.0)
    o_ref[0, 0] = y.astype(o_ref.dtype)


# ---------------------------------------------------------------------------
# XLA-side layout helpers
# ---------------------------------------------------------------------------
def _pack_weights_folded(w_oihw, scale, cin_act, cp, dtype):
    """OIHW -> (kh*kw*cin_act, cp): tap-major rows matching the kernel's lhs
    concat order, input channels zero-padded to the activation width, BN scale
    folded into the output channels, zero-padded to cp lanes."""
    cout, cin, kh, kw = w_oihw.shape
    wt = jnp.transpose(w_oihw, (2, 3, 1, 0)).reshape(kh * kw, cin, cout)
    wt = wt * scale[None, None, :]
    wt = jnp.pad(wt, ((0, 0), (0, cin_act - cin), (0, cp - cout)))
    return wt.reshape(kh * kw * cin_act, cp).astype(dtype)


def _pack_weights_taps(w_oihw, scale, cp, dtype):
    """OIHW -> (kh*kw, cin, cp) tap-major weights for the per-tap-loop path."""
    cout, cin, kh, kw = w_oihw.shape
    wt = jnp.transpose(w_oihw, (2, 3, 1, 0)).reshape(kh * kw, cin, cout)
    wt = wt * scale[None, None, :]
    wt = jnp.pad(wt, ((0, 0), (0, 0), (0, cp - cout)))
    return wt.astype(dtype)


def _conv_input_tiles(x_nhwc, k, stride, pad, tile_rows, n_tiles):
    """Zero-pad, phase-split, and cut into overlapping output-row tiles so that
    every (i, j) tap of a k x k / stride-s conv is a unit-stride *static* slice
    of the per-tile slab.  Returns xt (n, n_tiles, s*s*L, wq, c), L, wq with
    L = tile_rows + halo; tap (i, j) at local output row r, col c reads
        xt[b, t, ((i%s)*s + j%s)*L + i//s + r, c + j//s, :].
    """
    n, h, w, c = x_nhwc.shape
    s = stride
    halo = (k - 1) // s
    wo = (w + 2 * pad - k) // s + 1
    wq = wo + halo
    q_need = n_tiles * tile_rows + halo
    hp, wp = s * q_need, s * wq
    bot, right = hp - h - pad, wp - w - pad
    assert bot >= 0 and right >= 0
    xp = jnp.pad(x_nhwc, ((0, 0), (pad, bot), (pad, right), (0, 0)))
    xq = xp.reshape(n, q_need, s, wq, s, c).transpose(0, 2, 4, 1, 3, 5)
    L = tile_rows + halo
    if n_tiles == 1:
        return xq.reshape(n, 1, s * s * L, wq, c), L, wq
    slabs = [xq[:, :, :, t * tile_rows:t * tile_rows + L] for t in range(n_tiles)]
    xt = jnp.stack(slabs, axis=1).reshape(n, n_tiles, s * s * L, wq, c)
    return xt, L, wq


# ---------------------------------------------------------------------------
# One fused conv / bn / (+skip) / (relu) block
# ---------------------------------------------------------------------------
def _conv_block(x_nhwc, w_oihw, bn_scale, shift_cp, *, stride, pad, cp, relu,
                compute_dtype, out_dtype, skip=None, skip_w=None,
                max_tile_rows=None, vmem_budget_bytes=None, act_buffer_count=2):
    """conv(kxk, stride, pad) with BN scale folded into the weights, + shift,
    [+ skip @ skip_w], [relu].  Returns (n, ho, wo, cp)."""
    n, h, w, cin = x_nhwc.shape
    cout, _, k, _ = w_oihw.shape
    s = stride
    ho = (h + 2 * pad - k) // s + 1
    wo = (w + 2 * pad - k) // s + 1
    halo = (k - 1) // s
    wq = wo + halo
    taps = _taps(k)
    fold_k = (cin % 128 == 0)       # lane-aligned in-kernel tap concat is cheap
    c_skip = 0 if skip is None else skip.shape[-1]
    bpe_act = jnp.dtype(compute_dtype).itemsize
    bpe_out = jnp.dtype(out_dtype).itemsize

    def est(th):                    # per-grid-step VMEM working set (bytes)
        L_ = th + halo
        m_ = th * wo
        bytes_ = 2 * (s * s * L_) * wq * cin * bpe_act       # activation slab (x2)
        bytes_ += len(taps) * cin * cp * bpe_act             # weights (x1, Buffered(1))
        bytes_ += 2 * m_ * cp * bpe_out                      # output tile (x2)
        bytes_ += m_ * cp * 4                                # f32 accumulator
        bytes_ += m_ * len(taps) * cin * bpe_act             # lhs / tap-slice temps
        bytes_ += 2 * cp * 4                                 # shift
        if c_skip:
            bytes_ += 2 * m_ * c_skip * 4 + c_skip * cp * 4 + m_ * cp * 4
        return bytes_

    # Pick the output-row tile height so the per-step working set fits the VMEM
    # budget.  (Very wide / deep layers would additionally want an output-channel
    # grid axis; row tiling covers the sizes handled here.)  Prefer tile heights
    # whose flattened row count is a multiple of 8 for dense epilogue stores.
    budget = vmem_budget_bytes if vmem_budget_bytes else _default_vmem_budget()
    th = ho if max_tile_rows is None else max(1, min(ho, max_tile_rows))
    while th > 1 and est(th) > budget:
        th = _cdiv(th, 2)
    n_t = _cdiv(ho, th)
    th = _cdiv(ho, n_t)             # rebalance tiles (never increases est)
    m = th * wo

    xt, L, wq = _conv_input_tiles(x_nhwc.astype(compute_dtype), k, s, pad, th, n_t)

    if fold_k:
        wmat = _pack_weights_folded(w_oihw, bn_scale, cin, cp, compute_dtype)
        w_shape, w_imap = (len(taps) * cin, cp), (lambda b, r: (0, 0))
    else:
        wmat = _pack_weights_taps(w_oihw, bn_scale, cp, compute_dtype)
        w_shape, w_imap = (len(taps), cin, cp), (lambda b, r: (0, 0, 0))

    args = [xt, wmat, shift_cp.astype(jnp.float32)[None, :]]
    if skip is not None:
        sk = jnp.pad(skip.astype(jnp.float32),
                     ((0, 0), (0, n_t * th - ho), (0, 0), (0, 0)))
        args += [sk.reshape(n, n_t, m, c_skip), skip_w.astype(jnp.float32)]

    kernel = functools.partial(
        _conv_kernel, taps=taps, stride=s, rows_per_phase=L, tile_rows=th,
        wo=wo, relu=relu, fold_k=fold_k, has_skip=skip is not None)

    act_bc = None if act_buffer_count == 2 else act_buffer_count

    def build_in_specs(hinted):
        bc = (lambda c: c) if hinted else (lambda c: None)
        specs = [
            _block_spec((1, 1, s * s * L, wq, cin),
                        lambda b, r: (b, r, 0, 0, 0), bc(act_bc)),
            _block_spec(w_shape, w_imap, bc(1)),                 # grid-invariant
            _block_spec((1, cp), lambda b, r: (0, 0), bc(1)),    # grid-invariant
        ]
        if skip is not None:
            specs += [
                pl.BlockSpec((1, 1, m, c_skip), lambda b, r: (b, r, 0, 0)),
                _block_spec((c_skip, cp), lambda b, r: (0, 0), bc(1)),
            ]
        return specs

    def run(hinted):
        return pl.pallas_call(
            kernel,
            out_shape=jax.ShapeDtypeStruct((n, n_t, m, cp), out_dtype),
            grid=(n, n_t),
            in_specs=build_in_specs(hinted),
            out_specs=pl.BlockSpec((1, 1, m, cp), lambda b, r: (b, r, 0, 0)),
            compiler_params=pltpu.CompilerParams(
                dimension_semantics=("parallel", "parallel"),
                vmem_limit_bytes=_vmem_limit_bytes(est(th))),
        )(*args)

    try:
        out = run(True)
    except Exception:
        # pipeline_mode buffer hints unsupported on this jax version: fall back
        # to default double-buffering (correctness unchanged).
        out = run(False)

    return out.reshape(n, n_t * th, wo, cp)[:, :ho]


# ---------------------------------------------------------------------------
# Residual block forward (eval mode)
# ---------------------------------------------------------------------------
def residual_forward(x_nchw, params, *, use_1x1conv=False, strides=1, eps=1e-5,
                     compute_dtype=jnp.bfloat16, lane_multiple=128,
                     max_tile_rows=None, vmem_budget_bytes=None,
                     act_buffer_count=2):
    out_dtype = x_nchw.dtype
    x = jnp.transpose(x_nchw, (0, 2, 3, 1))           # NHWC master (input dtype)
    n, h, w, cin = x.shape
    cout = params["w1"].shape[0]
    if not use_1x1conv:
        assert cin == cout and strides == 1, (
            "identity skip requires input_channels == num_channels and strides == 1")
    # Lane-dense output channels.  NOTE: on v6e/v7x prefer lane_multiple=256 once
    # cout >= 256 (2x256x256 MXU); keep 128 on v5e (4x128x128 MXU).
    cp = _round_up(cout, lane_multiple)

    common = dict(compute_dtype=compute_dtype, max_tile_rows=max_tile_rows,
                  vmem_budget_bytes=vmem_budget_bytes,
                  act_buffer_count=act_buffer_count)

    # ---- conv1 -> bn1 -> relu ------------------------------------------------
    s1 = params["gamma1"] * lax.rsqrt(params["var1"] + eps)
    sh1 = jnp.pad((params["b1"] - params["mean1"]) * s1 + params["beta1"],
                  (0, cp - cout))
    y1 = _conv_block(x, params["w1"], s1, sh1, stride=strides, pad=1, cp=cp,
                     relu=True, out_dtype=compute_dtype, **common)
    # y1 stays at the padded cp width (the extra channels are exactly zero), so
    # conv2 streams lane-dense activations, folds its 9 taps into a 128-multiple
    # contraction depth, and no slice/re-pad HBM pass is needed in between.

    # ---- residual branch (folded into the conv2 kernel) -----------------------
    xf = x.astype(jnp.float32)                         # keep the residual add f32
    if use_1x1conv:
        w3 = jnp.transpose(params["w3"].reshape(cout, cin))          # (cin, cout)
        skip_w = jnp.pad(w3, ((0, 0), (0, cp - cout)))
        skip_shift = jnp.pad(params["b3"], (0, cp - cout))
        skip = xf[:, ::strides, ::strides, :]          # 1x1 stride-s conv == matmul
    else:
        skip_w = jnp.eye(cin, cp, dtype=jnp.float32)   # identity embedding
        skip_shift = jnp.zeros((cp,), jnp.float32)
        skip = xf

    # ---- conv2 -> bn2 -> dropout(eval: identity) -> + skip -> relu ------------
    s2 = params["gamma2"] * lax.rsqrt(params["var2"] + eps)
    sh2 = jnp.pad((params["b2"] - params["mean2"]) * s2 + params["beta2"],
                  (0, cp - cout)) + skip_shift
    out = _conv_block(y1, params["w2"], s2, sh2, stride=1, pad=1, cp=cp,
                      relu=True, out_dtype=compute_dtype,
                      skip=skip, skip_w=skip_w, **common)

    out = out[..., :cout]                              # drop lane padding
    return jnp.transpose(out, (0, 3, 1, 2)).astype(out_dtype)


# ---------------------------------------------------------------------------
# Pure-JAX reference (for correctness checks)
# ---------------------------------------------------------------------------
def residual_reference(x, params, *, use_1x1conv=False, strides=1, eps=1e-5):
    def conv(z, wgt, b, stride, pad):
        y = lax.conv_general_dilated(
            z, wgt, (stride, stride), [(pad, pad), (pad, pad)],
            dimension_numbers=("NCHW", "OIHW", "NCHW"))
        return y + b[None, :, None, None]

    def bn(z, g, b, m, v):
        return ((z - m[None, :, None, None]) / jnp.sqrt(v[None, :, None, None] + eps)
                * g[None, :, None, None] + b[None, :, None, None])

    y = jax.nn.relu(bn(conv(x, params["w1"], params["b1"], strides, 1),
                       params["gamma1"], params["beta1"], params["mean1"], params["var1"]))
    y = bn(conv(y, params["w2"], params["b2"], 1, 1),
           params["gamma2"], params["beta2"], params["mean2"], params["var2"])
    if use_1x1conv:
        x = conv(x, params["w3"], params["b3"], strides, 0)
    return jax.nn.relu(y + x)


# ---------------------------------------------------------------------------
# Deterministic parameter init (synthetic, no checkpoint)
# ---------------------------------------------------------------------------
def make_params(key, cin, cout, use_1x1conv):
    ks = jax.random.split(key, 12)
    p = {
        "w1": jax.random.normal(ks[0], (cout, cin, 3, 3), jnp.float32) * 0.1,
        "b1": jax.random.normal(ks[1], (cout,), jnp.float32) * 0.1,
        "w2": jax.random.normal(ks[2], (cout, cout, 3, 3), jnp.float32) * 0.1,
        "b2": jax.random.normal(ks[3], (cout,), jnp.float32) * 0.1,
        "gamma1": 1.0 + 0.1 * jax.random.normal(ks[4], (cout,), jnp.float32),
        "beta1": 0.1 * jax.random.normal(ks[5], (cout,), jnp.float32),
        "mean1": 0.1 * jax.random.normal(ks[6], (cout,), jnp.float32),
        "var1": 1.0 + 0.1 * jax.random.uniform(ks[7], (cout,), jnp.float32),
        "gamma2": 1.0 + 0.1 * jax.random.normal(ks[8], (cout,), jnp.float32),
        "beta2": 0.1 * jax.random.normal(ks[9], (cout,), jnp.float32),
        "mean2": 0.1 * jax.random.normal(ks[10], (cout,), jnp.float32),
        "var2": 1.0 + 0.1 * jax.random.uniform(ks[11], (cout,), jnp.float32),
    }
    if use_1x1conv:
        k3a, k3b = jax.random.split(jax.random.fold_in(key, 99))
        p["w3"] = jax.random.normal(k3a, (cout, cin, 1, 1), jnp.float32) * 0.1
        p["b3"] = jax.random.normal(k3b, (cout,), jnp.float32) * 0.1
    return p


if __name__ == "__main__":
    key = jax.random.PRNGKey(0)
    kx, kp1, kp2 = jax.random.split(key, 3)
    x = jax.random.normal(kx, (2, 4, 16, 16), jnp.float32)

    # Case 1: identity skip (input_channels == num_channels, stride 1)
    params1 = make_params(kp1, 4, 4, use_1x1conv=False)
    ref1 = residual_reference(x, params1, use_1x1conv=False, strides=1)

    out1_f32 = jax.block_until_ready(residual_forward(
        x, params1, use_1x1conv=False, strides=1, compute_dtype=jnp.float32))
    assert out1_f32.shape == (2, 4, 16, 16)
    assert jnp.allclose(out1_f32, ref1, atol=1e-4, rtol=1e-4), "mismatch (identity, f32)"

    # Same case with forced spatial tiling (3 ragged row tiles over ho=16) to
    # exercise the multi-tile grid path used for large feature maps.
    out1_tiled = jax.block_until_ready(residual_forward(
        x, params1, use_1x1conv=False, strides=1, compute_dtype=jnp.float32,
        max_tile_rows=6))
    assert jnp.allclose(out1_tiled, ref1, atol=1e-4, rtol=1e-4), "mismatch (tiled, f32)"

    out1_bf16 = jax.block_until_ready(residual_forward(
        x, params1, use_1x1conv=False, strides=1))          # bf16 MXU streaming
    assert jnp.allclose(out1_bf16, ref1, atol=1e-1, rtol=1e-1), "mismatch (identity, bf16)"

    # Case 2: 1x1-conv skip with stride 2 and channel change
    params2 = make_params(kp2, 4, 8, use_1x1conv=True)
    ref2 = residual_reference(x, params2, use_1x1conv=True, strides=2)

    out2_f32 = jax.block_until_ready(residual_forward(
        x, params2, use_1x1conv=True, strides=2, compute_dtype=jnp.float32))
    assert out2_f32.shape == (2, 8, 8, 8)
    assert jnp.allclose(out2_f32, ref2, atol=1e-4, rtol=1e-4), "mismatch (1x1 skip, f32)"

    out2_bf16 = jax.block_until_ready(residual_forward(
        x, params2, use_1x1conv=True, strides=2))
    assert jnp.allclose(out2_bf16, ref2, atol=1e-1, rtol=1e-1), "mismatch (1x1 skip, bf16)"

    print("KERNEL_OK")
</pallas_src>

<mosaic_0001>
module attributes {stable_mosaic.version = 11 : i64} {
  func.func @_conv_kernel(%arg0: i32, %arg1: i32, %arg2: memref<1x1x18x18x4xf32, #tpu.memory_space<vmem>>, %arg3: memref<9x4x128xf32, #tpu.memory_space<vmem>>, %arg4: memref<1x128xf32, #tpu.memory_space<vmem>>, %arg5: memref<1x1x256x128xf32, #tpu.memory_space<vmem>>) attributes {dimension_semantics = [#tpu.dimension_semantics<parallel>, #tpu.dimension_semantics<parallel>], iteration_bounds = array<i64: 2, 1>, scalar_prefetch = 0 : i64, scratch_operands = 0 : i64, tpu.core_type = #tpu.core_type<tc>, window_params = [{transform_indices = @transform_0, window_bounds = array<i64: 1, 1, 18, 18, 4>}, {pipeline_mode = #tpu.pipeline_mode<synchronous>, transform_indices = @transform_1, window_bounds = array<i64: 9, 4, 128>}, {pipeline_mode = #tpu.pipeline_mode<synchronous>, transform_indices = @transform_2, window_bounds = array<i64: 1, 128>}, {transform_indices = @transform_3, window_bounds = array<i64: 1, 1, 256, 128>}]} {
    %c0 = arith.constant 0 : index
    %c0_0 = arith.constant 0 : index
    %c0_1 = arith.constant 0 : index
    %c0_2 = arith.constant 0 : index
    %c0_3 = arith.constant 0 : index
    %0 = vector.load %arg2[%c0, %c0_0, %c0_1, %c0_2, %c0_3] : memref<1x1x18x18x4xf32, #tpu.memory_space<vmem>>, vector<1x1x18x18x4xf32>
    %1 = vector.shape_cast %0 : vector<1x1x18x18x4xf32> to vector<18x18x4xf32>
    %cst = arith.constant 0.000000e+00 : f32
    %2 = vector.broadcast %cst : f32 to vector<256x128xf32>
    %3 = vector.extract_strided_slice %1 {offsets = [0, 0, 0], sizes = [16, 16, 4], strides = [1, 1, 1]} : vector<18x18x4xf32> to vector<16x16x4xf32>
    %4 = vector.shape_cast %3 : vector<16x16x4xf32> to vector<256x4xf32>
    %c0_4 = arith.constant 0 : index
    %c0_5 = arith.constant 0 : index
    %c0_6 = arith.constant 0 : index
    %5 = vector.load %arg3[%c0_4, %c0_5, %c0_6] : memref<9x4x128xf32, #tpu.memory_space<vmem>>, vector<1x4x128xf32>
    %6 = vector.shape_cast %5 : vector<1x4x128xf32> to vector<4x128xf32>
    %cst_7 = arith.constant dense<0.000000e+00> : vector<256x128xf32>
    %7 = tpu.matmul %4, %6, %cst_7 {dimension_numbers = #tpu.dot_dimension_numbers<[1], [0], [0], [1], [0, 0, 1, 1], [], []>} : vector<256x4xf32>, vector<4x128xf32>, vector<256x128xf32> -> vector<256x128xf32>
    %8 = arith.addf %2, %7 : vector<256x128xf32>
    %9 = vector.extract_strided_slice %1 {offsets = [0, 1, 0], sizes = [16, 16, 4], strides = [1, 1, 1]} : vector<18x18x4xf32> to vector<16x16x4xf32>
    %10 = vector.shape_cast %9 : vector<16x16x4xf32> to vector<256x4xf32>
    %c1 = arith.constant 1 : index
    %c0_8 = arith.constant 0 : index
    %c0_9 = arith.constant 0 : index
    %11 = vector.load %arg3[%c1, %c0_8, %c0_9] : memref<9x4x128xf32, #tpu.memory_space<vmem>>, vector<1x4x128xf32>
    %12 = vector.shape_cast %11 : vector<1x4x128xf32> to vector<4x128xf32>
    %cst_10 = arith.constant dense<0.000000e+00> : vector<256x128xf32>
    %13 = tpu.matmul %10, %12, %cst_10 {dimension_numbers = #tpu.dot_dimension_numbers<[1], [0], [0], [1], [0, 0, 1, 1], [], []>} : vector<256x4xf32>, vector<4x128xf32>, vector<256x128xf32> -> vector<256x128xf32>
    %14 = arith.addf %8, %13 : vector<256x128xf32>
    %15 = vector.extract_strided_slice %1 {offsets = [0, 2, 0], sizes = [16, 16, 4], strides = [1, 1, 1]} : vector<18x18x4xf32> to vector<16x16x4xf32>
    %16 = vector.shape_cast %15 : vector<16x16x4xf32> to vector<256x4xf32>
    %c2 = arith.constant 2 : index
    %c0_11 = arith.constant 0 : index
    %c0_12 = arith.constant 0 : index
    %17 = vector.load %arg3[%c2, %c0_11, %c0_12] : memref<9x4x128xf32, #tpu.memory_space<vmem>>, vector<1x4x128xf32>
    %18 = vector.shape_cast %17 : vector<1x4x128xf32> to vector<4x128xf32>
    %cst_13 = arith.constant dense<0.000000e+00> : vector<256x128xf32>
    %19 = tpu.matmul %16, %18, %cst_13 {dimension_numbers = #tpu.dot_dimension_numbers<[1], [0], [0], [1], [0, 0, 1, 1], [], []>} : vector<256x4xf32>, vector<4x128xf32>, vector<256x128xf32> -> vector<256x128xf32>
    %20 = arith.addf %14, %19 : vector<256x128xf32>
    %21 = vector.extract_strided_slice %1 {offsets = [1, 0, 0], sizes = [16, 16, 4], strides = [1, 1, 1]} : vector<18x18x4xf32> to vector<16x16x4xf32>
    %22 = vector.shape_cast %21 : vector<16x16x4xf32> to vector<256x4xf32>
    %c3 = arith.constant 3 : index
    %c0_14 = arith.constant 0 : index
    %c0_15 = arith.constant 0 : index
    %23 = vector.load %arg3[%c3, %c0_14, %c0_15] : memref<9x4x128xf32, #tpu.memory_space<vmem>>, vector<1x4x128xf32>
    %24 = vector.shape_cast %23 : vector<1x4x128xf32> to vector<4x128xf32>
    %cst_16 = arith.constant dense<0.000000e+00> : vector<256x128xf32>
    %25 = tpu.matmul %22, %24, %cst_16 {dimension_numbers = #tpu.dot_dimension_numbers<[1], [0], [0], [1], [0, 0, 1, 1], [], []>} : vector<256x4xf32>, vector<4x128xf32>, vector<256x128xf32> -> vector<256x128xf32>
    %26 = arith.addf %20, %25 : vector<256x128xf32>
    %27 = vector.extract_strided_slice %1 {offsets = [1, 1, 0], sizes = [16, 16, 4], strides = [1, 1, 1]} : vector<18x18x4xf32> to vector<16x16x4xf32>
    %28 = vector.shape_cast %27 : vector<16x16x4xf32> to vector<256x4xf32>
    %c4 = arith.constant 4 : index
    %c0_17 = arith.constant 0 : index
    %c0_18 = arith.constant 0 : index
    %29 = vector.load %arg3[%c4, %c0_17, %c0_18] : memref<9x4x128xf32, #tpu.memory_space<vmem>>, vector<1x4x128xf32>
    %30 = vector.shape_cast %29 : vector<1x4x128xf32> to vector<4x128xf32>
    %cst_19 = arith.constant dense<0.000000e+00> : vector<256x128xf32>
    %31 = tpu.matmul %28, %30, %cst_19 {dimension_numbers = #tpu.dot_dimension_numbers<[1], [0], [0], [1], [0, 0, 1, 1], [], []>} : vector<256x4xf32>, vector<4x128xf32>, vector<256x128xf32> -> vector<256x128xf32>
    %32 = arith.addf %26, %31 : vector<256x128xf32>
    %33 = vector.extract_strided_slice %1 {offsets = [1, 2, 0], sizes = [16, 16, 4], strides = [1, 1, 1]} : vector<18x18x4xf32> to vector<16x16x4xf32>
    %34 = vector.shape_cast %33 : vector<16x16x4xf32> to vector<256x4xf32>
    %c5 = arith.constant 5 : index
    %c0_20 = arith.constant 0 : index
    %c0_21 = arith.constant 0 : index
    %35 = vector.load %arg3[%c5, %c0_20, %c0_21] : memref<9x4x128xf32, #tpu.memory_space<vmem>>, vector<1x4x128xf32>
    %36 = vector.shape_cast %35 : vector<1x4x128xf32> to vector<4x128xf32>
    %cst_22 = arith.constant dense<0.000000e+00> : vector<256x128xf32>
    %37 = tpu.matmul %34, %36, %cst_22 {dimension_numbers = #tpu.dot_dimension_numbers<[1], [0], [0], [1], [0, 0, 1, 1], [], []>} : vector<256x4xf32>, vector<4x128xf32>, vector<256x128xf32> -> vector<256x128xf32>
    %38 = arith.addf %32, %37 : vector<256x128xf32>
    %39 = vector.extract_strided_slice %1 {offsets = [2, 0, 0], sizes = [16, 16, 4], strides = [1, 1, 1]} : vector<18x18x4xf32> to vector<16x16x4xf32>
    %40 = vector.shape_cast %39 : vector<16x16x4xf32> to vector<256x4xf32>
    %c6 = arith.constant 6 : index
    %c0_23 = arith.constant 0 : index
    %c0_24 = arith.constant 0 : index
    %41 = vector.load %arg3[%c6, %c0_23, %c0_24] : memref<9x4x128xf32, #tpu.memory_space<vmem>>, vector<1x4x128xf32>
    %42 = vector.shape_cast %41 : vector<1x4x128xf32> to vector<4x128xf32>
    %cst_25 = arith.constant dense<0.000000e+00> : vector<256x128xf32>
    %43 = tpu.matmul %40, %42, %cst_25 {dimension_numbers = #tpu.dot_dimension_numbers<[1], [0], [0], [1], [0, 0, 1, 1], [], []>} : vector<256x4xf32>, vector<4x128xf32>, vector<256x128xf32> -> vector<256x128xf32>
    %44 = arith.addf %38, %43 : vector<256x128xf32>
    %45 = vector.extract_strided_slice %1 {offsets = [2, 1, 0], sizes = [16, 16, 4], strides = [1, 1, 1]} : vector<18x18x4xf32> to vector<16x16x4xf32>
    %46 = vector.shape_cast %45 : vector<16x16x4xf32> to vector<256x4xf32>
    %c7 = arith.constant 7 : index
    %c0_26 = arith.constant 0 : index
    %c0_27 = arith.constant 0 : index
    %47 = vector.load %arg3[%c7, %c0_26, %c0_27] : memref<9x4x128xf32, #tpu.memory_space<vmem>>, vector<1x4x128xf32>
    %48 = vector.shape_cast %47 : vector<1x4x128xf32> to vector<4x128xf32>
    %cst_28 = arith.constant dense<0.000000e+00> : vector<256x128xf32>
    %49 = tpu.matmul %46, %48, %cst_28 {dimension_numbers = #tpu.dot_dimension_numbers<[1], [0], [0], [1], [0, 0, 1, 1], [], []>} : vector<256x4xf32>, vector<4x128xf32>, vector<256x128xf32> -> vector<256x128xf32>
    %50 = arith.addf %44, %49 : vector<256x128xf32>
    %51 = vector.extract_strided_slice %1 {offsets = [2, 2, 0], sizes = [16, 16, 4], strides = [1, 1, 1]} : vector<18x18x4xf32> to vector<16x16x4xf32>
    %52 = vector.shape_cast %51 : vector<16x16x4xf32> to vector<256x4xf32>
    %c8 = arith.constant 8 : index
    %c0_29 = arith.constant 0 : index
    %c0_30 = arith.constant 0 : index
    %53 = vector.load %arg3[%c8, %c0_29, %c0_30] : memref<9x4x128xf32, #tpu.memory_space<vmem>>, vector<1x4x128xf32>
    %54 = vector.shape_cast %53 : vector<1x4x128xf32> to vector<4x128xf32>
    %cst_31 = arith.constant dense<0.000000e+00> : vector<256x128xf32>
    %55 = tpu.matmul %52, %54, %cst_31 {dimension_numbers = #tpu.dot_dimension_numbers<[1], [0], [0], [1], [0, 0, 1, 1], [], []>} : vector<256x4xf32>, vector<4x128xf32>, vector<256x128xf32> -> vector<256x128xf32>
    %56 = arith.addf %50, %55 : vector<256x128xf32>
    %c0_32 = arith.constant 0 : index
    %c0_33 = arith.constant 0 : index
    %57 = vector.load %arg4[%c0_32, %c0_33] : memref<1x128xf32, #tpu.memory_space<vmem>>, vector<1x128xf32>
    %58 = vector.broadcast %57 : vector<1x128xf32> to vector<256x128xf32>
    %59 = arith.addf %56, %58 : vector<256x128xf32>
    %cst_34 = arith.constant 0.000000e+00 : f32
    %60 = vector.broadcast %cst_34 : f32 to vector<256x128xf32>
    %61 = arith.maximumf %59, %60 : vector<256x128xf32>
    %c0_35 = arith.constant 0 : index
    %c0_36 = arith.constant 0 : index
    %c0_37 = arith.constant 0 : index
    %c0_38 = arith.constant 0 : index
    %62 = vector.load %arg5[%c0_35, %c0_36, %c0_37, %c0_38] : memref<1x1x256x128xf32, #tpu.memory_space<vmem>>, vector<1x1x256x128xf32>
    %63 = vector.shape_cast %62 : vector<1x1x256x128xf32> to vector<256x128xf32>
    %64 = vector.shape_cast %61 : vector<256x128xf32> to vector<1x1x256x128xf32>
    tpu.vector_store %arg5[%c0_35, %c0_36, %c0_37, %c0_38], %64 {strides = array<i32>} : memref<1x1x256x128xf32, #tpu.memory_space<vmem>>, vector<1x1x256x128xf32>,
    return
  }
  func.func @transform_0(%arg0: i32, %arg1: i32) -> (i32, i32, i32, i32, i32) {
    %c0_i32 = arith.constant 0 : i32
    %c0_i32_0 = arith.constant 0 : i32
    %c0_i32_1 = arith.constant 0 : i32
    %c0_i32_2 = arith.constant 0 : i32
    return %arg0, %arg1, %c0_i32, %c0_i32_0, %c0_i32_1 : i32, i32, i32, i32, i32
  }
  func.func @transform_1(%arg0: i32, %arg1: i32) -> (i32, i32, i32) {
    %c0_i32 = arith.constant 0 : i32
    %c0_i32_0 = arith.constant 0 : i32
    %c0_i32_1 = arith.constant 0 : i32
    %c0_i32_2 = arith.constant 0 : i32
    return %c0_i32, %c0_i32_0, %c0_i32_1 : i32, i32, i32
  }
  func.func @transform_2(%arg0: i32, %arg1: i32) -> (i32, i32) {
    %c0_i32 = arith.constant 0 : i32
    %c0_i32_0 = arith.constant 0 : i32
    %c0_i32_1 = arith.constant 0 : i32
    return %c0_i32, %c0_i32_0 : i32, i32
  }
  func.func @transform_3(%arg0: i32, %arg1: i32) -> (i32, i32, i32, i32) {
    %c0_i32 = arith.constant 0 : i32
    %c0_i32_0 = arith.constant 0 : i32
    %c0_i32_1 = arith.constant 0 : i32
    return %arg0, %arg1, %c0_i32, %c0_i32_0 : i32, i32, i32, i32
  }
}

module attributes {stable_mosaic.version = 11 : i64} {
  func.func @_conv_kernel(%arg0: i32, %arg1: i32, %arg2: memref<1x1x18x18x4xf32, #tpu.memory_space<vmem>>, %arg3: memref<9x4x128xf32, #tpu.memory_space<vmem>>, %arg4: memref<1x128xf32, #tpu.memory_space<vmem>>, %arg5: memref<1x1x256x128xf32, #tpu.memory_space<vmem>>) attributes {dimension_semantics = [#tpu.dimension_semantics<parallel>, #tpu.dimension_semantics<parallel>], iteration_bounds = array<i64: 2, 1>, scalar_prefetch = 0 : i64, scratch_operands = 0 : i64, tpu.core_type = #tpu.core_type<tc>, window_params = [{transform_indices = @transform_0, window_bounds = array<i64: 1, 1, 18, 18, 4>}, {pipeline_mode = #tpu.pipeline_mode<synchronous>, transform_indices = @transform_1, window_bounds = array<i64: 9, 4, 128>}, {pipeline_mode = #tpu.pipeline_mode<synchronous>, transform_indices = @transform_2, window_bounds = array<i64: 1, 128>}, {transform_indices = @transform_3, window_bounds = array<i64: 1, 1, 256, 128>}]} {
    %c0 = arith.constant 0 : index
    %c0_0 = arith.constant 0 : index
    %c0_1 = arith.constant 0 : index
    %c0_2 = arith.constant 0 : index
    %c0_3 = arith.constant 0 : index
    %0 = vector.load %arg2[%c0, %c0_0, %c0_1, %c0_2, %c0_3] : memref<1x1x18x18x4xf32, #tpu.memory_space<vmem>>, vector<1x1x18x18x4xf32>
    %1 = vector.shape_cast %0 : vector<1x1x18x18x4xf32> to vector<18x18x4xf32>
    %cst = arith.constant 0.000000e+00 : f32
    %2 = vector.broadcast %cst : f32 to vector<256x128xf32>
    %3 = vector.extract_strided_slice %1 {offsets = [0, 0, 0], sizes = [16, 16, 4], strides = [1, 1, 1]} : vector<18x18x4xf32> to vector<16x16x4xf32>
    %4 = vector.shape_cast %3 : vector<16x16x4xf32> to vector<256x4xf32>
    %c0_4 = arith.constant 0 : index
    %c0_5 = arith.constant 0 : index
    %c0_6 = arith.constant 0 : index
    %5 = vector.load %arg3[%c0_4, %c0_5, %c0_6] : memref<9x4x128xf32, #tpu.memory_space<vmem>>, vector<1x4x128xf32>
    %6 = vector.shape_cast %5 : vector<1x4x128xf32> to vector<4x128xf32>
    %cst_7 = arith.constant dense<0.000000e+00> : vector<256x128xf32>
    %7 = tpu.matmul %4, %6, %cst_7 {dimension_numbers = #tpu.dot_dimension_numbers<[1], [0], [0], [1], [0, 0, 1, 1], [], []>} : vector<256x4xf32>, vector<4x128xf32>, vector<256x128xf32> -> vector<256x128xf32>
    %8 = arith.addf %2, %7 : vector<256x128xf32>
    %9 = vector.extract_strided_slice %1 {offsets = [0, 1, 0], sizes = [16, 16, 4], strides = [1, 1, 1]} : vector<18x18x4xf32> to vector<16x16x4xf32>
    %10 = vector.shape_cast %9 : vector<16x16x4xf32> to vector<256x4xf32>
    %c1 = arith.constant 1 : index
    %c0_8 = arith.constant 0 : index
    %c0_9 = arith.constant 0 : index
    %11 = vector.load %arg3[%c1, %c0_8, %c0_9] : memref<9x4x128xf32, #tpu.memory_space<vmem>>, vector<1x4x128xf32>
    %12 = vector.shape_cast %11 : vector<1x4x128xf32> to vector<4x128xf32>
    %cst_10 = arith.constant dense<0.000000e+00> : vector<256x128xf32>
    %13 = tpu.matmul %10, %12, %cst_10 {dimension_numbers = #tpu.dot_dimension_numbers<[1], [0], [0], [1], [0, 0, 1, 1], [], []>} : vector<256x4xf32>, vector<4x128xf32>, vector<256x128xf32> -> vector<256x128xf32>
    %14 = arith.addf %8, %13 : vector<256x128xf32>
    %15 = vector.extract_strided_slice %1 {offsets = [0, 2, 0], sizes = [16, 16, 4], strides = [1, 1, 1]} : vector<18x18x4xf32> to vector<16x16x4xf32>
    %16 = vector.shape_cast %15 : vector<16x16x4xf32> to vector<256x4xf32>
    %c2 = arith.constant 2 : index
    %c0_11 = arith.constant 0 : index
    %c0_12 = arith.constant 0 : index
    %17 = vector.load %arg3[%c2, %c0_11, %c0_12] : memref<9x4x128xf32, #tpu.memory_space<vmem>>, vector<1x4x128xf32>
    %18 = vector.shape_cast %17 : vector<1x4x128xf32> to vector<4x128xf32>
    %cst_13 = arith.constant dense<0.000000e+00> : vector<256x128xf32>
    %19 = tpu.matmul %16, %18, %cst_13 {dimension_numbers = #tpu.dot_dimension_numbers<[1], [0], [0], [1], [0, 0, 1, 1], [], []>} : vector<256x4xf32>, vector<4x128xf32>, vector<256x128xf32> -> vector<256x128xf32>
    %20 = arith.addf %14, %19 : vector<256x128xf32>
    %21 = vector.extract_strided_slice %1 {offsets = [1, 0, 0], sizes = [16, 16, 4], strides = [1, 1, 1]} : vector<18x18x4xf32> to vector<16x16x4xf32>
    %22 = vector.shape_cast %21 : vector<16x16x4xf32> to vector<256x4xf32>
    %c3 = arith.constant 3 : index
    %c0_14 = arith.constant 0 : index
    %c0_15 = arith.constant 0 : index
    %23 = vector.load %arg3[%c3, %c0_14, %c0_15] : memref<9x4x128xf32, #tpu.memory_space<vmem>>, vector<1x4x128xf32>
    %24 = vector.shape_cast %23 : vector<1x4x128xf32> to vector<4x128xf32>
    %cst_16 = arith.constant dense<0.000000e+00> : vector<256x128xf32>
    %25 = tpu.matmul %22, %24, %cst_16 {dimension_numbers = #tpu.dot_dimension_numbers<[1], [0], [0], [1], [0, 0, 1, 1], [], []>} : vector<256x4xf32>, vector<4x128xf32>, vector<256x128xf32> -> vector<256x128xf32>
    %26 = arith.addf %20, %25 : vector<256x128xf32>
    %27 = vector.extract_strided_slice %1 {offsets = [1, 1, 0], sizes = [16, 16, 4], strides = [1, 1, 1]} : vector<18x18x4xf32> to vector<16x16x4xf32>
    %28 = vector.shape_cast %27 : vector<16x16x4xf32> to vector<256x4xf32>
    %c4 = arith.constant 4 : index
    %c0_17 = arith.constant 0 : index
    %c0_18 = arith.constant 0 : index
    %29 = vector.load %arg3[%c4, %c0_17, %c0_18] : memref<9x4x128xf32, #tpu.memory_space<vmem>>, vector<1x4x128xf32>
    %30 = vector.shape_cast %29 : vector<1x4x128xf32> to vector<4x128xf32>
    %cst_19 = arith.constant dense<0.000000e+00> : vector<256x128xf32>
    %31 = tpu.matmul %28, %30, %cst_19 {dimension_numbers = #tpu.dot_dimension_numbers<[1], [0], [0], [1], [0, 0, 1, 1], [], []>} : vector<256x4xf32>, vector<4x128xf32>, vector<256x128xf32> -> vector<256x128xf32>
    %32 = arith.addf %26, %31 : vector<256x128xf32>
    %33 = vector.extract_strided_slice %1 {offsets = [1, 2, 0], sizes = [16, 16, 4], strides = [1, 1, 1]} : vector<18x18x4xf32> to vector<16x16x4xf32>
    %34 = vector.shape_cast %33 : vector<16x16x4xf32> to vector<256x4xf32>
    %c5 = arith.constant 5 : index
    %c0_20 = arith.constant 0 : index
    %c0_21 = arith.constant 0 : index
    %35 = vector.load %arg3[%c5, %c0_20, %c0_21] : memref<9x4x128xf32, #tpu.memory_space<vmem>>, vector<1x4x128xf32>
    %36 = vector.shape_cast %35 : vector<1x4x128xf32> to vector<4x128xf32>
    %cst_22 = arith.constant dense<0.000000e+00> : vector<256x128xf32>
    %37 = tpu.matmul %34, %36, %cst_22 {dimension_numbers = #tpu.dot_dimension_numbers<[1], [0], [0], [1], [0, 0, 1, 1], [], []>} : vector<256x4xf32>, vector<4x128xf32>, vector<256x128xf32> -> vector<256x128xf32>
    %38 = arith.addf %32, %37 : vector<256x128xf32>
    %39 = vector.extract_strided_slice %1 {offsets = [2, 0, 0], sizes = [16, 16, 4], strides = [1, 1, 1]} : vector<18x18x4xf32> to vector<16x16x4xf32>
    %40 = vector.shape_cast %39 : vector<16x16x4xf32> to vector<256x4xf32>
    %c6 = arith.constant 6 : index
    %c0_23 = arith.constant 0 : index
    %c0_24 = arith.constant 0 : index
    %41 = vector.load %arg3[%c6, %c0_23, %c0_24] : memref<9x4x128xf32, #tpu.memory_space<vmem>>, vector<1x4x128xf32>
    %42 = vector.shape_cast %41 : vector<1x4x128xf32> to vector<4x128xf32>
    %cst_25 = arith.constant dense<0.000000e+00> : vector<256x128xf32>
    %43 = tpu.matmul %40, %42, %cst_25 {dimension_numbers = #tpu.dot_dimension_numbers<[1], [0], [0], [1], [0, 0, 1, 1], [], []>} : vector<256x4xf32>, vector<4x128xf32>, vector<256x128xf32> -> vector<256x128xf32>
    %44 = arith.addf %38, %43 : vector<256x128xf32>
    %45 = vector.extract_strided_slice %1 {offsets = [2, 1, 0], sizes = [16, 16, 4], strides = [1, 1, 1]} : vector<18x18x4xf32> to vector<16x16x4xf32>
    %46 = vector.shape_cast %45 : vector<16x16x4xf32> to vector<256x4xf32>
    %c7 = arith.constant 7 : index
    %c0_26 = arith.constant 0 : index
    %c0_27 = arith.constant 0 : index
    %47 = vector.load %arg3[%c7, %c0_26, %c0_27] : memref<9x4x128xf32, #tpu.memory_space<vmem>>, vector<1x4x128xf32>
    %48 = vector.shape_cast %47 : vector<1x4x128xf32> to vector<4x128xf32>
    %cst_28 = arith.constant dense<0.000000e+00> : vector<256x128xf32>
    %49 = tpu.matmul %46, %48, %cst_28 {dimension_numbers = #tpu.dot_dimension_numbers<[1], [0], [0], [1], [0, 0, 1, 1], [], []>} : vector<256x4xf32>, vector<4x128xf32>, vector<256x128xf32> -> vector<256x128xf32>
    %50 = arith.addf %44, %49 : vector<256x128xf32>
    %51 = vector.extract_strided_slice %1 {offsets = [2, 2, 0], sizes = [16, 16, 4], strides = [1, 1, 1]} : vector<18x18x4xf32> to vector<16x16x4xf32>
    %52 = vector.shape_cast %51 : vector<16x16x4xf32> to vector<256x4xf32>
    %c8 = arith.constant 8 : index
    %c0_29 = arith.constant 0 : index
    %c0_30 = arith.constant 0 : index
    %53 = vector.load %arg3[%c8, %c0_29, %c0_30] : memref<9x4x128xf32, #tpu.memory_space<vmem>>, vector<1x4x128xf32>
    %54 = vector.shape_cast %53 : vector<1x4x128xf32> to vector<4x128xf32>
    %cst_31 = arith.constant dense<0.000000e+00> : vector<256x128xf32>
    %55 = tpu.matmul %52, %54, %cst_31 {dimension_numbers = #tpu.dot_dimension_numbers<[1], [0], [0], [1], [0, 0, 1, 1], [], []>} : vector<256x4xf32>, vector<4x128xf32>, vector<256x128xf32> -> vector<256x128xf32>
    %56 = arith.addf %50, %55 : vector<256x128xf32>
    %c0_32 = arith.constant 0 : index
    %c0_33 = arith.constant 0 : index
    %57 = vector.load %arg4[%c0_32, %c0_33] : memref<1x128xf32, #tpu.memory_space<vmem>>, vector<1x128xf32>
    %58 = vector.broadcast %57 : vector<1x128xf32> to vector<256x128xf32>
    %59 = arith.addf %56, %58 : vector<256x128xf32>
    %cst_34 = arith.constant 0.000000e+00 : f32
    %60 = vector.broadcast %cst_34 : f32 to vector<256x128xf32>
    %61 = arith.maximumf %59, %60 : vector<256x128xf32>
    %c0_35 = arith.constant 0 : index
    %c0_36 = arith.constant 0 : index
    %c0_37 = arith.constant 0 : index
    %c0_38 = arith.constant 0 : index
    %62 = vector.load %arg5[%c0_35, %c0_36, %c0_37, %c0_38] : memref<1x1x256x128xf32, #tpu.memory_space<vmem>>, vector<1x1x256x128xf32>
    %63 = vector.shape_cast %62 : vector<1x1x256x128xf32> to vector<256x128xf32>
    %64 = vector.shape_cast %61 : vector<256x128xf32> to vector<1x1x256x128xf32>
    tpu.vector_store %arg5[%c0_35, %c0_36, %c0_37, %c0_38], %64 {strides = array<i32>} : memref<1x1x256x128xf32, #tpu.memory_space<vmem>>, vector<1x1x256x128xf32>,
    return
  }
  func.func @transform_0(%arg0: i32, %arg1: i32) -> (i32, i32, i32, i32, i32) {
    %c0_i32 = arith.constant 0 : i32
    %c0_i32_0 = arith.constant 0 : i32
    %c0_i32_1 = arith.constant 0 : i32
    %c0_i32_2 = arith.constant 0 : i32
    return %arg0, %arg1, %c0_i32, %c0_i32_0, %c0_i32_1 : i32, i32, i32, i32, i32
  }
  func.func @transform_1(%arg0: i32, %arg1: i32) -> (i32, i32, i32) {
    %c0_i32 = arith.constant 0 : i32
    %c0_i32_0 = arith.constant 0 : i32
    %c0_i32_1 = arith.constant 0 : i32
    %c0_i32_2 = arith.constant 0 : i32
    return %c0_i32, %c0_i32_0, %c0_i32_1 : i32, i32, i32
  }
  func.func @transform_2(%arg0: i32, %arg1: i32) -> (i32, i32) {
    %c0_i32 = arith.constant 0 : i32
    %c0_i32_0 = arith.constant 0 : i32
    %c0_i32_1 = arith.constant 0 : i32
    return %c0_i32, %c0_i32_0 : i32, i32
  }
  func.func @transform_3(%arg0: i32, %arg1: i32) -> (i32, i32, i32, i32) {
    %c0_i32 = arith.constant 0 : i32
    %c0_i32_0 = arith.constant 0 : i32
    %c0_i32_1 = arith.constant 0 : i32
    return %arg0, %arg1, %c0_i32, %c0_i32_0 : i32, i32, i32, i32
  }
}

</mosaic_0001>

<bundles_post_ra>
// kernel: tpu_custom_call.1
= control target key start
LH: loop header
LB: loop body
LE: loop exit
PB: predicated region body
PF: predicated region fallthrough
CT: control target
= control target key end

     0   :  { %8 = vsyncpa [#allocation3], 0  ;;  %s4118_s0 = inlined_call_operand.vmem [shape: f32[2,1,18,18,4], index: 0, kind: input, shape index: {}]   ;;  %s4119_s1 = inlined_call_operand.vmem [shape: f32[9,4,128], index: 1, kind: input, shape index: {}]   ;;  %s4120_s2 = inlined_call_operand.vmem [shape: f32[1,128], index: 2, kind: input, shape index: {}]   ;;  %s4121_s3 = inlined_call_operand.hbm [shape: f32[2,1,256,128], index: 3, kind: output, shape index: {}]  }
   0x1   :  { %10 = vsyncpa [#allocation3 + $0x1], 0  ;;  %s2696_s12 = smov 0   ;;  %s2698_s13 = smov 0  }
   0x2   :  { %s2700_s14 = smov 0   ;;  %s2702_s15 = smov 0  }
   0x3   :  { %s2704_s16 = smov 0   ;;  %s2706_s17 = smov 0  }
   0x4 LB: > { %s2190_s18 = sadd.s32 4294967295, %s2672_s17   ;;  %s2191_s19 = sadd.s32 4294967294, %s2672_s17   ;;  %s2672_s17 = sphi %s2706_s17, %s16_s17   ;;  %s2668_s16 = sphi %s2704_s16, %s4341_s16   ;;  %s2664_s15 = sphi %s2702_s15, %s4340_s15   ;;  %s2660_s14 = sphi %s2700_s14, %s4339_s14   ;;  %s2656_s13 = sphi %s2698_s13, %s4338_s13   ;;  %s2652_s12 = sphi %s2696_s12, %s4337_s12  }
   0x5   : > { %s28_s20 = sadd.s32 1, %s2668_s16  ;;  %s107_s21 = sadd.s32 1, %s2660_s14 }
   0x6   : > { %p30_p0 = scmp.ge.s32.totalorder %s28_s20, 2  ;;  %p117_p1 = scmp.ne.s32.totalorder %s2660_s14, %s2656_s13 }
   0x7   : > { %p118_p2 = scmp.eq.s32.totalorder %s2190_s18, 1  ;;  %p123_p3 = scmp.ne.s32.totalorder %s2656_s13, %s2652_s12 }
   0x8   : > { %s4343_s20 = smov (%p30_p0, %s28_s20), 0  ;;  %p124_p5 = scmp.eq.s32.totalorder %s2191_s19, 1 }
   0x9   : > { %p2736_p4 = por %p118_p2, %p117_p1  ;;  %s102_s23 = ssub.s32 %s2668_s16, %s4343_s20 }
   0xa   : > { %p2194_p6 = scmp.ge.s32.totalorder %s2672_s17, 1  ;;  %p105_p7 = scmp.eq.s32.totalorder %s102_s23, 0 }
   0xb   : > { %p2743_p8 = por %p124_p5, %p123_p3  ;;  %p160_p9 = scmp.lt.s32.totalorder %s2672_s17, 3 }
   0xc   : > { %s2749_s25 = scalar_select %p105_p7, %s2660_s14, %s107_s21  }
   0xd   : > { %p161_p10 = pnand %p2194_p6, %p160_p9 }
   0xf   : > { %164 = sbr.rel (%p161_p10) target bundleno = 746 (0x2ea), region = 32 }
  0x14   : > { %v2197_v0 = vld [vmem:[%s4119_s1 + $0x4] sm:$0xf]  ;;  %vm448_vm0 = vcmask 1043456   ;;  %p188_p11 = scmp.lt.s32.totalorder %s2664_s15, 1  ;;  %v2264_v1 = vld [vmem:[%s4119_s1 + $0x8] sm:$0xf] }
  0x15   : > { %2508 = vmatpush.msk.msra.mxu1 %vm448_vm0, %v2197_v0  ;;  %2509 = vmatpush.msk.msra.mxu2 %vm448_vm0, %v2197_v0  ;;  %v2298_v2 = vld [vmem:[%s4119_s1 + $0xc] sm:$0xf]  ;;  %v251_v3 = vld [vmem:[%s4119_s1] sm:$0xf]  ;;  %v2332_v4 = vld [vmem:[%s4119_s1 + $0x10] sm:$0xf] }
  0x16   : > { %s189_s7 = scalar_select %p188_p11, %s2664_s15, 1  ;;  %2510 = vmatpush.msk.msra.mxu3 %vm448_vm0, %v2197_v0  ;;  %2198 = vmatpush.msk.msra.mxu0 %vm448_vm0, %v2197_v0  ;;  %vm300_vm1 = vcmask 1046528   ;;  %vm383_vm2 = vcmask 31744   ;;  %vm745_vm3 = vcmask 1045504  }
  0x17   : > { %2265 = vmatpush.msk.msrb.mxu2 %vm448_vm0, %v2264_v1  ;;  %2231 = vmatpush.msk.msrb.mxu1 %vm448_vm0, %v251_v3  ;;  %s185_s5 = sand.u32 1, %s2656_s13   ;;  %s2614_s30 = scalar_lea.hbm %s4121_s3, 512 }
  0x18   : > { %2299 = vmatpush.msk.msrb.mxu3 %vm448_vm0, %v2298_v2  ;;  %s2511_s10 = smul.u32 432, %s189_s7  ;;  %2333 = vmatpush.msk.msrb.mxu0 %vm448_vm0, %v2332_v4  ;;  %s2195_s8 = sshll.u32 %s185_s5, 8 }
  0x19   : > { %s3870_s9 = scalar_lea.vmem [#allocation2], %s2195_s8 }
  0x1a   : > { %s2779_s19 = scalar_lea.vmem %s4118_s0, %s2511_s10  ;;  %s2507_s10 = sshll.u32 %s2664_s15, 8 }
  0x1b   : > { %v2782_v5 = vld [vmem:[%s2779_s19 + $0x60] sm:$0xff]  ;;  %v2785_v6 = vld [vmem:[%s2779_s19 + $0x68] sm:$0xff]  ;;  %v2806_v17 = vld [vmem:[%s2779_s19 + $0x70] sm:$0x3]  ;;  %s2105_s21 = sshll.u32 %s3870_s9, 4  ;;  %s2091_s15 = scalar_lea.sflag [#allocation3], %s185_s5  ;;  %s2106_s21 = int_to_ptr.vmem [resolvable:$true] %s2105_s21 }
  0x1c   : > { %v2788_v7 = vld [vmem:[%s2779_s19 + $0xc0] sm:$0xff]  ;;  %v321_v8 = vrot.slane %v2782_v5, 1  ;;  %v322_v9 = vrot.slane %v2785_v6, 1  ;;  %v2793_v10 = vld [vmem:[%s2779_s19 + $0xc8] sm:$0xff]  ;;  %v2815_v20 = vld [vmem:[%s2779_s19 + $0xd0] sm:$0x3] }
  0x1d   : > { %v341_v11 = vrot.slane %v2788_v7, 1  ;;  %v2797_v12 = vld [vmem:[%s2779_s19 + $0x120] sm:$0xff]  ;;  %v2800_v13 = vld [vmem:[%s2779_s19 + $0x128] sm:$0xff]  ;;  %v342_v14 = vrot.slane %v2793_v10, 1  ;;  %v2831_v26 = vld [vmem:[%s2779_s19 + $0x130] sm:$0x3] }
  0x1e   : > { %4199 = vst [vmem:[#allocation5_spill] sm:$0xff] %v2797_v12  ;;  %v361_v15 = vrot.slane %v2797_v12, 1  ;;  %v362_v16 = vrot.slane %v2800_v13, 1  ;;  %v2809_v18 = vld [vmem:[%s2779_s19] sm:$0xff]  ;;  %v2812_v19 = vsel %vm300_vm1, %v321_v8, %v322_v9  ;;  %v2818_v21 = vld [vmem:[%s2779_s19 + $0x8] sm:$0xff]  ;;  %v324_v27 = vrot.slane %v2806_v17, 1 }
  0x1f   : > { %4200 = vst [vmem:[#allocation6_spill] sm:$0xff] %v2800_v13  ;;  %v301_v22 = vrot.slane %v2809_v18, 1  ;;  %2207 = vmatmul.msk.f32.vlgmr.msra.gmra.mxu1 %vm383_vm2, %v2812_v19  ;;  %v2824_v23 = vsel %vm300_vm1, %v341_v11, %v342_v14  ;;  %v302_v25 = vrot.slane %v2818_v21, 1  ;;  %v2839_v28 = vld [vmem:[%s2779_s19 + $0x10] sm:$0x3]  ;;  %v344_v29 = vrot.slane %v2815_v20, 1 }
  0x20   : > { %4201 = vst [vmem:[#allocation7_spill] sm:$0xff] %v2824_v23  ;;  %v2827_v24 = vsel %vm300_vm1, %v361_v15, %v362_v16  ;;  %2215 = vmatmul.msk.f32.vlgmr.msra.gmra.mxu2 %vm383_vm2, %v2824_v23  ;;  %v364_v31 = vrot.slane %v2831_v26, 1  ;;  %v304_v32 = vrot.slane %v2839_v28, 1  ;;  %v2847_v33 = vsel %vm300_vm1, %v322_v9, %v324_v27  ;;  %v2856_v36 = vld [vmem:[%s2779_s19 + $0x78] sm:$0xff]  ;;  %v2859_v37 = vld [vmem:[%s2779_s19 + $0x80] sm:$0xff]  ;;  %v2941_v4 = vld [vmem:[%s2779_s19 + $0x90] sm:$0xff] }
  0x21   : > { %4202 = vst [vmem:[#allocation8_spill] sm:$0xff] %v2827_v24  ;;  %2223 = vmatmul.msk.f32.vlgmr.msra.gmra.mxu3 %vm383_vm2, %v2827_v24  ;;  %v303_v30 = vsel %vm300_vm1, %v301_v22, %v302_v25  ;;  %v2850_v34 = vsel %vm300_vm1, %v342_v14, %v344_v29  ;;  %v2862_v38 = vld [vmem:[%s2779_s19 + $0xd8] sm:$0xff]  ;;  %v2865_v39 = vld [vmem:[%s2779_s19 + $0xe0] sm:$0xff]  ;;  %v326_v43 = vrot.slane %v2856_v36, 1  ;;  %v327_v44 = vrot.slane %v2859_v37, 1  ;;  %v2947_v9 = vld [vmem:[%s2779_s19 + $0xf0] sm:$0xff] }
  0x22   : > { %4203 = vst [vmem:[#allocation9_spill] sm:$0xff] %v2831_v26  ;;  %2199 = vmatmul.msk.f32.vlgmr.msra.gmra.mxu0 %vm383_vm2, %v303_v30  ;;  %v2853_v35 = vsel %vm300_vm1, %v362_v16, %v364_v31  ;;  %v2868_v40 = vld [vmem:[%s2779_s19 + $0x138] sm:$0xff]  ;;  %v2871_v41 = vld [vmem:[%s2779_s19 + $0x140] sm:$0xff]  ;;  %v305_v42 = vsel %vm300_vm1, %v302_v25, %v304_v32  ;;  %v346_v47 = vrot.slane %v2862_v38, 1  ;;  %v347_v48 = vrot.slane %v2865_v39, 1  ;;  %v2953_v14 = vld [vmem:[%s2779_s19 + $0x150] sm:$0xff] }
  0x23   : > { %4204 = vst [vmem:[#allocation10_spill] sm:$0xff] %v2847_v33  ;;  %v2883_v45 = vld [vmem:[%s2779_s19 + $0x18] sm:$0xff]  ;;  %v2886_v46 = vld [vmem:[%s2779_s19 + $0x20] sm:$0xff]  ;;  %v366_v49 = vrot.slane %v2868_v40, 1  ;;  %v367_v50 = vrot.slane %v2871_v41, 1  ;;  %v2896_v53 = vsel %vm300_vm1, %v326_v43, %v327_v44  ;;  %v331_v22 = vrot.slane %v2941_v4, 1 }
  0x24   : > { %4205 = vst [vmem:[#allocation11_spill] sm:$0xff] %v2850_v34  ;;  %v306_v51 = vrot.slane %v2883_v45, 1  ;;  %v307_v52 = vrot.slane %v2886_v46, 1  ;;  %v2899_v54 = vsel %vm300_vm1, %v346_v47, %v347_v48  ;;  %v2905_v56 = vld [vmem:[%s2779_s19 + $0x88] sm:$0x3]  ;;  %v2944_v8 = vld [vmem:[%s2779_s19 + $0x98] sm:$0xff] }
  0x25   : > { %4206 = vst [vmem:[#allocation12_spill] sm:$0xff] %v2853_v35  ;;  %v2902_v55 = vsel %vm300_vm1, %v366_v49, %v367_v50  ;;  %v2908_v57 = vld [vmem:[%s2779_s19 + $0xe8] sm:$0x3]  ;;  %v329_v60 = vrot.slane %v2905_v56, 1  ;;  %v2950_v11 = vld [vmem:[%s2779_s19 + $0xf8] sm:$0xff]  ;;  %v332_v25 = vrot.slane %v2944_v8, 1 }
  0x26   : > { %4207 = vst [vmem:[#allocation13_spill] sm:$0xff] %v2868_v40  ;;  %v2911_v58 = vld [vmem:[%s2779_s19 + $0x148] sm:$0x3]  ;;  %v2916_v59 = vsel %vm300_vm1, %v306_v51, %v307_v52  ;;  %v349_v62 = vrot.slane %v2908_v57, 1  ;;  %v2956_v15 = vld [vmem:[%s2779_s19 + $0x158] sm:$0xff]  ;;  %v2970_v27 = vld [vmem:[%s2779_s19 + $0x30] sm:$0xff] }
  0x27   : > { %4208 = vst [vmem:[#allocation14_spill] sm:$0xff] %v2871_v41  ;;  %2208 = vmatmul.msk.f32.gmra.mxu1 %vm383_vm2, %v2847_v33  ;;  %v2924_v61 = vld [vmem:[%s2779_s19 + $0x28] sm:$0x3]  ;;  %v369_v63 = vrot.slane %v2911_v58, 1  ;;  %v2932_v1 = vsel %vm300_vm1, %v327_v44, %v329_v60  ;;  %v2973_v29 = vld [vmem:[%s2779_s19 + $0x38] sm:$0xff]  ;;  %v351_v30 = vrot.slane %v2947_v9, 1  ;;  %v2984_v47 = vsel %vm300_vm1, %v331_v22, %v332_v25 }
  0x28   : > { %2216 = vmatmul.msk.f32.gmra.mxu2 %vm383_vm2, %v2850_v34  ;;  %4209 = vst [vmem:[#allocation15_spill] sm:$0xff] %v2896_v53  ;;  %v309_v0 = vrot.slane %v2924_v61, 1  ;;  %v2935_v2 = vsel %vm300_vm1, %v347_v48, %v349_v62  ;;  %v352_v31 = vrot.slane %v2950_v11, 1  ;;  %v371_v32 = vrot.slane %v2953_v14, 1  ;;  %v2987_v48 = vld [vmem:[%s2779_s19 + $0xa0] sm:$0x3] }
  0x29   : > { %2224 = vmatmul.msk.f32.gmra.mxu3 %vm383_vm2, %v2853_v35  ;;  %4210 = vst [vmem:[#allocation16_spill] sm:$0xff] %v2902_v55  ;;  %v2938_v3 = vsel %vm300_vm1, %v367_v50, %v369_v63  ;;  %v311_v43 = vrot.slane %v2970_v27, 1  ;;  %v312_v44 = vrot.slane %v2973_v29, 1  ;;  %v2996_v51 = vld [vmem:[%s2779_s19 + $0x100] sm:$0x3]  ;;  %v334_v60 = vrot.slane %v2987_v48, 1 }
  0x2a   : > { %2200 = vmatmul.msk.f32.gmra.mxu0 %vm383_vm2, %v305_v42  ;;  %4211 = vst [vmem:[#allocation17_spill] sm:$0xff] %v2911_v58  ;;  %v2961_v16 = vsel %vm300_vm1, %v307_v52, %v309_v0  ;;  %v372_v42 = vrot.slane %v2956_v15, 1  ;;  %v2990_v49 = vsel %vm300_vm1, %v351_v30, %v352_v31  ;;  %v2999_v52 = vld [vmem:[%s2779_s19 + $0x160] sm:$0x3]  ;;  %v2400_v0 = vld [vmem:[%s4119_s1 + $0x18] sm:$0xf] }
  0x2b   : > { %4212 = vst [vmem:[#allocation18_spill] sm:$0xff] %v2932_v1  ;;  %v3005_v62 = vsel %vm300_vm1, %v311_v43, %v312_v44  ;;  %v3008_v63 = vld [vmem:[%s2779_s19 + $0x40] sm:$0x3]  ;;  %v2434_v22 = vld [vmem:[%s4119_s1 + $0x1c] sm:$0xf]  ;;  %v374_v43 = vrot.slane %v2999_v52, 1  ;;  %2401 = vmatpush.msk.msra.mxu2 %vm448_vm0, %v2400_v0 }
  0x2c   : > { %4213 = vst [vmem:[#allocation19_spill] sm:$0xff] %v2938_v3  ;;  %v2993_v50 = vsel %vm300_vm1, %v371_v32, %v372_v42  ;;  %v2366_v30 = vld [vmem:[%s4119_s1 + $0x14] sm:$0xf]  ;;  %v354_v32 = vrot.slane %v2996_v51, 1  ;;  %2435 = vmatpush.msk.msra.mxu3 %vm448_vm0, %v2434_v22  ;;  %v3041_v0 = vld [vmem:[%s2779_s19 + $0xa8] sm:$0xff] }
  0x2d   : > { %4214 = vst [vmem:[#allocation20_spill] sm:$0xff] %v2953_v14  ;;  %2367 = vmatpush.msk.msra.mxu1 %vm448_vm0, %v2366_v30  ;;  %v3044_v22 = vld [vmem:[%s2779_s19 + $0xb0] sm:$0xff]  ;;  %v3047_v14 = vld [vmem:[%s2779_s19 + $0x108] sm:$0xff]  ;;  %v3100_v24 = vld [vmem:[%s2779_s19 + $0x118] sm:$0x3] }
  0x2e   : > { %4215 = vst [vmem:[#allocation21_spill] sm:$0xff] %v2956_v15  ;;  %v314_v15 = vrot.slane %v3008_v63, 1  ;;  %v3035_v58 = vsel %vm300_vm1, %v352_v31, %v354_v32  ;;  %v3050_v30 = vld [vmem:[%s2779_s19 + $0x110] sm:$0xff]  ;;  %v336_v31 = vrot.slane %v3041_v0, 1 }
  0x2f   : > { %2209 = vmatmul.msk.f32.gmra.mxu1 %vm383_vm2, %v2896_v53  ;;  %4216 = vst [vmem:[#allocation22_spill] sm:$0xff] %v2984_v47  ;;  %v3056_v41 = vld [vmem:[%s2779_s19 + $0x170] sm:$0xff] }
  0x30   : > { %2217 = vmatmul.msk.f32.gmra.mxu2 %vm383_vm2, %v2899_v54  ;;  %4217 = vst [vmem:[#allocation23_spill] sm:$0xff] %v2993_v50  ;;  %v3073_v32 = vld [vmem:[%s2779_s19 + $0x50] sm:$0xff] }
  0x31   : > { %2225 = vmatmul.msk.f32.gmra.mxu3 %vm383_vm2, %v2902_v55  ;;  %4218 = vst [vmem:[#allocation24_spill] sm:$0xff] %v2996_v51  ;;  %v377_v55 = vrot.slane %v3056_v41, 1  ;;  %v317_v40 = vrot.slane %v3073_v32, 1 }
  0x32   : > { %2201 = vmatmul.msk.f32.gmra.mxu0 %vm383_vm2, %v2916_v59  ;;  %4219 = vst [vmem:[#allocation25_spill] sm:$0xff] %v2999_v52  ;;  %v3038_v52 = vsel %vm300_vm1, %v372_v42, %v374_v43  ;;  %v337_v42 = vrot.slane %v3044_v22, 1  ;;  %v357_v43 = vrot.slane %v3050_v30, 1 }
  0x33   : > { %4221 = vst [vmem:[#allocation27_spill] sm:$0xff] %v3038_v52 }
  0x34   : > { %4222 = vst [vmem:[#allocation28_spill] sm:$0xff] %v3050_v30  ;;  %v3088_v35 = vsel %vm300_vm1, %v336_v31, %v337_v42  ;;  %v3116_v31 = vld [vmem:[%s2779_s19 + $0x58] sm:$0x3] }
  0x35   : > { %4224 = vst [vmem:[#allocation30_spill] sm:$0xff] %v3056_v41  ;;  %v3097_v41 = vld [vmem:[%s2779_s19 + $0xb8] sm:$0x3] }
  0x36   : > { %4225 = vst [vmem:[#allocation31_spill] sm:$0xff] %v3088_v35 }
  0x37   : > { %2210 = vmatmul.msk.f32.gmra.mxu1 %vm383_vm2, %v2932_v1  ;;  %4228 = vst [vmem:[#allocation34_spill] sm:$0xff] %v3100_v24 }
  0x38   : > { %2218 = vmatmul.msk.f32.gmra.mxu2 %vm383_vm2, %v2935_v2 }
  0x39   : > { %2226 = vmatmul.msk.f32.gmra.mxu3 %vm383_vm2, %v2938_v3  ;;  %v3053_v3 = vld [vmem:[%s2779_s19 + $0x168] sm:$0xff] }
  0x3a   : > { %2202 = vmatmul.msk.f32.gmra.mxu0 %vm383_vm2, %v2961_v16  ;;  %4223 = vst [vmem:[#allocation29_spill] sm:$0xff] %v3053_v3 }
  0x3f   : > { %2211 = vmatmul.msk.f32.gmra.mxu1 %vm383_vm2, %v2984_v47 }
  0x40   : > { %2219 = vmatmul.msk.f32.gmra.mxu2 %vm383_vm2, %v2990_v49 }
  0x41   : > { %2227 = vmatmul.msk.f32.gmra.mxu3 %vm383_vm2, %v2993_v50  ;;  %v3032_v50 = vsel %vm300_vm1, %v332_v25, %v334_v60  ;;  %v3061_v25 = vsel %vm300_vm1, %v312_v44, %v314_v15  ;;  %v3070_v60 = vld [vmem:[%s2779_s19 + $0x48] sm:$0xff]  ;;  %v2468_v15 = vld [vmem:[%s4119_s1 + $0x20] sm:$0xf]  ;;  %v356_v44 = vrot.slane %v3047_v14, 1 }
  0x42   : > { %2203 = vmatmul.msk.f32.gmra.mxu0 %vm383_vm2, %v3005_v62  ;;  %4220 = vst [vmem:[#allocation26_spill] sm:$0xff] %v3032_v50  ;;  %v316_v26 = vrot.slane %v3070_v60, 1 }
  0x43   : > { %2469 = vmatpush.msk.msra.mxu0 %vm448_vm0, %v2468_v15  ;;  %v3091_v13 = vsel %vm300_vm1, %v356_v44, %v357_v43  ;;  %v3103_v15 = vld [vmem:[%s2779_s19 + $0x178] sm:$0x3]  ;;  %v359_v44 = vrot.slane %v3100_v24, 1 }
  0x44   : > { %4226 = vst [vmem:[#allocation32_spill] sm:$0xff] %v3091_v13  ;;  %v3108_v12 = vsel %vm300_vm1, %v316_v26, %v317_v40  ;;  %v379_v30 = vrot.slane %v3103_v15, 1  ;;  %v319_v26 = vrot.slane %v3116_v31, 1 }
  0x46   : > { %v3135_v24 = vsel %vm300_vm1, %v317_v40, %v319_v26  ;;  %v749_v40 = vrot.slane %v2839_v28, 2  ;;  %v761_v26 = vrot.slane %v3070_v60, 2 }
  0x47   : > { %2212 = vmatmul.msk.f32.gmra.mxu1 %vm383_vm2, %v3032_v50 }
  0x48   : > { %2220 = vmatmul.msk.f32.gmra.mxu2 %vm383_vm2, %v3035_v58 }
  0x49   : > { %2228 = vmatmul.msk.f32.gmra.mxu3 %vm383_vm2, %v3038_v52  ;;  %v376_v52 = vrot.slane %v3053_v3, 1 }
  0x4a   : > { %2204 = vmatmul.msk.f32.gmra.mxu0 %vm383_vm2, %v3061_v25 }
  0x4b   : > { %v3094_v3 = vsel %vm300_vm1, %v376_v52, %v377_v55  ;;  %v339_v52 = vrot.slane %v3097_v41, 1 }
  0x4c   : > { %4227 = vst [vmem:[#allocation33_spill] sm:$0xff] %v3094_v3 }
  0x4d   : > { %v3124_v51 = vsel %vm300_vm1, %v337_v42, %v339_v52  ;;  %v746_v42 = vrot.slane %v2809_v18, 2  ;;  %v752_v52 = vrot.slane %v2886_v46, 2 }
  0x4e   : > { %4229 = vst [vmem:[#allocation35_spill] sm:$0xff] %v3124_v51 }
  0x4f   : > { %2213 = vmatmul.msk.f32.gmra.mxu1 %vm383_vm2, %v3088_v35 }
  0x50   : > { %2221 = vmatmul.msk.f32.gmra.mxu2 %vm383_vm2, %v3091_v13  ;;  %v3127_v13 = vsel %vm300_vm1, %v357_v43, %v359_v44  ;;  %v747_v43 = vrot.slane %v2818_v21, 2 }
  0x51   : > { %2229 = vmatmul.msk.f32.gmra.mxu3 %vm383_vm2, %v3094_v3  ;;  %v3130_v3 = vsel %vm300_vm1, %v377_v55, %v379_v30 }
  0x52   : > { %2205 = vmatmul.msk.f32.gmra.mxu0 %vm383_vm2, %v3108_v12  ;;  %4230 = vst [vmem:[#allocation36_spill] sm:$0xff] %v3130_v3  ;;  %v748_v55 = vsel %vm745_vm3, %v746_v42, %v747_v43  ;;  %v750_v30 = vsel %vm745_vm3, %v747_v43, %v749_v40  ;;  %v762_v42 = vrot.slane %v3073_v32, 2  ;;  %v764_v43 = vrot.slane %v3116_v31, 2 }
  0x53   : > { %v766_v40 = vrot.slane %v2782_v5, 2 }
  0x57   : > { %2214 = vmatmul.msk.f32.gmra.mxu1 %vm383_vm2, %v3124_v51 }
  0x58   : > { %2222 = vmatmul.msk.f32.gmra.mxu2 %vm383_vm2, %v3127_v13 }
  0x59   : > { %2230 = vmatmul.msk.f32.gmra.mxu3 %vm383_vm2, %v3130_v3 }
  0x5a   : > { %2206 = vmatmul.msk.f32.gmra.mxu0 %vm383_vm2, %v3135_v24 }
  0x5f   : > { %2232 = vmatmul.msk.f32.vlgmr.msrb.gmra.mxu1 %vm383_vm2, %v2809_v18  ;;  %v751_v18 = vrot.slane %v2883_v45, 2 }
  0x60   : > { %2266 = vmatmul.msk.f32.vlgmr.msrb.gmra.mxu2 %vm383_vm2, %v748_v55  ;;  %v3227_v55 = vsel %vm745_vm3, %v762_v42, %v764_v43 }
  0x61   : > { %2300 = vmatmul.msk.f32.vlgmr.msrb.gmra.mxu3 %vm383_vm2, %v2883_v45  ;;  %v3165_v28 = vsel %vm745_vm3, %v751_v18, %v752_v52 }
  0x62   : > { %2334 = vmatmul.msk.f32.vlgmr.msrb.gmra.mxu0 %vm383_vm2, %v2916_v59 }
  0x67   : > { %2233 = vmatmul.msk.f32.gmra.mxu1 %vm383_vm2, %v2818_v21  ;;  %v754_v21 = vrot.slane %v2924_v61, 2 }
  0x68   : > { %2267 = vmatmul.msk.f32.gmra.mxu2 %vm383_vm2, %v750_v30  ;;  %v767_v30 = vrot.slane %v2785_v6, 2 }
  0x69   : > { %2301 = vmatmul.msk.f32.gmra.mxu3 %vm383_vm2, %v2886_v46  ;;  %v3177_v59 = vsel %vm745_vm3, %v752_v52, %v754_v21  ;;  %v769_v21 = vrot.slane %v2806_v17, 2  ;;  %v771_v17 = vrot.slane %v2856_v36, 2 }
  0x6a   : > { %2335 = vmatmul.msk.f32.gmra.mxu0 %vm383_vm2, %v2961_v16  ;;  %v757_v16 = vrot.slane %v2973_v29, 2  ;;  %v3242_v18 = vsel %vm745_vm3, %v766_v40, %v767_v30 }
  0x6b   : > { %4231 = vst [vmem:[#allocation37_spill] sm:$0xff] %v3242_v18 }
  0x6f   : > { %2234 = vmatmul.msk.f32.gmra.mxu1 %vm383_vm2, %v2883_v45  ;;  %v756_v45 = vrot.slane %v2970_v27, 2 }
  0x70   : > { %2268 = vmatmul.msk.f32.gmra.mxu2 %vm383_vm2, %v3165_v28 }
  0x71   : > { %2302 = vmatmul.msk.f32.gmra.mxu3 %vm383_vm2, %v2970_v27  ;;  %v3190_v61 = vsel %vm745_vm3, %v756_v45, %v757_v16 }
  0x72   : > { %2336 = vmatmul.msk.f32.gmra.mxu0 %vm383_vm2, %v3005_v62 }
  0x77   : > { %2235 = vmatmul.msk.f32.gmra.mxu1 %vm383_vm2, %v2886_v46  ;;  %v759_v46 = vrot.slane %v3008_v63, 2  ;;  %v3215_v63 = vsel %vm745_vm3, %v761_v26, %v762_v42  ;;  %v772_v42 = vrot.slane %v2859_v37, 2 }
  0x78   : > { %2269 = vmatmul.msk.f32.gmra.mxu2 %vm383_vm2, %v3177_v59 }
  0x79   : > { %2303 = vmatmul.msk.f32.gmra.mxu3 %vm383_vm2, %v2973_v29  ;;  %v3202_v44 = vsel %vm745_vm3, %v757_v16, %v759_v46 }
  0x7a   : > { %2337 = vmatmul.msk.f32.gmra.mxu0 %vm383_vm2, %v3061_v25 }
  0x7f   : > { %2236 = vmatmul.msk.f32.gmra.mxu1 %vm383_vm2, %v2970_v27 }
  0x80   : > { %2270 = vmatmul.msk.f32.gmra.mxu2 %vm383_vm2, %v3190_v61 }
  0x81   : > { %2304 = vmatmul.msk.f32.gmra.mxu3 %vm383_vm2, %v3070_v60 }
  0x82   : > { %2338 = vmatmul.msk.f32.gmra.mxu0 %vm383_vm2, %v3108_v12 }
  0x87   : > { %2237 = vmatmul.msk.f32.gmra.mxu1 %vm383_vm2, %v2973_v29 }
  0x88   : > { %2271 = vmatmul.msk.f32.gmra.mxu2 %vm383_vm2, %v3202_v44 }
  0x89   : > { %2305 = vmatmul.msk.f32.gmra.mxu3 %vm383_vm2, %v3073_v32 }
  0x8a   : > { %2339 = vmatmul.msk.f32.gmra.mxu0 %vm383_vm2, %v3135_v24 }
  0x8f   : > { %2238 = vmatmul.msk.f32.gmra.mxu1 %vm383_vm2, %v3070_v60 }
  0x90   : > { %2272 = vmatmul.msk.f32.gmra.mxu2 %vm383_vm2, %v3215_v63 }
  0x91   : > { %2306 = vmatmul.msk.f32.gmra.mxu3 %vm383_vm2, %v2782_v5 }
  0x92   : > { %2340 = vmatmul.msk.f32.gmra.mxu0 %vm383_vm2, %v2812_v19 }
  0x97   : > { %2239 = vmatmul.msk.f32.gmra.mxu1 %vm383_vm2, %v3073_v32 }
  0x98   : > { %2273 = vmatmul.msk.f32.gmra.mxu2 %vm383_vm2, %v3227_v55 }
  0x99   : > { %2307 = vmatmul.msk.f32.gmra.mxu3 %vm383_vm2, %v2785_v6 }
  0x9a   : > { %2341 = vmatmul.msk.f32.gmra.mxu0 %vm383_vm2, %v2847_v33 }
  0x9c   : > { %v3239_v31 = vpop.f32.mrf.mxu1 }
  0x9f   : > { %2240 = vmatmul.msk.f32.gmra.mxu1 %vm383_vm2, %v2782_v5  ;;  %v3246_v52 = vpop.f32.mrf.mxu0  ;;  %v3262_v5 = vsel %vm745_vm3, %v767_v30, %v769_v21  ;;  %v3283_v30 = vsel %vm745_vm3, %v771_v17, %v772_v42 }
  0xa0   : > { %2274 = vmatmul.msk.f32.gmra.mxu2 %vm383_vm2, %v3242_v18  ;;  %4233 = vst [vmem:[#allocation39_spill] sm:$0xff] %v3262_v5 }
  0xa1   : > { %2308 = vmatmul.msk.f32.gmra.mxu3 %vm383_vm2, %v2856_v36  ;;  %4235 = vst [vmem:[#allocation41_spill] sm:$0xff] %v3283_v30 }
  0xa2   : > { %2342 = vmatmul.msk.f32.gmra.mxu0 %vm383_vm2, %v2896_v53 }
  0xa3   : > { %v3255_v45 = vpop.f32.mrf.mxu2 }
  0xa4   : > { %v3257_v16 = vpop.f32.mrf.mxu3  ;;  %v3259_v46 = vpop.f32.mrf.mxu1 }
  0xa5   : > { %4232 = vst [vmem:[#allocation38_spill] sm:$0xff] %v3257_v16  ;;  %v774_v16 = vrot.slane %v2905_v56, 2  ;;  %v776_v56 = vrot.slane %v2941_v4, 2 }
  0xa7   : > { %2241 = vmatmul.msk.f32.gmra.mxu1 %vm383_vm2, %v2785_v6  ;;  %v3266_v26 = vpop.f32.mrf.mxu0 }
  0xa8   : > { %2275 = vmatmul.msk.f32.gmra.mxu2 %vm383_vm2, %v3262_v5 }
  0xa9   : > { %2309 = vmatmul.msk.f32.gmra.mxu3 %vm383_vm2, %v2859_v37 }
  0xaa   : > { %2343 = vmatmul.msk.f32.gmra.mxu0 %vm383_vm2, %v2932_v1 }
  0xab   : > { %v3276_v43 = vpop.f32.mrf.mxu2 }
  0xac   : > { %v3278_v40 = vpop.f32.mrf.mxu3  ;;  %v3280_v6 = vpop.f32.mrf.mxu1 }
  0xad   : > { %4234 = vst [vmem:[#allocation40_spill] sm:$0xff] %v3278_v40 }
  0xaf   : > { %2242 = vmatmul.msk.f32.gmra.mxu1 %vm383_vm2, %v2856_v36  ;;  %v3287_v21 = vpop.f32.mrf.mxu0  ;;  %v3303_v36 = vsel %vm745_vm3, %v772_v42, %v774_v16 }
  0xb0   : > { %2276 = vmatmul.msk.f32.gmra.mxu2 %vm383_vm2, %v3283_v30  ;;  %4237 = vst [vmem:[#allocation43_spill] sm:$0xff] %v3303_v36 }
  0xb1   : > { %2310 = vmatmul.msk.f32.gmra.mxu3 %vm383_vm2, %v2941_v4 }
  0xb2   : > { %2344 = vmatmul.msk.f32.gmra.mxu0 %vm383_vm2, %v2984_v47 }
  0xb3   : > { %v3296_v40 = vpop.f32.mrf.mxu2 }
  0xb4   : > { %v3298_v17 = vpop.f32.mrf.mxu3  ;;  %v3300_v1 = vpop.f32.mrf.mxu1 }
  0xb5   : > { %4236 = vst [vmem:[#allocation42_spill] sm:$0xff] %v3298_v17  ;;  %v777_v17 = vrot.slane %v2944_v8, 2 }
  0xb7   : > { %2243 = vmatmul.msk.f32.gmra.mxu1 %vm383_vm2, %v2859_v37  ;;  %v3307_v30 = vpop.f32.mrf.mxu0  ;;  %v3324_v47 = vsel %vm745_vm3, %v776_v56, %v777_v17 }
  0xb8   : > { %2277 = vmatmul.msk.f32.gmra.mxu2 %vm383_vm2, %v3303_v36  ;;  %4239 = vst [vmem:[#allocation45_spill] sm:$0xff] %v3324_v47 }
  0xb9   : > { %2311 = vmatmul.msk.f32.gmra.mxu3 %vm383_vm2, %v2944_v8 }
  0xba   : > { %2345 = vmatmul.msk.f32.gmra.mxu0 %vm383_vm2, %v3032_v50  ;;  %v779_v50 = vrot.slane %v2987_v48, 2  ;;  %v781_v48 = vrot.slane %v3041_v0, 2 }
  0xbb   : > { %v3317_v16 = vpop.f32.mrf.mxu2 }
  0xbc   : > { %v3319_v42 = vpop.f32.mrf.mxu3  ;;  %v3321_v37 = vpop.f32.mrf.mxu1 }
  0xbd   : > { %4238 = vst [vmem:[#allocation44_spill] sm:$0xff] %v3319_v42 }
  0xbf   : > { %2244 = vmatmul.msk.f32.gmra.mxu1 %vm383_vm2, %v2941_v4  ;;  %v3328_v36 = vpop.f32.mrf.mxu0  ;;  %v3344_v4 = vsel %vm745_vm3, %v777_v17, %v779_v50 }
  0xc0   : > { %2278 = vmatmul.msk.f32.gmra.mxu2 %vm383_vm2, %v3324_v47  ;;  %4241 = vst [vmem:[#allocation47_spill] sm:$0xff] %v3344_v4 }
  0xc1   : > { %2312 = vmatmul.msk.f32.gmra.mxu3 %vm383_vm2, %v3041_v0 }
  0xc2   : > { %2346 = vmatmul.msk.f32.gmra.mxu0 %vm383_vm2, %v3088_v35 }
  0xc3   : > { %v3337_v42 = vpop.f32.mrf.mxu2 }
  0xc4   : > { %v3339_v56 = vpop.f32.mrf.mxu3  ;;  %v3341_v53 = vpop.f32.mrf.mxu1 }
  0xc5   : > { %4240 = vst [vmem:[#allocation46_spill] sm:$0xff] %v3339_v56  ;;  %v782_v56 = vrot.slane %v3044_v22, 2 }
  0xc7   : > { %2245 = vmatmul.msk.f32.gmra.mxu1 %vm383_vm2, %v2944_v8  ;;  %v3348_v47 = vpop.f32.mrf.mxu0  ;;  %v3365_v35 = vsel %vm745_vm3, %v781_v48, %v782_v56 }
  0xc8   : > { %2279 = vmatmul.msk.f32.gmra.mxu2 %vm383_vm2, %v3344_v4  ;;  %4244 = vst [vmem:[#allocation50_spill] sm:$0xff] %v3365_v35 }
  0xc9   : > { %2313 = vmatmul.msk.f32.gmra.mxu3 %vm383_vm2, %v3044_v22 }
  0xca   : > { %2347 = vmatmul.msk.f32.gmra.mxu0 %vm383_vm2, %v3124_v51  ;;  %v784_v51 = vrot.slane %v3097_v41, 2  ;;  %v786_v41 = vrot.slane %v2788_v7, 2 }
  0xcb   : > { %v3358_v50 = vpop.f32.mrf.mxu2 }
  0xcc   : > { %4242 = vst [vmem:[#allocation48_spill] sm:$0xff] %v3358_v50  ;;  %v3360_v17 = vpop.f32.mrf.mxu3  ;;  %v3362_v8 = vpop.f32.mrf.mxu1 }
  0xcd   : > { %4243 = vst [vmem:[#allocation49_spill] sm:$0xff] %v3360_v17 }
  0xcf   : > { %2246 = vmatmul.msk.f32.gmra.mxu1 %vm383_vm2, %v3041_v0  ;;  %v3369_v4 = vpop.f32.mrf.mxu0  ;;  %v3385_v0 = vsel %vm745_vm3, %v782_v56, %v784_v51 }
  0xd0   : > { %2280 = vmatmul.msk.f32.gmra.mxu2 %vm383_vm2, %v3365_v35  ;;  %4247 = vst [vmem:[#allocation53_spill] sm:$0xff] %v3385_v0 }
  0xd1   : > { %2314 = vmatmul.msk.f32.gmra.mxu3 %vm383_vm2, %v2788_v7 }
  0xd2   : > { %2348 = vmatmul.msk.f32.gmra.mxu0 %vm383_vm2, %v2824_v23 }
  0xd3   : > { %v3378_v17 = vpop.f32.mrf.mxu2 }
  0xd4   : > { %4245 = vst [vmem:[#allocation51_spill] sm:$0xff] %v3378_v17  ;;  %v3380_v48 = vpop.f32.mrf.mxu3  ;;  %v3382_v5 = vpop.f32.mrf.mxu1 }
  0xd5   : > { %4246 = vst [vmem:[#allocation52_spill] sm:$0xff] %v3380_v48  ;;  %v787_v48 = vrot.slane %v2793_v10, 2 }
  0xd7   : > { %2247 = vmatmul.msk.f32.gmra.mxu1 %vm383_vm2, %v3044_v22  ;;  %v3389_v35 = vpop.f32.mrf.mxu0  ;;  %v3404_v23 = vsel %vm745_vm3, %v786_v41, %v787_v48 }
  0xd8   : > { %2281 = vmatmul.msk.f32.gmra.mxu2 %vm383_vm2, %v3385_v0  ;;  %4250 = vst [vmem:[#allocation56_spill] sm:$0xff] %v3404_v23 }
  0xd9   : > { %2315 = vmatmul.msk.f32.gmra.mxu3 %vm383_vm2, %v2793_v10 }
  0xda   : > { %2349 = vmatmul.msk.f32.gmra.mxu0 %vm383_vm2, %v2850_v34  ;;  %v789_v34 = vrot.slane %v2815_v20, 2  ;;  %v791_v20 = vrot.slane %v2862_v38, 2 }
  0xdb   : > { %v3399_v51 = vpop.f32.mrf.mxu2 }
  0xdc   : > { %4248 = vst [vmem:[#allocation54_spill] sm:$0xff] %v3399_v51  ;;  %v3401_v56 = vpop.f32.mrf.mxu3  ;;  %v649_v22 = vpop.f32.mrf.mxu1 }
  0xdd   : > { %4249 = vst [vmem:[#allocation55_spill] sm:$0xff] %v3401_v56  ;;  %v650_v51 = vadd.f32 %v649_v22, %v3246_v52  ;;  %v792_v52 = vrot.slane %v2865_v39, 2 }
  0xdf   : > { %2248 = vmatmul.msk.f32.gmra.mxu1 %vm383_vm2, %v2788_v7  ;;  %v1228_v0 = vpop.f32.mrf.mxu0  ;;  %v3417_v7 = vsel %vm745_vm3, %v787_v48, %v789_v34 }
  0xe0   : > { %2282 = vmatmul.msk.f32.gmra.mxu2 %vm383_vm2, %v3404_v23 }
  0xe1   : > { %2316 = vmatmul.msk.f32.gmra.mxu3 %vm383_vm2, %v2862_v38 }
  0xe2   : > { %2350 = vmatmul.msk.f32.gmra.mxu0 %vm383_vm2, %v2899_v54 }
  0xe3   : > { %v912_v56 = vpop.f32.mrf.mxu2 }
  0xe4   : > { %v1068_v41 = vpop.f32.mrf.mxu3  ;;  %v1008_v17 = vadd.f32 %v912_v56, %v650_v51  ;;  %v652_v50 = vpop.f32.mrf.mxu1 }
  0xe5   : > { %v653_v34 = vadd.f32 %v652_v50, %v3266_v26  ;;  %v794_v26 = vrot.slane %v2908_v57, 2  ;;  %v796_v57 = vrot.slane %v2947_v9, 2 }
  0xe6   : > { %v1164_v33 = vadd.f32 %v1068_v41, %v1008_v17 }
  0xe7   : > { %2249 = vmatmul.msk.f32.gmra.mxu1 %vm383_vm2, %v2793_v10  ;;  %v1231_v23 = vpop.f32.mrf.mxu0 }
  0xe8   : > { %v3421_v18 = vadd.f32 %v1228_v0, %v1164_v33  ;;  %2283 = vmatmul.msk.f32.gmra.mxu2 %vm383_vm2, %v3417_v7  ;;  %v3433_v0 = vsel %vm745_vm3, %v791_v20, %v792_v52 }
  0xe9   : > { %2317 = vmatmul.msk.f32.gmra.mxu3 %vm383_vm2, %v2865_v39 }
  0xea   : > { %2351 = vmatmul.msk.f32.gmra.mxu0 %vm383_vm2, %v2935_v2 }
  0xeb   : > { %v915_v17 = vpop.f32.mrf.mxu2 }
  0xec   : > { %v1071_v10 = vpop.f32.mrf.mxu3  ;;  %v1009_v48 = vadd.f32 %v915_v17, %v653_v34  ;;  %v655_v33 = vpop.f32.mrf.mxu1 }
  0xed   : > { %v656_v50 = vadd.f32 %v655_v33, %v3287_v21  ;;  %v797_v21 = vrot.slane %v2950_v11, 2 }
  0xee   : > { %v1165_v51 = vadd.f32 %v1071_v10, %v1009_v48 }
  0xef   : > { %2250 = vmatmul.msk.f32.gmra.mxu1 %vm383_vm2, %v2862_v38  ;;  %v1234_v56 = vpop.f32.mrf.mxu0 }
  0xf0   : > { %v3437_v22 = vadd.f32 %v1231_v23, %v1165_v51  ;;  %2284 = vmatmul.msk.f32.gmra.mxu2 %vm383_vm2, %v3433_v0  ;;  %v3448_v23 = vsel %vm745_vm3, %v792_v52, %v794_v26  ;;  %v3464_v26 = vsel %vm745_vm3, %v796_v57, %v797_v21 }
  0xf1   : > { %2318 = vmatmul.msk.f32.gmra.mxu3 %vm383_vm2, %v2947_v9 }
  0xf2   : > { %2352 = vmatmul.msk.f32.gmra.mxu0 %vm383_vm2, %v2990_v49 }
  0xf3   : > { %v918_v41 = vpop.f32.mrf.mxu2 }
  0xf4   : > { %v1074_v20 = vpop.f32.mrf.mxu3  ;;  %v1010_v34 = vadd.f32 %v918_v41, %v656_v50  ;;  %v658_v38 = vpop.f32.mrf.mxu1 }
  0xf5   : > { %v659_v52 = vadd.f32 %v658_v38, %v3307_v30  ;;  %v4252_v30 = vld [vmem:[#allocation24_spill] sm:$0xff] }
  0xf6   : > { %v1166_v17 = vadd.f32 %v1074_v20, %v1010_v34  ;;  %v799_v34 = vrot.slane %v4252_v30, 2 }
  0xf7   : > { %2251 = vmatmul.msk.f32.gmra.mxu1 %vm383_vm2, %v2865_v39  ;;  %v1237_v10 = vpop.f32.mrf.mxu0 }
  0xf8   : > { %v3452_v48 = vadd.f32 %v1234_v56, %v1166_v17  ;;  %2285 = vmatmul.msk.f32.gmra.mxu2 %vm383_vm2, %v3448_v23  ;;  %v4253_v17 = vld [vmem:[#allocation32_spill] sm:$0xff] }
  0xf9   : > { %2319 = vmatmul.msk.f32.gmra.mxu3 %vm383_vm2, %v2950_v11 }
  0xfa   : > { %2353 = vmatmul.msk.f32.gmra.mxu0 %vm383_vm2, %v3035_v58 }
  0xfb   : > { %v921_v33 = vpop.f32.mrf.mxu2 }
  0xfc   : > { %v1077_v39 = vpop.f32.mrf.mxu3  ;;  %v1011_v51 = vadd.f32 %v921_v33, %v659_v52  ;;  %v661_v56 = vpop.f32.mrf.mxu1 }
  0xfd   : > { %v662_v38 = vadd.f32 %v661_v56, %v3328_v36  ;;  %v4255_v36 = vld [vmem:[#allocation28_spill] sm:$0xff]  ;;  %v801_v56 = vrot.slane %v3047_v14, 2 }
  0xfe   : > { %v1167_v50 = vadd.f32 %v1077_v39, %v1011_v51  ;;  %v802_v30 = vrot.slane %v4255_v36, 2 }
  0xff   : > { %2252 = vmatmul.msk.f32.gmra.mxu1 %vm383_vm2, %v2947_v9  ;;  %v1240_v41 = vpop.f32.mrf.mxu0 }
 0x100   : > { %v3468_v20 = vadd.f32 %v1237_v10, %v1167_v50  ;;  %2286 = vmatmul.msk.f32.gmra.mxu2 %vm383_vm2, %v3464_v26  ;;  %v3479_v10 = vsel %vm745_vm3, %v797_v21, %v799_v34 }
 0x101   : > { %2320 = vmatmul.msk.f32.gmra.mxu3 %vm383_vm2, %v3047_v14 }
 0x102   : > { %4251 = vst [vmem:[#allocation57_spill] sm:$0xff] %v3468_v20  ;;  %2354 = vmatmul.msk.f32.gmra.mxu0 %vm383_vm2, %v4253_v17 }
 0x103   : > { %v924_v57 = vpop.f32.mrf.mxu2 }
 0x104   : > { %v1080_v52 = vpop.f32.mrf.mxu3  ;;  %v1012_v33 = vadd.f32 %v924_v57, %v662_v38  ;;  %v664_v9 = vpop.f32.mrf.mxu1  ;;  %v3495_v57 = vsel %vm745_vm3, %v801_v56, %v802_v30 }
 0x105   : > { %v665_v21 = vadd.f32 %v664_v9, %v3348_v47  ;;  %v4257_v47 = vld [vmem:[#allocation5_spill] sm:$0xff]  ;;  %v4258_v9 = vld [vmem:[#allocation34_spill] sm:$0xff] }
 0x106   : > { %v1168_v39 = vadd.f32 %v1080_v52, %v1012_v33 }
 0x107   : > { %2253 = vmatmul.msk.f32.gmra.mxu1 %vm383_vm2, %v2950_v11  ;;  %v1243_v51 = vpop.f32.mrf.mxu0 }
 0x108   : > { %v3483_v50 = vadd.f32 %v1240_v41, %v1168_v39  ;;  %2287 = vmatmul.msk.f32.gmra.mxu2 %vm383_vm2, %v3479_v10 }
 0x109   : > { %2321 = vmatmul.msk.f32.gmra.mxu3 %vm383_vm2, %v4255_v36 }
 0x10a   : > { %4254 = vst [vmem:[#allocation24_spill] sm:$0xff] %v3483_v50  ;;  %2355 = vmatmul.msk.f32.gmra.mxu0 %vm383_vm2, %v3127_v13  ;;  %v804_v50 = vrot.slane %v4258_v9, 2 }
 0x10b   : > { %v927_v34 = vpop.f32.mrf.mxu2 }
 0x10c   : > { %v1083_v11 = vpop.f32.mrf.mxu3  ;;  %v1013_v38 = vadd.f32 %v927_v34, %v665_v21  ;;  %v667_v41 = vpop.f32.mrf.mxu1  ;;  %v4259_v34 = vld [vmem:[#allocation8_spill] sm:$0xff] }
 0x10d   : > { %v668_v21 = vadd.f32 %v667_v41, %v3369_v4  ;;  %v4261_v4 = vld [vmem:[#allocation6_spill] sm:$0xff]  ;;  %v806_v41 = vrot.slane %v4257_v47, 2 }
 0x10e   : > { %v1169_v52 = vadd.f32 %v1083_v11, %v1013_v38  ;;  %v807_v9 = vrot.slane %v4261_v4, 2 }
 0x10f   : > { %2254 = vmatmul.msk.f32.gmra.mxu1 %vm383_vm2, %v3047_v14  ;;  %v1246_v33 = vpop.f32.mrf.mxu0 }
 0x110   : > { %v3499_v39 = vadd.f32 %v1243_v51, %v1169_v52  ;;  %2288 = vmatmul.msk.f32.gmra.mxu2 %vm383_vm2, %v3495_v57  ;;  %v3510_v51 = vsel %vm745_vm3, %v802_v30, %v804_v50  ;;  %v4262_v30 = vld [vmem:[#allocation12_spill] sm:$0xff] }
 0x111   : > { %2322 = vmatmul.msk.f32.gmra.mxu3 %vm383_vm2, %v4257_v47 }
 0x112   : > { %4256 = vst [vmem:[#allocation32_spill] sm:$0xff] %v3499_v39  ;;  %2356 = vmatmul.msk.f32.gmra.mxu0 %vm383_vm2, %v4259_v34 }
 0x113   : > { %v930_v56 = vpop.f32.mrf.mxu2 }
 0x114   : > { %v1086_v11 = vpop.f32.mrf.mxu3  ;;  %v1014_v38 = vadd.f32 %v930_v56, %v668_v21  ;;  %v670_v14 = vpop.f32.mrf.mxu1 }
 0x115   : > { %v671_v50 = vadd.f32 %v670_v14, %v3389_v35  ;;  %v4265_v35 = vld [vmem:[#allocation13_spill] sm:$0xff] }
 0x116   : > { %v1170_v52 = vadd.f32 %v1086_v11, %v1014_v38  ;;  %v3526_v11 = vsel %vm745_vm3, %v806_v41, %v807_v9  ;;  %v4266_v14 = vld [vmem:[#allocation9_spill] sm:$0xff] }
 0x117   : > { %2255 = vmatmul.msk.f32.gmra.mxu1 %vm383_vm2, %v4255_v36  ;;  %v1249_v39 = vpop.f32.mrf.mxu0  ;;  %4263 = vst [vmem:[#allocation5_spill] sm:$0xff] %v3526_v11 }
 0x118   : > { %v3514_v20 = vadd.f32 %v1246_v33, %v1170_v52  ;;  %2289 = vmatmul.msk.f32.gmra.mxu2 %vm383_vm2, %v3510_v51 }
 0x119   : > { %2323 = vmatmul.msk.f32.gmra.mxu3 %vm383_vm2, %v4261_v4 }
 0x11a   : > { %4260 = vst [vmem:[#allocation28_spill] sm:$0xff] %v3514_v20  ;;  %2357 = vmatmul.msk.f32.gmra.mxu0 %vm383_vm2, %v4262_v30  ;;  %v809_v30 = vrot.slane %v4266_v14, 2 }
 0x11b   : > { %v933_v21 = vpop.f32.mrf.mxu2 }
 0x11c   : > { %v1089_v36 = vpop.f32.mrf.mxu3  ;;  %v1015_v56 = vadd.f32 %v933_v21, %v671_v50  ;;  %v673_v33 = vpop.f32.mrf.mxu1  ;;  %v4267_v21 = vld [vmem:[#allocation16_spill] sm:$0xff] }
 0x11d   : > { %v674_v50 = vadd.f32 %v673_v33, %v3239_v31  ;;  %v4269_v31 = vld [vmem:[#allocation14_spill] sm:$0xff]  ;;  %v811_v33 = vrot.slane %v4265_v35, 2 }
 0x11e   : > { %v1171_v38 = vadd.f32 %v1089_v36, %v1015_v56  ;;  %v812_v14 = vrot.slane %v4269_v31, 2 }
 0x11f   : > { %2256 = vmatmul.msk.f32.gmra.mxu1 %vm383_vm2, %v4257_v47  ;;  %v1252_v52 = vpop.f32.mrf.mxu0 }
 0x120   : > { %v3530_v20 = vadd.f32 %v1249_v39, %v1171_v38  ;;  %2290 = vmatmul.msk.f32.gmra.mxu2 %vm383_vm2, %v3526_v11  ;;  %v3541_v39 = vsel %vm745_vm3, %v807_v9, %v809_v30  ;;  %v4270_v30 = vld [vmem:[#allocation19_spill] sm:$0xff] }
 0x121   : > { %2324 = vmatmul.msk.f32.gmra.mxu3 %vm383_vm2, %v4265_v35 }
 0x122   : > { %4264 = vst [vmem:[#allocation34_spill] sm:$0xff] %v3530_v20  ;;  %2358 = vmatmul.msk.f32.gmra.mxu0 %vm383_vm2, %v4267_v21 }
 0x123   : > { %v936_v41 = vpop.f32.mrf.mxu2 }
 0x124   : > { %v1092_v36 = vpop.f32.mrf.mxu3  ;;  %v1016_v56 = vadd.f32 %v936_v41, %v674_v50  ;;  %v676_v47 = vpop.f32.mrf.mxu1 }
 0x125   : > { %v677_v9 = vadd.f32 %v676_v47, %v3259_v46  ;;  %v4273_v46 = vld [vmem:[#allocation20_spill] sm:$0xff]  ;;  %v4274_v47 = vld [vmem:[#allocation17_spill] sm:$0xff] }
 0x126   : > { %v1172_v38 = vadd.f32 %v1092_v36, %v1016_v56  ;;  %v3557_v36 = vsel %vm745_vm3, %v811_v33, %v812_v14 }
 0x127   : > { %2257 = vmatmul.msk.f32.gmra.mxu1 %vm383_vm2, %v4261_v4  ;;  %v1255_v20 = vpop.f32.mrf.mxu0  ;;  %4271 = vst [vmem:[#allocation6_spill] sm:$0xff] %v3557_v36 }
 0x128   : > { %v3545_v11 = vadd.f32 %v1252_v52, %v1172_v38  ;;  %2291 = vmatmul.msk.f32.gmra.mxu2 %vm383_vm2, %v3541_v39 }
 0x129   : > { %2325 = vmatmul.msk.f32.gmra.mxu3 %vm383_vm2, %v4269_v31 }
 0x12a   : > { %4268 = vst [vmem:[#allocation8_spill] sm:$0xff] %v3545_v11  ;;  %2359 = vmatmul.msk.f32.gmra.mxu0 %vm383_vm2, %v4270_v30  ;;  %v814_v30 = vrot.slane %v4274_v47, 2 }
 0x12b   : > { %v939_v50 = vpop.f32.mrf.mxu2 }
 0x12c   : > { %v1095_v4 = vpop.f32.mrf.mxu3  ;;  %v1017_v41 = vadd.f32 %v939_v50, %v677_v9  ;;  %v679_v52 = vpop.f32.mrf.mxu1  ;;  %v4275_v50 = vld [vmem:[#allocation23_spill] sm:$0xff] }
 0x12d   : > { %v680_v9 = vadd.f32 %v679_v52, %v3280_v6  ;;  %v4277_v6 = vld [vmem:[#allocation21_spill] sm:$0xff]  ;;  %v816_v52 = vrot.slane %v4273_v46, 2 }
 0x12e   : > { %v1173_v56 = vadd.f32 %v1095_v4, %v1017_v41  ;;  %v817_v47 = vrot.slane %v4277_v6, 2 }
 0x12f   : > { %2258 = vmatmul.msk.f32.gmra.mxu1 %vm383_vm2, %v4265_v35  ;;  %v1258_v38 = vpop.f32.mrf.mxu0 }
 0x130   : > { %v3561_v11 = vadd.f32 %v1255_v20, %v1173_v56  ;;  %2292 = vmatmul.msk.f32.gmra.mxu2 %vm383_vm2, %v3557_v36  ;;  %v3572_v20 = vsel %vm745_vm3, %v812_v14, %v814_v30  ;;  %v4278_v30 = vld [vmem:[#allocation27_spill] sm:$0xff] }
 0x131   : > { %2326 = vmatmul.msk.f32.gmra.mxu3 %vm383_vm2, %v4273_v46 }
 0x132   : > { %4272 = vst [vmem:[#allocation13_spill] sm:$0xff] %v3561_v11  ;;  %2360 = vmatmul.msk.f32.gmra.mxu0 %vm383_vm2, %v4275_v50 }
 0x133   : > { %v942_v33 = vpop.f32.mrf.mxu2 }
 0x134   : > { %v1098_v4 = vpop.f32.mrf.mxu3  ;;  %v1018_v41 = vadd.f32 %v942_v33, %v680_v9  ;;  %v682_v35 = vpop.f32.mrf.mxu1 }
 0x135   : > { %v683_v14 = vadd.f32 %v682_v35, %v3300_v1  ;;  %v4281_v1 = vld [vmem:[#allocation29_spill] sm:$0xff] }
 0x136   : > { %v1174_v56 = vadd.f32 %v1098_v4, %v1018_v41  ;;  %v3588_v4 = vsel %vm745_vm3, %v816_v52, %v817_v47  ;;  %v4282_v35 = vld [vmem:[#allocation25_spill] sm:$0xff] }
 0x137   : > { %2259 = vmatmul.msk.f32.gmra.mxu1 %vm383_vm2, %v4269_v31  ;;  %v1261_v11 = vpop.f32.mrf.mxu0  ;;  %4279 = vst [vmem:[#allocation16_spill] sm:$0xff] %v3588_v4  ;;  %v4283_v52 = vld [vmem:[#allocation33_spill] sm:$0xff] }
 0x138   : > { %v3576_v36 = vadd.f32 %v1258_v38, %v1174_v56  ;;  %2293 = vmatmul.msk.f32.gmra.mxu2 %vm383_vm2, %v3572_v20 }
 0x139   : > { %2327 = vmatmul.msk.f32.gmra.mxu3 %vm383_vm2, %v4277_v6 }
 0x13a   : > { %4276 = vst [vmem:[#allocation9_spill] sm:$0xff] %v3576_v36  ;;  %2361 = vmatmul.msk.f32.gmra.mxu0 %vm383_vm2, %v4278_v30 }
 0x13b   : > { %v945_v9 = vpop.f32.mrf.mxu2 }
 0x13c   : > { %v1101_v31 = vpop.f32.mrf.mxu3  ;;  %v1019_v33 = vadd.f32 %v945_v9, %v683_v14  ;;  %v685_v38 = vpop.f32.mrf.mxu1  ;;  %v819_v14 = vrot.slane %v4282_v35, 2  ;;  %v821_v35 = vrot.slane %v4281_v1, 2 }
 0x13d   : > { %v686_v9 = vadd.f32 %v685_v38, %v3321_v37  ;;  %v4285_v37 = vld [vmem:[#allocation30_spill] sm:$0xff] }
 0x13e   : > { %v1175_v41 = vadd.f32 %v1101_v31, %v1019_v33  ;;  %v3614_v38 = vld [vmem:[%s2779_s19 + $0x188] sm:$0xff] }
 0x13f   : > { %2260 = vmatmul.msk.f32.gmra.mxu1 %vm383_vm2, %v4273_v46  ;;  %v1264_v56 = vpop.f32.mrf.mxu0 }
 0x140   : > { %v3592_v36 = vadd.f32 %v1261_v11, %v1175_v41  ;;  %2294 = vmatmul.msk.f32.gmra.mxu2 %vm383_vm2, %v3588_v4  ;;  %v3603_v41 = vsel %vm745_vm3, %v817_v47, %v819_v14  ;;  %v822_v47 = vrot.slane %v4285_v37, 2 }
 0x141   : > { %2328 = vmatmul.msk.f32.gmra.mxu3 %vm383_vm2, %v4281_v1 }
 0x142   : > { %4280 = vst [vmem:[#allocation14_spill] sm:$0xff] %v3592_v36  ;;  %2362 = vmatmul.msk.f32.gmra.mxu0 %vm383_vm2, %v4283_v52 }
 0x143   : > { %v948_v31 = vpop.f32.mrf.mxu2 }
 0x144   : > { %v1104_v46 = vpop.f32.mrf.mxu3  ;;  %v1020_v33 = vadd.f32 %v948_v31, %v686_v9  ;;  %v688_v11 = vpop.f32.mrf.mxu1  ;;  %v3620_v9 = vld [vmem:[%s2779_s19 + $0x180] sm:$0xff]  ;;  %v1198_v31 = vrot.slane %v3614_v38, 1 }
 0x145   : > { %v689_v14 = vadd.f32 %v688_v11, %v3341_v53  ;;  %4286 = vst [vmem:[#allocation17_spill] sm:$0xff] %v3620_v9 }
 0x146   : > { %v1176_v36 = vadd.f32 %v1104_v46, %v1020_v33 }
 0x147   : > { %2261 = vmatmul.msk.f32.gmra.mxu1 %vm383_vm2, %v4277_v6  ;;  %v1267_v30 = vpop.f32.mrf.mxu0 }
 0x148   : > { %v3607_v4 = vadd.f32 %v1264_v56, %v1176_v36  ;;  %2295 = vmatmul.msk.f32.gmra.mxu2 %vm383_vm2, %v3603_v41  ;;  %v1197_v56 = vrot.slane %v3620_v9, 1 }
 0x149   : > { %2329 = vmatmul.msk.f32.gmra.mxu3 %vm383_vm2, %v4285_v37 }
 0x14a   : > { %4284 = vst [vmem:[#allocation20_spill] sm:$0xff] %v3607_v4  ;;  %2363 = vmatmul.msk.f32.gmra.mxu0 %vm383_vm2, %v3130_v3  ;;  %v3627_v4 = vsel %vm745_vm3, %v821_v35, %v822_v47  ;;  %v3632_v11 = vsel %vm300_vm1, %v1197_v56, %v1198_v31  ;;  %v824_v35 = vrot.slane %v3103_v15, 2 }
 0x14b   : > { %v951_v36 = vpop.f32.mrf.mxu2 }
 0x14c   : > { %v1107_v6 = vpop.f32.mrf.mxu3  ;;  %v1021_v46 = vadd.f32 %v951_v36, %v689_v14  ;;  %v691_v33 = vpop.f32.mrf.mxu1  ;;  %v3641_v14 = vld [vmem:[%s2779_s19 + $0x190] sm:$0x3] }
 0x14d   : > { %v692_v36 = vadd.f32 %v691_v33, %v3362_v8 }
 0x14e   : > { %v1177_v52 = vadd.f32 %v1107_v6, %v1021_v46  ;;  %v3649_v46 = vsel %vm745_vm3, %v822_v47, %v824_v35 }
 0x14f   : > { %2262 = vmatmul.msk.f32.gmra.mxu1 %vm383_vm2, %v4281_v1  ;;  %v1270_v53 = vpop.f32.mrf.mxu0 }
 0x150   : > { %v3634_v3 = vadd.f32 %v1267_v30, %v1177_v52  ;;  %2296 = vmatmul.msk.f32.gmra.mxu2 %vm383_vm2, %v3627_v4  ;;  %v1200_v30 = vrot.slane %v3641_v14, 1 }
 0x151   : > { %2330 = vmatmul.msk.f32.gmra.mxu3 %vm383_vm2, %v3620_v9 }
 0x152   : > { %4287 = vst [vmem:[#allocation23_spill] sm:$0xff] %v3634_v3  ;;  %2364 = vmatmul.msk.f32.gmra.mxu0 %vm383_vm2, %v3632_v11  ;;  %v3654_v15 = vsel %vm300_vm1, %v1198_v31, %v1200_v30 }
 0x153   : > { %v954_v1 = vpop.f32.mrf.mxu2 }
 0x154   : > { %v1110_v6 = vpop.f32.mrf.mxu3  ;;  %v1022_v52 = vadd.f32 %v954_v1, %v692_v36  ;;  %v694_v56 = vpop.f32.mrf.mxu1 }
 0x155   : > { %v695_v33 = vadd.f32 %v694_v56, %v3382_v5 }
 0x156   : > { %v1178_v3 = vadd.f32 %v1110_v6, %v1022_v52 }
 0x157   : > { %2263 = vmatmul.msk.f32.gmra.mxu1 %vm383_vm2, %v4285_v37  ;;  %v1273_v9 = vpop.f32.mrf.mxu0 }
 0x158   : > { %v3656_v8 = vadd.f32 %v1270_v53, %v1178_v3  ;;  %2297 = vmatmul.msk.f32.gmra.mxu2 %vm383_vm2, %v3649_v46 }
 0x159   : > { %2331 = vmatmul.msk.f32.gmra.mxu3 %vm383_vm2, %v3614_v38 }
 0x15a   : > { %2365 = vmatmul.msk.f32.gmra.mxu0 %vm383_vm2, %v3654_v15 }
 0x15b   : > { %v957_v47 = vpop.f32.mrf.mxu2 }
 0x15c   : > { %v1113_v35 = vpop.f32.mrf.mxu3  ;;  %v1023_v37 = vadd.f32 %v957_v47, %v695_v33  ;;  %v697_v36 = vpop.f32.mrf.mxu1 }
 0x15d   : > { %v698_v5 = vadd.f32 %v697_v36, %v3255_v45 }
 0x15e   : > { %v1179_v1 = vadd.f32 %v1113_v35, %v1023_v37 }
 0x15f   : > { %2368 = vmatmul.msk.f32.vlgmr.msra.gmra.mxu1 %vm383_vm2, %v3165_v28  ;;  %v1276_v3 = vpop.f32.mrf.mxu0 }
 0x160   : > { %v3667_v31 = vadd.f32 %v1273_v9, %v1179_v1  ;;  %2402 = vmatmul.msk.f32.vlgmr.msra.gmra.mxu2 %vm383_vm2, %v2970_v27 }
 0x161   : > { %2436 = vmatmul.msk.f32.vlgmr.msra.gmra.mxu3 %vm383_vm2, %v3005_v62 }
 0x162   : > { %2470 = vmatmul.msk.f32.vlgmr.msra.gmra.mxu0 %vm383_vm2, %v3190_v61 }
 0x163   : > { %v960_v53 = vpop.f32.mrf.mxu2 }
 0x164   : > { %v1116_v6 = vpop.f32.mrf.mxu3  ;;  %v1024_v30 = vadd.f32 %v960_v53, %v698_v5  ;;  %v700_v52 = vpop.f32.mrf.mxu1 }
 0x165   : > { %v701_v27 = vadd.f32 %v700_v52, %v3276_v43 }
 0x166   : > { %v1180_v56 = vadd.f32 %v1116_v6, %v1024_v30 }
 0x167   : > { %2369 = vmatmul.msk.f32.gmra.mxu1 %vm383_vm2, %v3177_v59  ;;  %v1279_v28 = vpop.f32.mrf.mxu0 }
 0x168   : > { %v3678_v9 = vadd.f32 %v1276_v3, %v1180_v56  ;;  %2403 = vmatmul.msk.f32.gmra.mxu2 %vm383_vm2, %v2973_v29 }
 0x169   : > { %2437 = vmatmul.msk.f32.gmra.mxu3 %vm383_vm2, %v3061_v25 }
 0x16a   : > { %2471 = vmatmul.msk.f32.gmra.mxu0 %vm383_vm2, %v3202_v44 }
 0x16b   : > { %v963_v62 = vpop.f32.mrf.mxu2 }
 0x16c   : > { %v1119_v45 = vpop.f32.mrf.mxu3  ;;  %v1025_v33 = vadd.f32 %v963_v62, %v701_v27  ;;  %v703_v47 = vpop.f32.mrf.mxu1 }
 0x16d   : > { %v704_v29 = vadd.f32 %v703_v47, %v3296_v40  ;;  %v2571_v47 = vld [vmem:[%s2779_s19 + $0x68] sm:$0xff] }
 0x16e   : > { %v1181_v35 = vadd.f32 %v1119_v45, %v1025_v33 }
 0x16f   : > { %2370 = vmatmul.msk.f32.gmra.mxu1 %vm383_vm2, %v3190_v61  ;;  %v1282_v59 = vpop.f32.mrf.mxu0 }
 0x170   : > { %v3689_v37 = vadd.f32 %v1279_v28, %v1181_v35  ;;  %2404 = vmatmul.msk.f32.gmra.mxu2 %vm383_vm2, %v3070_v60 }
 0x171   : > { %2438 = vmatmul.msk.f32.gmra.mxu3 %vm383_vm2, %v3108_v12 }
 0x172   : > { %2472 = vmatmul.msk.f32.gmra.mxu0 %vm383_vm2, %v3215_v63 }
 0x173   : > { %v966_v25 = vpop.f32.mrf.mxu2 }
 0x174   : > { %v1122_v43 = vpop.f32.mrf.mxu3  ;;  %v1026_v36 = vadd.f32 %v966_v25, %v704_v29  ;;  %v706_v1 = vpop.f32.mrf.mxu1 }
 0x175   : > { %v707_v12 = vadd.f32 %v706_v1, %v3317_v16  ;;  %v4288_v16 = vld [vmem:[#allocation37_spill] sm:$0xff] }
 0x176   : > { %v1182_v3 = vadd.f32 %v1122_v43, %v1026_v36 }
 0x177   : > { %2371 = vmatmul.msk.f32.gmra.mxu1 %vm383_vm2, %v3202_v44  ;;  %v1285_v61 = vpop.f32.mrf.mxu0 }
 0x178   : > { %v3700_v5 = vadd.f32 %v1282_v59, %v1182_v3  ;;  %2405 = vmatmul.msk.f32.gmra.mxu2 %vm383_vm2, %v3073_v32  ;;  %v2570_v32 = vld [vmem:[%s2779_s19 + $0x60] sm:$0xff]  ;;  %v4291_v59 = vld [vmem:[#allocation39_spill] sm:$0xff] }
 0x179   : > { %2439 = vmatmul.msk.f32.gmra.mxu3 %vm383_vm2, %v3135_v24 }
 0x17a   : > { %2473 = vmatmul.msk.f32.gmra.mxu0 %vm383_vm2, %v3227_v55 }
 0x17b   : > { %v969_v60 = vpop.f32.mrf.mxu2 }
 0x17c   : > { %v1125_v40 = vpop.f32.mrf.mxu3  ;;  %v1027_v53 = vadd.f32 %v969_v60, %v707_v12  ;;  %v709_v6 = vpop.f32.mrf.mxu1  ;;  %v4292_v12 = vld [vmem:[#allocation15_spill] sm:$0xff] }
 0x17d   : > { %v710_v24 = vadd.f32 %v709_v6, %v3337_v42  ;;  %v4290_v42 = vld [vmem:[#allocation48_spill] sm:$0xff]  ;;  %v4293_v60 = vld [vmem:[#allocation51_spill] sm:$0xff] }
 0x17e   : > { %v1183_v30 = vadd.f32 %v1125_v40, %v1027_v53  ;;  %v4294_v53 = vld [vmem:[#allocation41_spill] sm:$0xff] }
 0x17f   : > { %2372 = vmatmul.msk.f32.gmra.mxu1 %vm383_vm2, %v3215_v63  ;;  %v1288_v44 = vpop.f32.mrf.mxu0 }
 0x180   : > { %v3711_v52 = vadd.f32 %v1285_v61, %v1183_v30  ;;  %2406 = vmatmul.msk.f32.gmra.mxu2 %vm383_vm2, %v2570_v32  ;;  %v2572_v61 = vld [vmem:[%s2779_s19 + $0x78] sm:$0xff] }
 0x181   : > { %2440 = vmatmul.msk.f32.gmra.mxu3 %vm383_vm2, %v2812_v19  ;;  %v4289_v19 = vld [vmem:[#allocation10_spill] sm:$0xff] }
 0x182   : > { %2474 = vmatmul.msk.f32.gmra.mxu0 %vm383_vm2, %v4288_v16 }
 0x183   : > { %v972_v56 = vpop.f32.mrf.mxu2 }
 0x184   : > { %v1128_v28 = vpop.f32.mrf.mxu3  ;;  %v1028_v27 = vadd.f32 %v972_v56, %v710_v24  ;;  %v712_v62 = vpop.f32.mrf.mxu1 }
 0x185   : > { %v713_v35 = vadd.f32 %v712_v62, %v4290_v42  ;;  %v4296_v62 = vld [vmem:[#allocation54_spill] sm:$0xff] }
 0x186   : > { %v1184_v63 = vadd.f32 %v1128_v28, %v1028_v27  ;;  %v2573_v28 = vld [vmem:[%s2779_s19 + $0x80] sm:$0xff]  ;;  %v4295_v27 = vld [vmem:[#allocation18_spill] sm:$0xff] }
 0x187   : > { %2373 = vmatmul.msk.f32.gmra.mxu1 %vm383_vm2, %v3227_v55  ;;  %v1291_v45 = vpop.f32.mrf.mxu0 }
 0x188   : > { %v3722_v33 = vadd.f32 %v1288_v44, %v1184_v63  ;;  %2407 = vmatmul.msk.f32.gmra.mxu2 %vm383_vm2, %v2571_v47 }
 0x189   : > { %2441 = vmatmul.msk.f32.gmra.mxu3 %vm383_vm2, %v4289_v19 }
 0x18a   : > { %2475 = vmatmul.msk.f32.gmra.mxu0 %vm383_vm2, %v4291_v59 }
 0x18b   : > { %v975_v29 = vpop.f32.mrf.mxu2 }
 0x18c   : > { %v1131_v25 = vpop.f32.mrf.mxu3  ;;  %v1029_v43 = vadd.f32 %v975_v29, %v713_v35  ;;  %v715_v36 = vpop.f32.mrf.mxu1 }
 0x18d   : > { %v716_v40 = vadd.f32 %v715_v36, %v4293_v60  ;;  %v4298_v36 = vld [vmem:[#allocation22_spill] sm:$0xff] }
 0x18e   : > { %v1185_v55 = vadd.f32 %v1131_v25, %v1029_v43  ;;  %v2574_v43 = vld [vmem:[%s2779_s19 + $0x90] sm:$0xff] }
 0x18f   : > { %2374 = vmatmul.msk.f32.gmra.mxu1 %vm383_vm2, %v4288_v16  ;;  %v1294_v1 = vpop.f32.mrf.mxu0 }
 0x190   : > { %v3733_v3 = vadd.f32 %v1291_v45, %v1185_v55  ;;  %2408 = vmatmul.msk.f32.gmra.mxu2 %vm383_vm2, %v2572_v61  ;;  %v4297_v45 = vld [vmem:[#allocation43_spill] sm:$0xff]  ;;  %v4299_v55 = vld [vmem:[#allocation38_spill] sm:$0xff]  ;;  %v4300_v61 = vld [vmem:[#allocation45_spill] sm:$0xff] }
 0x191   : > { %2442 = vmatmul.msk.f32.gmra.mxu3 %vm383_vm2, %v4292_v12 }
 0x192   : > { %2476 = vmatmul.msk.f32.gmra.mxu0 %vm383_vm2, %v4294_v53 }
 0x193   : > { %v978_v6 = vpop.f32.mrf.mxu2 }
 0x194   : > { %v1134_v30 = vpop.f32.mrf.mxu3  ;;  %v1030_v44 = vadd.f32 %v978_v6, %v716_v40  ;;  %v718_v32 = vpop.f32.mrf.mxu1 }
 0x195   : > { %v719_v63 = vadd.f32 %v718_v32, %v4296_v62  ;;  %v2575_v32 = vld [vmem:[%s2779_s19 + $0x98] sm:$0xff] }
 0x196   : > { %v1186_v24 = vadd.f32 %v1134_v30, %v1030_v44 }
 0x197   : > { %2375 = vmatmul.msk.f32.gmra.mxu1 %vm383_vm2, %v4291_v59  ;;  %v1297_v16 = vpop.f32.mrf.mxu0 }
 0x198   : > { %v3744_v56 = vadd.f32 %v1294_v1, %v1186_v24  ;;  %2409 = vmatmul.msk.f32.gmra.mxu2 %vm383_vm2, %v2573_v28  ;;  %v4301_v24 = vld [vmem:[#allocation26_spill] sm:$0xff] }
 0x199   : > { %2443 = vmatmul.msk.f32.gmra.mxu3 %vm383_vm2, %v4295_v27  ;;  %v4303_v27 = vld [vmem:[#allocation47_spill] sm:$0xff] }
 0x19a   : > { %2477 = vmatmul.msk.f32.gmra.mxu0 %vm383_vm2, %v4297_v45 }
 0x19b   : > { %v981_v47 = vpop.f32.mrf.mxu2 }
 0x19c   : > { %v1137_v19 = vpop.f32.mrf.mxu3  ;;  %v1031_v42 = vadd.f32 %v981_v47, %v719_v63  ;;  %v721_v35 = vpop.f32.mrf.mxu1 }
 0x19d   : > { %v722_v1 = vadd.f32 %v721_v35, %v4299_v55  ;;  %v4306_v55 = vld [vmem:[#allocation50_spill] sm:$0xff] }
 0x19e   : > { %v1187_v59 = vadd.f32 %v1137_v19, %v1031_v42 }
 0x19f   : > { %2376 = vmatmul.msk.f32.gmra.mxu1 %vm383_vm2, %v4294_v53  ;;  %v1300_v29 = vpop.f32.mrf.mxu0 }
 0x1a0   : > { %v3755_v25 = vadd.f32 %v1297_v16, %v1187_v59  ;;  %2410 = vmatmul.msk.f32.gmra.mxu2 %vm383_vm2, %v2574_v43  ;;  %v4302_v16 = vld [vmem:[#allocation40_spill] sm:$0xff]  ;;  %v2576_v59 = vld [vmem:[%s2779_s19 + $0xa8] sm:$0xff] }
 0x1a1   : > { %2444 = vmatmul.msk.f32.gmra.mxu3 %vm383_vm2, %v4298_v36  ;;  %v4305_v43 = vld [vmem:[#allocation42_spill] sm:$0xff] }
 0x1a2   : > { %2478 = vmatmul.msk.f32.gmra.mxu0 %vm383_vm2, %v4300_v61 }
 0x1a3   : > { %v984_v12 = vpop.f32.mrf.mxu2 }
 0x1a4   : > { %v1140_v60 = vpop.f32.mrf.mxu3  ;;  %v1032_v40 = vadd.f32 %v984_v12, %v722_v1  ;;  %v724_v6 = vpop.f32.mrf.mxu1 }
 0x1a5   : > { %v725_v28 = vadd.f32 %v724_v6, %v4302_v16 }
 0x1a6   : > { %v1188_v53 = vadd.f32 %v1140_v60, %v1032_v40 }
 0x1a7   : > { %2377 = vmatmul.msk.f32.gmra.mxu1 %vm383_vm2, %v4297_v45  ;;  %v1303_v30 = vpop.f32.mrf.mxu0 }
 0x1a8   : > { %v3766_v44 = vadd.f32 %v1300_v29, %v1188_v53  ;;  %2411 = vmatmul.msk.f32.gmra.mxu2 %vm383_vm2, %v2575_v32  ;;  %v4304_v29 = vld [vmem:[#allocation31_spill] sm:$0xff] }
 0x1a9   : > { %2445 = vmatmul.msk.f32.gmra.mxu3 %vm383_vm2, %v4301_v24  ;;  %v4307_v32 = vld [vmem:[#allocation35_spill] sm:$0xff]  ;;  %v4308_v24 = vld [vmem:[#allocation44_spill] sm:$0xff] }
 0x1aa   : > { %2479 = vmatmul.msk.f32.gmra.mxu0 %vm383_vm2, %v4303_v27 }
 0x1ab   : > { %v987_v62 = vpop.f32.mrf.mxu2 }
 0x1ac   : > { %v1143_v63 = vpop.f32.mrf.mxu3  ;;  %v1033_v47 = vadd.f32 %v987_v62, %v725_v28  ;;  %v727_v19 = vpop.f32.mrf.mxu1  ;;  %v4309_v28 = vld [vmem:[#allocation53_spill] sm:$0xff] }
 0x1ad   : > { %v728_v36 = vadd.f32 %v727_v19, %v4305_v43  ;;  %v4311_v43 = vld [vmem:[#allocation46_spill] sm:$0xff] }
 0x1ae   : > { %v1189_v45 = vadd.f32 %v1143_v63, %v1033_v47 }
 0x1af   : > { %2378 = vmatmul.msk.f32.gmra.mxu1 %vm383_vm2, %v4300_v61  ;;  %v1306_v42 = vpop.f32.mrf.mxu0 }
 0x1b0   : > { %v3777_v35 = vadd.f32 %v1303_v30, %v1189_v45  ;;  %2412 = vmatmul.msk.f32.gmra.mxu2 %vm383_vm2, %v2576_v59  ;;  %v2577_v30 = vld [vmem:[%s2779_s19 + $0xb0] sm:$0xff]  ;;  %v2578_v59 = vld [vmem:[%s2779_s19 + $0xc0] sm:$0xff] }
 0x1b1   : > { %2446 = vmatmul.msk.f32.gmra.mxu3 %vm383_vm2, %v4304_v29  ;;  %v4310_v29 = vld [vmem:[#allocation7_spill] sm:$0xff] }
 0x1b2   : > { %2480 = vmatmul.msk.f32.gmra.mxu0 %vm383_vm2, %v4306_v55 }
 0x1b3   : > { %v990_v1 = vpop.f32.mrf.mxu2 }
 0x1b4   : > { %v1146_v12 = vpop.f32.mrf.mxu3  ;;  %v1034_v60 = vadd.f32 %v990_v1, %v728_v36  ;;  %v730_v40 = vpop.f32.mrf.mxu1  ;;  %v4312_v1 = vld [vmem:[#allocation56_spill] sm:$0xff] }
 0x1b5   : > { %v731_v16 = vadd.f32 %v730_v40, %v4308_v24  ;;  %v4313_v24 = vld [vmem:[#allocation11_spill] sm:$0xff] }
 0x1b6   : > { %v1190_v61 = vadd.f32 %v1146_v12, %v1034_v60 }
 0x1b7   : > { %2379 = vmatmul.msk.f32.gmra.mxu1 %vm383_vm2, %v4303_v27  ;;  %v1309_v6 = vpop.f32.mrf.mxu0 }
 0x1b8   : > { %v3788_v53 = vadd.f32 %v1306_v42, %v1190_v61  ;;  %2413 = vmatmul.msk.f32.gmra.mxu2 %vm383_vm2, %v2577_v30 }
 0x1b9   : > { %2447 = vmatmul.msk.f32.gmra.mxu3 %vm383_vm2, %v4307_v32  ;;  %v2579_v32 = vld [vmem:[%s2779_s19 + $0xc8] sm:$0xff] }
 0x1ba   : > { %2481 = vmatmul.msk.f32.gmra.mxu0 %vm383_vm2, %v4309_v28 }
 0x1bb   : > { %v993_v62 = vpop.f32.mrf.mxu2 }
 0x1bc   : > { %v1149_v63 = vpop.f32.mrf.mxu3  ;;  %v1035_v47 = vadd.f32 %v993_v62, %v731_v16  ;;  %v733_v19 = vpop.f32.mrf.mxu1  ;;  %v4314_v16 = vld [vmem:[#allocation49_spill] sm:$0xff] }
 0x1bd   : > { %v734_v36 = vadd.f32 %v733_v19, %v4311_v43  ;;  %v4315_v43 = vld [vmem:[#allocation52_spill] sm:$0xff] }
 0x1be   : > { %v1191_v27 = vadd.f32 %v1149_v63, %v1035_v47 }
 0x1bf   : > { %2380 = vmatmul.msk.f32.gmra.mxu1 %vm383_vm2, %v4306_v55  ;;  %v1312_v45 = vpop.f32.mrf.mxu0 }
 0x1c0   : > { %v3799_v42 = vadd.f32 %v1309_v6, %v1191_v27  ;;  %2414 = vmatmul.msk.f32.gmra.mxu2 %vm383_vm2, %v2578_v59 }
 0x1c1   : > { %2448 = vmatmul.msk.f32.gmra.mxu3 %vm383_vm2, %v4310_v29  ;;  %v2580_v29 = vld [vmem:[%s2779_s19 + $0xd8] sm:$0xff] }
 0x1c2   : > { %2482 = vmatmul.msk.f32.gmra.mxu0 %vm383_vm2, %v4312_v1 }
 0x1c3   : > { %v996_v12 = vpop.f32.mrf.mxu2 }
 0x1c4   : > { %v1152_v60 = vpop.f32.mrf.mxu3  ;;  %v1036_v40 = vadd.f32 %v996_v12, %v734_v36  ;;  %v736_v61 = vpop.f32.mrf.mxu1 }
 0x1c5   : > { %v737_v62 = vadd.f32 %v736_v61, %v4314_v16 }
 0x1c6   : > { %v1192_v55 = vadd.f32 %v1152_v60, %v1036_v40 }
 0x1c7   : > { %2381 = vmatmul.msk.f32.gmra.mxu1 %vm383_vm2, %v4309_v28  ;;  %v1315_v6 = vpop.f32.mrf.mxu0 }
 0x1c8   : > { %v3810_v30 = vadd.f32 %v1312_v45, %v1192_v55  ;;  %2415 = vmatmul.msk.f32.gmra.mxu2 %vm383_vm2, %v2579_v32  ;;  %v2581_v32 = vld [vmem:[%s2779_s19 + $0xe0] sm:$0xff] }
 0x1c9   : > { %2449 = vmatmul.msk.f32.gmra.mxu3 %vm383_vm2, %v4313_v24 }
 0x1ca   : > { %2483 = vmatmul.msk.f32.gmra.mxu0 %vm383_vm2, %v3417_v7 }
 0x1cb   : > { %v999_v63 = vpop.f32.mrf.mxu2 }
 0x1cc   : > { %v1155_v47 = vpop.f32.mrf.mxu3  ;;  %v1037_v19 = vadd.f32 %v999_v63, %v737_v62  ;;  %v739_v27 = vpop.f32.mrf.mxu1 }
 0x1cd   : > { %v740_v36 = vadd.f32 %v739_v27, %v4315_v43 }
 0x1ce   : > { %v1193_v28 = vadd.f32 %v1155_v47, %v1037_v19 }
 0x1cf   : > { %2382 = vmatmul.msk.f32.gmra.mxu1 %vm383_vm2, %v4312_v1  ;;  %v1318_v45 = vpop.f32.mrf.mxu0 }
 0x1d0   : > { %v3821_v59 = vadd.f32 %v1315_v6, %v1193_v28  ;;  %2416 = vmatmul.msk.f32.gmra.mxu2 %vm383_vm2, %v2580_v29  ;;  %v2582_v28 = vld [vmem:[%s2779_s19 + $0xf0] sm:$0xff] }
 0x1d1   : > { %2450 = vmatmul.msk.f32.gmra.mxu3 %vm383_vm2, %v2899_v54  ;;  %v4316_v54 = vld [vmem:[#allocation55_spill] sm:$0xff] }
 0x1d2   : > { %2484 = vmatmul.msk.f32.gmra.mxu0 %vm383_vm2, %v3433_v0 }
 0x1d3   : > { %v1002_v12 = vpop.f32.mrf.mxu2 }
 0x1d4   : > { %v1158_v60 = vpop.f32.mrf.mxu3  ;;  %v1038_v40 = vadd.f32 %v1002_v12, %v740_v36  ;;  %v742_v61 = vpop.f32.mrf.mxu1  ;;  %v3856_v12 = vld [vmem:[%s4120_s2] ss:$0 sm:$0xff] }
 0x1d5   : > { %v743_v24 = vadd.f32 %v742_v61, %v4316_v54 }
 0x1d6   : > { %v1194_v1 = vadd.f32 %v1158_v60, %v1038_v40  ;;  %v2583_v60 = vld [vmem:[%s2779_s19 + $0xf8] sm:$0xff] }
 0x1d7   : > { %2383 = vmatmul.msk.f32.gmra.mxu1 %vm383_vm2, %v3417_v7  ;;  %v1321_v55 = vpop.f32.mrf.mxu0 }
 0x1d8   : > { %v3832_v6 = vadd.f32 %v1318_v45, %v1194_v1  ;;  %2417 = vmatmul.msk.f32.gmra.mxu2 %vm383_vm2, %v2581_v32 }
 0x1d9   : > { %2451 = vmatmul.msk.f32.gmra.mxu3 %vm383_vm2, %v2935_v2 }
 0x1da   : > { %2485 = vmatmul.msk.f32.gmra.mxu0 %vm383_vm2, %v3448_v23 }
 0x1db   : > { %v1005_v16 = vpop.f32.mrf.mxu2 }
 0x1dc   : > { %v1161_v62 = vpop.f32.mrf.mxu3  ;;  %v1039_v63 = vadd.f32 %v1005_v16, %v743_v24  ;;  %v1387_v7 = vpop.f32.mrf.mxu1  ;;  %v2584_v16 = vld [vmem:[%s2779_s19 + $0x108] sm:$0xff] }
 0x1dd   : > { %v1483_v2 = vadd.f32 %v1387_v7, %v3421_v18 }
 0x1de   : > { %v1195_v47 = vadd.f32 %v1161_v62, %v1039_v63 }
 0x1df   : > { %2384 = vmatmul.msk.f32.gmra.mxu1 %vm383_vm2, %v3433_v0  ;;  %v1862_v19 = vpop.f32.mrf.mxu0 }
 0x1e0   : > { %v3843_v27 = vadd.f32 %v1321_v55, %v1195_v47  ;;  %2418 = vmatmul.msk.f32.gmra.mxu2 %vm383_vm2, %v2582_v28 }
 0x1e1   : > { %2452 = vmatmul.msk.f32.gmra.mxu3 %vm383_vm2, %v2990_v49 }
 0x1e2   : > { %2486 = vmatmul.msk.f32.gmra.mxu0 %vm383_vm2, %v3464_v26 }
 0x1e3   : > { %v1543_v45 = vpop.f32.mrf.mxu2 }
 0x1e4   : > { %v1703_v29 = vpop.f32.mrf.mxu3  ;;  %v1639_v43 = vadd.f32 %v1543_v45, %v1483_v2  ;;  %v1390_v0 = vpop.f32.mrf.mxu1 }
 0x1e5   : > { %v1484_v40 = vadd.f32 %v1390_v0, %v3437_v22 }
 0x1e6   : > { %v1799_v36 = vadd.f32 %v1703_v29, %v1639_v43  ;;  %v2585_v29 = vld [vmem:[%s2779_s19 + $0x110] sm:$0xff] }
 0x1e7   : > { %2385 = vmatmul.msk.f32.gmra.mxu1 %vm383_vm2, %v3448_v23  ;;  %v1865_v49 = vpop.f32.mrf.mxu0 }
 0x1e8   : > { %v1958_v18 = vadd.f32 %v1862_v19, %v1799_v36  ;;  %2419 = vmatmul.msk.f32.gmra.mxu2 %vm383_vm2, %v2583_v60 }
 0x1e9   : > { %2453 = vmatmul.msk.f32.gmra.mxu3 %vm383_vm2, %v3035_v58 }
 0x1ea   : > { %v1994_v61 = vadd.f32 %v3856_v12, %v1958_v18  ;;  %2487 = vmatmul.msk.f32.gmra.mxu0 %vm383_vm2, %v3479_v10 }
 0x1eb   : > { %v1546_v1 = vpop.f32.mrf.mxu2 }
 0x1ec   : > { %v1706_v23 = vpop.f32.mrf.mxu3  ;;  %v2026_v55 = vmax.f32 %v1994_v61, 0.0  ;;  %v1640_v32 = vadd.f32 %v1546_v1, %v1484_v40  ;;  %v1393_v54 = vpop.f32.mrf.mxu1  ;;  %v2586_v1 = vld [vmem:[%s2779_s19 + $0x120] sm:$0xff] }
 0x1ed   : > { %v1485_v62 = vadd.f32 %v1393_v54, %v3452_v48  ;;  %v4317_v48 = vld [vmem:[#allocation57_spill] sm:$0xff] }
 0x1ee   : > { %2058 = vst [vmem:[%s3870_s9] sm:$0xff] %v2026_v55  ;;  %v1800_v24 = vadd.f32 %v1706_v23, %v1640_v32  ;;  %v4318_v23 = vld [vmem:[#allocation24_spill] sm:$0xff]  ;;  %v4319_v54 = vld [vmem:[#allocation5_spill] sm:$0xff] }
 0x1ef   : > { %2386 = vmatmul.msk.f32.gmra.mxu1 %vm383_vm2, %v3464_v26  ;;  %v1868_v58 = vpop.f32.mrf.mxu0 }
 0x1f0   : > { %v1959_v22 = vadd.f32 %v1865_v49, %v1800_v24  ;;  %2420 = vmatmul.msk.f32.gmra.mxu2 %vm383_vm2, %v2584_v16 }
 0x1f1   : > { %2454 = vmatmul.msk.f32.gmra.mxu3 %vm383_vm2, %v4253_v17 }
 0x1f2   : > { %v1995_v63 = vadd.f32 %v3856_v12, %v1959_v22  ;;  %2488 = vmatmul.msk.f32.gmra.mxu0 %vm383_vm2, %v3495_v57 }
 0x1f3   : > { %v1549_v7 = vpop.f32.mrf.mxu2 }
 0x1f4   : > { %v1709_v47 = vpop.f32.mrf.mxu3  ;;  %v2027_v19 = vmax.f32 %v1995_v63, 0.0  ;;  %v1641_v26 = vadd.f32 %v1549_v7, %v1485_v62  ;;  %v1396_v28 = vpop.f32.mrf.mxu1  ;;  %v2587_v7 = vld [vmem:[%s2779_s19 + $0x128] sm:$0xff] }
 0x1f5   : > { %v1486_v43 = vadd.f32 %v1396_v28, %v4317_v48 }
 0x1f6   : > { %2059 = vst [vmem:[%s3870_s9 + $0x8] sm:$0xff] %v2027_v19  ;;  %v1801_v2 = vadd.f32 %v1709_v47, %v1641_v26  ;;  %v4320_v47 = vld [vmem:[#allocation12_spill] sm:$0xff] }
 0x1f7   : > { %2387 = vmatmul.msk.f32.gmra.mxu1 %vm383_vm2, %v3479_v10  ;;  %v1871_v45 = vpop.f32.mrf.mxu0  ;;  %v4321_v19 = vld [vmem:[#allocation32_spill] sm:$0xff] }
 0x1f8   : > { %v1960_v17 = vadd.f32 %v1868_v58, %v1801_v2  ;;  %2421 = vmatmul.msk.f32.gmra.mxu2 %vm383_vm2, %v2585_v29 }
 0x1f9   : > { %2455 = vmatmul.msk.f32.gmra.mxu3 %vm383_vm2, %v3127_v13 }
 0x1fa   : > { %v1996_v0 = vadd.f32 %v3856_v12, %v1960_v17  ;;  %2489 = vmatmul.msk.f32.gmra.mxu0 %vm383_vm2, %v3510_v51 }
 0x1fb   : > { %v1552_v36 = vpop.f32.mrf.mxu2 }
 0x1fc   : > { %v1712_v49 = vpop.f32.mrf.mxu3  ;;  %v2028_v18 = vmax.f32 %v1996_v0, 0.0  ;;  %v1642_v10 = vadd.f32 %v1552_v36, %v1486_v43  ;;  %v1399_v60 = vpop.f32.mrf.mxu1  ;;  %v2588_v36 = vld [vmem:[%s2779_s19 + $0x138] sm:$0xff] }
 0x1fd   : > { %v1487_v55 = vadd.f32 %v1399_v60, %v4318_v23  ;;  %v4323_v60 = vld [vmem:[#allocation6_spill] sm:$0xff] }
 0x1fe   : > { %2060 = vst [vmem:[%s3870_s9 + $0x10] sm:$0xff] %v2028_v18  ;;  %v1802_v40 = vadd.f32 %v1712_v49, %v1642_v10  ;;  %v4322_v49 = vld [vmem:[#allocation28_spill] sm:$0xff] }
 0x1ff   : > { %2388 = vmatmul.msk.f32.gmra.mxu1 %vm383_vm2, %v3495_v57  ;;  %v1874_v61 = vpop.f32.mrf.mxu0 }
 0x200   : > { %v1961_v13 = vadd.f32 %v1871_v45, %v1802_v40  ;;  %2422 = vmatmul.msk.f32.gmra.mxu2 %vm383_vm2, %v2586_v1 }
 0x201   : > { %2456 = vmatmul.msk.f32.gmra.mxu3 %vm383_vm2, %v4259_v34 }
 0x202   : > { %v1997_v32 = vadd.f32 %v3856_v12, %v1961_v13  ;;  %2490 = vmatmul.msk.f32.gmra.mxu0 %vm383_vm2, %v4319_v54 }
 0x203   : > { %v1555_v24 = vpop.f32.mrf.mxu2 }
 0x204   : > { %v1715_v58 = vpop.f32.mrf.mxu3  ;;  %v2029_v22 = vmax.f32 %v1997_v32, 0.0  ;;  %v1643_v57 = vadd.f32 %v1555_v24, %v1487_v55  ;;  %v1402_v16 = vpop.f32.mrf.mxu1  ;;  %v4324_v24 = vld [vmem:[#allocation19_spill] sm:$0xff] }
 0x205   : > { %v1488_v26 = vadd.f32 %v1402_v16, %v4321_v19 }
 0x206   : > { %2061 = vst [vmem:[%s3870_s9 + $0x18] sm:$0xff] %v2029_v22  ;;  %v1803_v62 = vadd.f32 %v1715_v58, %v1643_v57  ;;  %v4325_v58 = vld [vmem:[#allocation34_spill] sm:$0xff] }
 0x207   : > { %2389 = vmatmul.msk.f32.gmra.mxu1 %vm383_vm2, %v3510_v51  ;;  %v1877_v63 = vpop.f32.mrf.mxu0 }
 0x208   : > { %v1962_v34 = vadd.f32 %v1874_v61, %v1803_v62  ;;  %2423 = vmatmul.msk.f32.gmra.mxu2 %vm383_vm2, %v2587_v7 }
 0x209   : > { %2457 = vmatmul.msk.f32.gmra.mxu3 %vm383_vm2, %v4320_v47 }
 0x20a   : > { %v1998_v28 = vadd.f32 %v3856_v12, %v1962_v34  ;;  %2491 = vmatmul.msk.f32.gmra.mxu0 %vm383_vm2, %v3541_v39 }
 0x20b   : > { %v1558_v2 = vpop.f32.mrf.mxu2 }
 0x20c   : > { %v1718_v45 = vpop.f32.mrf.mxu3  ;;  %v2030_v17 = vmax.f32 %v1998_v28, 0.0  ;;  %v1644_v51 = vadd.f32 %v1558_v2, %v1488_v26  ;;  %v1405_v29 = vpop.f32.mrf.mxu1  ;;  %v2590_v26 = vld [vmem:[%s2779_s19 + $0x150] sm:$0xff]  ;;  %v4326_v28 = vld [vmem:[#allocation8_spill] sm:$0xff] }
 0x20d   : > { %v1489_v18 = vadd.f32 %v1405_v29, %v4322_v49 }
 0x20e   : > { %2062 = vst [vmem:[%s3870_s9 + $0x20] sm:$0xff] %v2030_v17  ;;  %v1804_v48 = vadd.f32 %v1718_v45, %v1644_v51  ;;  %v4327_v17 = vld [vmem:[#allocation16_spill] sm:$0xff] }
 0x20f   : > { %2390 = vmatmul.msk.f32.gmra.mxu1 %vm383_vm2, %v4319_v54  ;;  %v1880_v43 = vpop.f32.mrf.mxu0  ;;  %v2589_v54 = vld [vmem:[%s2779_s19 + $0x140] sm:$0xff] }
 0x210   : > { %v1963_v0 = vadd.f32 %v1877_v63, %v1804_v48  ;;  %2424 = vmatmul.msk.f32.gmra.mxu2 %vm383_vm2, %v2588_v36 }
 0x211   : > { %2458 = vmatmul.msk.f32.gmra.mxu3 %vm383_vm2, %v4267_v21 }
 0x212   : > { %v1999_v10 = vadd.f32 %v3856_v12, %v1963_v0  ;;  %2492 = vmatmul.msk.f32.gmra.mxu0 %vm383_vm2, %v4323_v60 }
 0x213   : > { %v1561_v40 = vpop.f32.mrf.mxu2 }
 0x214   : > { %v1721_v61 = vpop.f32.mrf.mxu3  ;;  %v2031_v13 = vmax.f32 %v1999_v10, 0.0  ;;  %v1645_v1 = vadd.f32 %v1561_v40, %v1489_v18  ;;  %v1408_v23 = vpop.f32.mrf.mxu1  ;;  %v2591_v18 = vld [vmem:[%s2779_s19 + $0x158] sm:$0xff]  ;;  %v4328_v10 = vld [vmem:[#allocation27_spill] sm:$0xff] }
 0x215   : > { %v1490_v22 = vadd.f32 %v1408_v23, %v4325_v58  ;;  %v4330_v58 = vld [vmem:[#allocation33_spill] sm:$0xff] }
 0x216   : > { %2063 = vst [vmem:[%s3870_s9 + $0x28] sm:$0xff] %v2031_v13  ;;  %v1805_v55 = vadd.f32 %v1721_v61, %v1645_v1 }
 0x217   : > { %2391 = vmatmul.msk.f32.gmra.mxu1 %vm383_vm2, %v3541_v39  ;;  %v1883_v32 = vpop.f32.mrf.mxu0 }
 0x218   : > { %v1964_v21 = vadd.f32 %v1880_v43, %v1805_v55  ;;  %2425 = vmatmul.msk.f32.gmra.mxu2 %vm383_vm2, %v2589_v54 }
 0x219   : > { %2459 = vmatmul.msk.f32.gmra.mxu3 %vm383_vm2, %v4324_v24  ;;  %v2592_v24 = vld [vmem:[%s2779_s19 + $0x168] sm:$0xff] }
 0x21a   : > { %v2000_v57 = vadd.f32 %v3856_v12, %v1964_v21  ;;  %2493 = vmatmul.msk.f32.gmra.mxu0 %vm383_vm2, %v3572_v20 }
 0x21b   : > { %v1564_v16 = vpop.f32.mrf.mxu2 }
 0x21c   : > { %v1724_v62 = vpop.f32.mrf.mxu3  ;;  %v2032_v63 = vmax.f32 %v2000_v57, 0.0  ;;  %v1646_v39 = vadd.f32 %v1564_v16, %v1490_v22  ;;  %v1411_v34 = vpop.f32.mrf.mxu1  ;;  %v4331_v22 = vld [vmem:[#allocation9_spill] sm:$0xff] }
 0x21d   : > { %v1491_v2 = vadd.f32 %v1411_v34, %v4326_v28  ;;  %v2593_v28 = vld [vmem:[%s2779_s19 + $0x170] sm:$0xff] }
 0x21e   : > { %2064 = vst [vmem:[%s3870_s9 + $0x30] sm:$0xff] %v2032_v63  ;;  %v1806_v7 = vadd.f32 %v1724_v62, %v1646_v39 }
 0x21f   : > { %2392 = vmatmul.msk.f32.gmra.mxu1 %vm383_vm2, %v4323_v60  ;;  %v1886_v47 = vpop.f32.mrf.mxu0  ;;  %v4329_v60 = vld [vmem:[#allocation13_spill] sm:$0xff] }
 0x220   : > { %v1965_v19 = vadd.f32 %v1883_v32, %v1806_v7  ;;  %2426 = vmatmul.msk.f32.gmra.mxu2 %vm383_vm2, %v2590_v26 }
 0x221   : > { %2460 = vmatmul.msk.f32.gmra.mxu3 %vm383_vm2, %v4275_v50 }
 0x222   : > { %v2001_v45 = vadd.f32 %v3856_v12, %v1965_v19  ;;  %2494 = vmatmul.msk.f32.gmra.mxu0 %vm383_vm2, %v4327_v17 }
 0x223   : > { %v1567_v51 = vpop.f32.mrf.mxu2 }
 0x224   : > { %v1727_v29 = vpop.f32.mrf.mxu3  ;;  %v2033_v48 = vmax.f32 %v2001_v45, 0.0  ;;  %v1647_v43 = vadd.f32 %v1567_v51, %v1491_v2  ;;  %v1414_v0 = vpop.f32.mrf.mxu1  ;;  %v4332_v2 = vld [vmem:[#allocation36_spill] sm:$0xff]  ;;  %v4333_v45 = vld [vmem:[#allocation14_spill] sm:$0xff] }
 0x225   : > { %v1492_v40 = vadd.f32 %v1414_v0, %v4329_v60 }
 0x226   : > { %2065 = vst [vmem:[%s3870_s9 + $0x38] sm:$0xff] %v2033_v48  ;;  %v1807_v36 = vadd.f32 %v1727_v29, %v1647_v43  ;;  %v4334_v29 = vld [vmem:[#allocation17_spill] sm:$0xff] }
 0x227   : > { %2393 = vmatmul.msk.f32.gmra.mxu1 %vm383_vm2, %v3572_v20  ;;  %v1889_v49 = vpop.f32.mrf.mxu0  ;;  %v1356_v48 = vrot.slane %v4334_v29, 2 }
 0x228   : > { %v1966_v50 = vadd.f32 %v1886_v47, %v1807_v36  ;;  %2427 = vmatmul.msk.f32.gmra.mxu2 %vm383_vm2, %v2591_v18 }
 0x229   : > { %2461 = vmatmul.msk.f32.gmra.mxu3 %vm383_vm2, %v4328_v10 }
 0x22a   : > { %v2002_v61 = vadd.f32 %v3856_v12, %v1966_v50  ;;  %2495 = vmatmul.msk.f32.gmra.mxu0 %vm383_vm2, %v3603_v41 }
 0x22b   : > { %v1570_v13 = vpop.f32.mrf.mxu2 }
 0x22c   : > { %v1730_v1 = vpop.f32.mrf.mxu3  ;;  %v2034_v23 = vmax.f32 %v2002_v61, 0.0  ;;  %v1648_v20 = vadd.f32 %v1570_v13, %v1492_v40  ;;  %v1417_v55 = vpop.f32.mrf.mxu1  ;;  %v4335_v61 = vld [vmem:[#allocation20_spill] sm:$0xff] }
 0x22d   : > { %v1493_v57 = vadd.f32 %v1417_v55, %v4331_v22 }
 0x22e   : > { %2066 = vst [vmem:[%s3870_s9 + $0x40] sm:$0xff] %v2034_v23  ;;  %v1808_v32 = vadd.f32 %v1730_v1, %v1648_v20  ;;  %v1359_v20 = vrot.slane %v3641_v14, 2 }
 0x22f   : > { %2394 = vmatmul.msk.f32.gmra.mxu1 %vm383_vm2, %v4327_v17  ;;  %v1892_v21 = vpop.f32.mrf.mxu0 }
 0x230   : > { %v1967_v54 = vadd.f32 %v1889_v49, %v1808_v32  ;;  %2428 = vmatmul.msk.f32.gmra.mxu2 %vm383_vm2, %v2592_v24  ;;  %v248_v24 = vld [vmem:[%s2779_s19 + $0x198] sm:$0xff] }
 0x231   : > { %2462 = vmatmul.msk.f32.gmra.mxu3 %vm383_vm2, %v4330_v58  ;;  %v249_v58 = vld [vmem:[%s2779_s19 + $0x1a0] sm:$0xff]  ;;  %v1672_v14 = vrot.slane %v248_v24, 1 }
 0x232   : > { %v2003_v16 = vadd.f32 %v3856_v12, %v1967_v54  ;;  %2496 = vmatmul.msk.f32.gmra.mxu0 %vm383_vm2, %v3627_v4 }
 0x233   : > { %v1573_v62 = vpop.f32.mrf.mxu2 }
 0x234   : > { %v1733_v63 = vpop.f32.mrf.mxu3  ;;  %v2035_v39 = vmax.f32 %v2003_v16, 0.0  ;;  %v1649_v34 = vadd.f32 %v1573_v62, %v1493_v57  ;;  %v1420_v7 = vpop.f32.mrf.mxu1  ;;  %v1673_v16 = vrot.slane %v249_v58, 1  ;;  %v4336_v62 = vld [vmem:[#allocation23_spill] sm:$0xff] }
 0x235   : > { %v1494_v17 = vadd.f32 %v1420_v7, %v4333_v45  ;;  %v1831_v7 = vrot.slane %v248_v24, 2 }
 0x236   : > { %2067 = vst [vmem:[%s3870_s9 + $0x48] sm:$0xff] %v2035_v39  ;;  %v1809_v47 = vadd.f32 %v1733_v63, %v1649_v34 }
 0x237   : > { %2395 = vmatmul.msk.f32.gmra.mxu1 %vm383_vm2, %v3603_v41  ;;  %v1895_v19 = vpop.f32.mrf.mxu0  ;;  %v1357_v41 = vrot.slane %v3614_v38, 2 }
 0x238   : > { %v1968_v26 = vadd.f32 %v1892_v21, %v1809_v47  ;;  %2429 = vmatmul.msk.f32.gmra.mxu2 %vm383_vm2, %v2593_v28  ;;  %v1832_v47 = vrot.slane %v249_v58, 2 }
 0x239   : > { %2463 = vmatmul.msk.f32.gmra.mxu3 %vm383_vm2, %v4332_v2  ;;  %v1358_v60 = vsel %vm745_vm3, %v1356_v48, %v1357_v41  ;;  %v1360_v22 = vsel %vm745_vm3, %v1357_v41, %v1359_v20  ;;  %v250_v2 = vld [vmem:[%s2779_s19 + $0x1a8] sm:$0x3]  ;;  %s2104_s19 = scalar_lea.hbm %s4121_s3, %s2507_s10 }
 0x23a   : > { %v2004_v51 = vadd.f32 %v3856_v12, %v1968_v26  ;;  %2497 = vmatmul.msk.f32.gmra.mxu0 %vm383_vm2, %v3649_v46  ;;  %s2107_s23 = sshll.u32 %s2104_s19, 4  ;;  %s2108_s23 = int_to_ptr.hbm [resolvable:$true] %s2107_s23 }
 0x23b   : > { %v1576_v43 = vpop.f32.mrf.mxu2  ;;  %s2608_s26 = sshra.s32 %s2108_s23, 4  ;;  %s2609_s26 = int_to_ptr.hbm [resolvable:$true] %s2608_s26 }
 0x23c   : > { %v1736_v0 = vpop.f32.mrf.mxu3  ;;  %v2036_v36 = vmax.f32 %v2004_v51, 0.0  ;;  %v1650_v49 = vadd.f32 %v1576_v43, %v1494_v17  ;;  %v1423_v50 = vpop.f32.mrf.mxu1  ;;  %v1833_v17 = vsel %vm745_vm3, %v1831_v7, %v1832_v47  ;;  %s2610_s27 = scalar_lea.hbm %s2609_s26, 256  ;;  %p2615_p1 = scmp.lt.s32.totalorder %s2609_s26, %s4121_s3 }
 0x23d   : > { %v1495_v13 = vadd.f32 %v1423_v50, %v4335_v61  ;;  %p2611_p12 = scmp.ne.s32.totalorder %s2609_s26, %s2610_s27  ;;  %p2616_p2 = scmp.lt.s32.totalorder %s2614_s30, %s2610_s27 }
 0x23e   : > { %2068 = vst [vmem:[%s3870_s9 + $0x50] sm:$0xff] %v2036_v36  ;;  %v1810_v18 = vadd.f32 %v1736_v0, %v1650_v49  ;;  %v1834_v36 = vrot.slane %v250_v2, 2 }
 0x23f   : > { %2396 = vmatmul.msk.f32.gmra.mxu1 %vm383_vm2, %v3627_v4  ;;  %v1898_v10 = vpop.f32.mrf.mxu0  ;;  %p2612_p13 = pnand %p2611_p12, %p2736_p4  ;;  %p2617_p3 = por %p2616_p2, %p2615_p1 }
 0x240   : > { %v1969_v40 = vadd.f32 %v1895_v19, %v1810_v18  ;;  %2430 = vmatmul.msk.f32.gmra.mxu2 %vm383_vm2, %v4334_v29  ;;  %v1675_v29 = vrot.slane %v250_v2, 1 }
 0x241   : > { %2464 = vmatmul.msk.f32.gmra.mxu3 %vm383_vm2, %v3632_v11  ;;  %p2613_p0 = pneg %p2612_p13 }
 0x242   : > { %v2005_v1 = vadd.f32 %v3856_v12, %v1969_v40  ;;  %2498 = vmatmul.msk.f32.gmra.mxu0 %vm383_vm2, %v1358_v60 }
 0x243   : > { %v1579_v23 = vpop.f32.mrf.mxu2  ;;  %p2618_p5 = pnand %p2617_p3, %p2613_p0 }
 0x244   : > { %v1739_v4 = vpop.f32.mrf.mxu3  ;;  %v2037_v55 = vmax.f32 %v2005_v1, 0.0  ;;  %v1651_v32 = vadd.f32 %v1579_v23, %v1495_v13  ;;  %v1426_v21 = vpop.f32.mrf.mxu1 }
 0x245   : > { %v1496_v63 = vadd.f32 %v1426_v21, %v4336_v62 }
 0x246   : > { %2069 = vst [vmem:[%s3870_s9 + $0x58] sm:$0xff] %v2037_v55  ;;  %v1811_v54 = vadd.f32 %v1739_v4, %v1651_v32 }
 0x247   : > { %2397 = vmatmul.msk.f32.gmra.mxu1 %vm383_vm2, %v3649_v46  ;;  %v1901_v11 = vpop.f32.mrf.mxu0 }
 0x248   : > { %v1970_v57 = vadd.f32 %v1898_v10, %v1811_v54  ;;  %2431 = vmatmul.msk.f32.gmra.mxu2 %vm383_vm2, %v3614_v38  ;;  %v1674_v38 = vsel %vm300_vm1, %v1672_v14, %v1673_v16  ;;  %v1676_v10 = vsel %vm300_vm1, %v1673_v16, %v1675_v29 }
 0x249   : > { %2465 = vmatmul.msk.f32.gmra.mxu3 %vm383_vm2, %v3654_v15 }
 0x24a   : > { %v2006_v39 = vadd.f32 %v3856_v12, %v1970_v57  ;;  %2499 = vmatmul.msk.f32.gmra.mxu0 %vm383_vm2, %v1360_v22 }
 0x24b   : > { %v1582_v46 = vpop.f32.mrf.mxu2 }
 0x24c   : > { %v1742_v34 = vpop.f32.mrf.mxu3  ;;  %v2038_v19 = vmax.f32 %v2006_v39, 0.0  ;;  %v1652_v26 = vadd.f32 %v1582_v46, %v1496_v63  ;;  %v1429_v28 = vpop.f32.mrf.mxu1 }
 0x24d   : > { %v1497_v48 = vadd.f32 %v1429_v28, %v3656_v8  ;;  %v1835_v8 = vsel %vm745_vm3, %v1832_v47, %v1834_v36 }
 0x24e   : > { %2070 = vst [vmem:[%s3870_s9 + $0x60] sm:$0xff] %v2038_v19  ;;  %v1812_v15 = vadd.f32 %v1742_v34, %v1652_v26 }
 0x24f   : > { %2398 = vmatmul.msk.f32.gmra.mxu1 %vm383_vm2, %v1358_v60  ;;  %v1904_v45 = vpop.f32.mrf.mxu0 }
 0x250   : > { %v1971_v51 = vadd.f32 %v1901_v11, %v1812_v15  ;;  %2432 = vmatmul.msk.f32.gmra.mxu2 %vm383_vm2, %v248_v24 }
 0x251   : > { %2466 = vmatmul.msk.f32.gmra.mxu3 %vm383_vm2, %v1674_v38 }
 0x252   : > { %v2007_v41 = vadd.f32 %v3856_v12, %v1971_v51  ;;  %2500 = vmatmul.msk.f32.gmra.mxu0 %vm383_vm2, %v1833_v17 }
 0x253   : > { %v1585_v43 = vpop.f32.mrf.mxu2 }
 0x254   : > { %v1745_v0 = vpop.f32.mrf.mxu3  ;;  %v2039_v49 = vmax.f32 %v2007_v41, 0.0  ;;  %v1653_v50 = vadd.f32 %v1585_v43, %v1497_v48  ;;  %v1432_v18 = vpop.f32.mrf.mxu1 }
 0x255   : > { %v1498_v13 = vadd.f32 %v1432_v18, %v3667_v31 }
 0x256   : > { %2071 = vst [vmem:[%s3870_s9 + $0x68] sm:$0xff] %v2039_v49  ;;  %v1813_v60 = vadd.f32 %v1745_v0, %v1653_v50 }
 0x257   : > { %2399 = vmatmul.msk.f32.gmra.mxu1 %vm383_vm2, %v1360_v22  ;;  %v1907_v40 = vpop.f32.mrf.mxu0 }
 0x258   : > { %v1972_v61 = vadd.f32 %v1904_v45, %v1813_v60  ;;  %2433 = vmatmul.msk.f32.gmra.mxu2 %vm383_vm2, %v249_v58 }
 0x259   : > { %2467 = vmatmul.msk.f32.gmra.mxu3 %vm383_vm2, %v1676_v10 }
 0x25a   : > { %v2008_v1 = vadd.f32 %v3856_v12, %v1972_v61  ;;  %2501 = vmatmul.msk.f32.gmra.mxu0 %vm383_vm2, %v1835_v8 }
 0x25b   : > { %v1588_v23 = vpop.f32.mrf.mxu2 }
 0x25c   : > { %v1748_v4 = vpop.f32.mrf.mxu3  ;;  %v2040_v20 = vmax.f32 %v2008_v1, 0.0  ;;  %v1654_v55 = vadd.f32 %v1588_v23, %v1498_v13  ;;  %v1435_v32 = vpop.f32.mrf.mxu1 }
 0x25d   : > { %v1499_v58 = vadd.f32 %v1435_v32, %v3678_v9 }
 0x25e   : > { %2072 = vst [vmem:[%s3870_s9 + $0x70] sm:$0xff] %v2040_v20  ;;  %v1814_v21 = vadd.f32 %v1748_v4, %v1654_v55 }
 0x25f   : > { %v1910_v54 = vpop.f32.mrf.mxu0 }
 0x260   : > { %v1973_v24 = vadd.f32 %v1907_v40, %v1814_v21 }
 0x262   : > { %v2009_v11 = vadd.f32 %v3856_v12, %v1973_v24 }
 0x263   : > { %v1591_v22 = vpop.f32.mrf.mxu2 }
 0x264   : > { %v1751_v31 = vpop.f32.mrf.mxu3  ;;  %v2041_v57 = vmax.f32 %v2009_v11, 0.0  ;;  %v1655_v14 = vadd.f32 %v1591_v22, %v1499_v58  ;;  %v1438_v16 = vpop.f32.mrf.mxu1 }
 0x265   : > { %v1500_v46 = vadd.f32 %v1438_v16, %v3689_v37 }
 0x266   : > { %2073 = vst [vmem:[%s3870_s9 + $0x78] sm:$0xff] %v2041_v57  ;;  %v1815_v62 = vadd.f32 %v1751_v31, %v1655_v14 }
 0x267   : > { %v1913_v63 = vpop.f32.mrf.mxu0 }
 0x268   : > { %v1974_v39 = vadd.f32 %v1910_v54, %v1815_v62 }
 0x26a   : > { %v2010_v34 = vadd.f32 %v3856_v12, %v1974_v39 }
 0x26b   : > { %v1594_v7 = vpop.f32.mrf.mxu2 }
 0x26c   : > { %v1754_v47 = vpop.f32.mrf.mxu3  ;;  %v2042_v9 = vmax.f32 %v2010_v34, 0.0  ;;  %v1656_v19 = vadd.f32 %v1594_v7, %v1500_v46  ;;  %v1441_v26 = vpop.f32.mrf.mxu1 }
 0x26d   : > { %v1501_v2 = vadd.f32 %v1441_v26, %v3700_v5 }
 0x26e   : > { %2074 = vst [vmem:[%s3870_s9 + $0x80] sm:$0xff] %v2042_v9  ;;  %v1816_v28 = vadd.f32 %v1754_v47, %v1656_v19 }
 0x26f   : > { %v1916_v38 = vpop.f32.mrf.mxu0 }
 0x270   : > { %v1975_v15 = vadd.f32 %v1913_v63, %v1816_v28 }
 0x272   : > { %v2011_v45 = vadd.f32 %v3856_v12, %v1975_v15 }
 0x273   : > { %v1597_v17 = vpop.f32.mrf.mxu2 }
 0x274   : > { %v1757_v51 = vpop.f32.mrf.mxu3  ;;  %v2043_v37 = vmax.f32 %v2011_v45, 0.0  ;;  %v1657_v29 = vadd.f32 %v1597_v17, %v1501_v2  ;;  %v1444_v48 = vpop.f32.mrf.mxu1 }
 0x275   : > { %v1502_v36 = vadd.f32 %v1444_v48, %v3711_v52 }
 0x276   : > { %2075 = vst [vmem:[%s3870_s9 + $0x88] sm:$0xff] %v2043_v37  ;;  %v1817_v41 = vadd.f32 %v1757_v51, %v1657_v29 }
 0x277   : > { %v1919_v43 = vpop.f32.mrf.mxu0 }
 0x278   : > { %v1976_v0 = vadd.f32 %v1916_v38, %v1817_v41 }
 0x27a   : > { %v2012_v49 = vadd.f32 %v3856_v12, %v1976_v0 }
 0x27b   : > { %v1600_v50 = vpop.f32.mrf.mxu2 }
 0x27c   : > { %v1760_v18 = vpop.f32.mrf.mxu3  ;;  %v2044_v5 = vmax.f32 %v2012_v49, 0.0  ;;  %v1658_v10 = vadd.f32 %v1600_v50, %v1502_v36  ;;  %v1447_v60 = vpop.f32.mrf.mxu1 }
 0x27d   : > { %v1503_v13 = vadd.f32 %v1447_v60, %v3722_v33 }
 0x27e   : > { %2076 = vst [vmem:[%s3870_s9 + $0x90] sm:$0xff] %v2044_v5  ;;  %v1818_v40 = vadd.f32 %v1760_v18, %v1658_v10 }
 0x27f   : > { %v1922_v8 = vpop.f32.mrf.mxu0 }
 0x280   : > { %v1977_v61 = vadd.f32 %v1919_v43, %v1818_v40 }
 0x282   : > { %v2013_v1 = vadd.f32 %v3856_v12, %v1977_v61 }
 0x283   : > { %v1603_v23 = vpop.f32.mrf.mxu2 }
 0x284   : > { %v1763_v4 = vpop.f32.mrf.mxu3  ;;  %v2045_v52 = vmax.f32 %v2013_v1, 0.0  ;;  %v1659_v20 = vadd.f32 %v1603_v23, %v1503_v13  ;;  %v1450_v55 = vpop.f32.mrf.mxu1 }
 0x285   : > { %v1504_v24 = vadd.f32 %v1450_v55, %v3733_v3 }
 0x286   : > { %2077 = vst [vmem:[%s3870_s9 + $0x98] sm:$0xff] %v2045_v52  ;;  %v1819_v32 = vadd.f32 %v1763_v4, %v1659_v20 }
 0x287   : > { %v1925_v21 = vpop.f32.mrf.mxu0 }
 0x288   : > { %v1978_v54 = vadd.f32 %v1922_v8, %v1819_v32 }
 0x28a   : > { %v2014_v58 = vadd.f32 %v3856_v12, %v1978_v54 }
 0x28b   : > { %v1606_v11 = vpop.f32.mrf.mxu2 }
 0x28c   : > { %v1766_v22 = vpop.f32.mrf.mxu3  ;;  %v2046_v33 = vmax.f32 %v2014_v58, 0.0  ;;  %v1660_v31 = vadd.f32 %v1606_v11, %v1504_v24  ;;  %v1453_v57 = vpop.f32.mrf.mxu1 }
 0x28d   : > { %v1505_v63 = vadd.f32 %v1453_v57, %v3744_v56 }
 0x28e   : > { %2078 = vst [vmem:[%s3870_s9 + $0xa0] sm:$0xff] %v2046_v33  ;;  %v1820_v14 = vadd.f32 %v1766_v22, %v1660_v31 }
 0x28f   : > { %v1928_v16 = vpop.f32.mrf.mxu0 }
 0x290   : > { %v1979_v62 = vadd.f32 %v1925_v21, %v1820_v14 }
 0x292   : > { %v2015_v39 = vadd.f32 %v3856_v12, %v1979_v62 }
 0x293   : > { %v1609_v46 = vpop.f32.mrf.mxu2 }
 0x294   : > { %v1769_v34 = vpop.f32.mrf.mxu3  ;;  %v2047_v3 = vmax.f32 %v2015_v39, 0.0  ;;  %v1661_v7 = vadd.f32 %v1609_v46, %v1505_v63  ;;  %v1456_v47 = vpop.f32.mrf.mxu1 }
 0x295   : > { %v1506_v28 = vadd.f32 %v1456_v47, %v3755_v25 }
 0x296   : > { %2079 = vst [vmem:[%s3870_s9 + $0xa8] sm:$0xff] %v2047_v3  ;;  %v1821_v9 = vadd.f32 %v1769_v34, %v1661_v7 }
 0x297   : > { %v1931_v19 = vpop.f32.mrf.mxu0 }
 0x298   : > { %v1980_v26 = vadd.f32 %v1928_v16, %v1821_v9 }
 0x29a   : > { %v2016_v38 = vadd.f32 %v3856_v12, %v1980_v26 }
 0x29b   : > { %v1612_v15 = vpop.f32.mrf.mxu2 }
 0x29c   : > { %v1772_v2 = vpop.f32.mrf.mxu3  ;;  %v2048_v56 = vmax.f32 %v2016_v38, 0.0  ;;  %v1662_v45 = vadd.f32 %v1612_v15, %v1506_v28  ;;  %v1459_v17 = vpop.f32.mrf.mxu1 }
 0x29d   : > { %v1507_v48 = vadd.f32 %v1459_v17, %v3766_v44 }
 0x29e   : > { %2080 = vst [vmem:[%s3870_s9 + $0xb0] sm:$0xff] %v2048_v56  ;;  %v1822_v51 = vadd.f32 %v1772_v2, %v1662_v45 }
 0x29f   : > { %v1934_v37 = vpop.f32.mrf.mxu0 }
 0x2a0   : > { %v1981_v29 = vadd.f32 %v1931_v19, %v1822_v51 }
 0x2a2   : > { %v2017_v41 = vadd.f32 %v3856_v12, %v1981_v29 }
 0x2a3   : > { %v1615_v43 = vpop.f32.mrf.mxu2 }
 0x2a4   : > { %v1775_v0 = vpop.f32.mrf.mxu3  ;;  %v2049_v25 = vmax.f32 %v2017_v41, 0.0  ;;  %v1663_v36 = vadd.f32 %v1615_v43, %v1507_v48  ;;  %v1462_v49 = vpop.f32.mrf.mxu1 }
 0x2a5   : > { %v1508_v10 = vadd.f32 %v1462_v49, %v3777_v35 }
 0x2a6   : > { %2081 = vst [vmem:[%s3870_s9 + $0xb8] sm:$0xff] %v2049_v25  ;;  %v1823_v50 = vadd.f32 %v1775_v0, %v1663_v36 }
 0x2a7   : > { %v1937_v18 = vpop.f32.mrf.mxu0 }
 0x2a8   : > { %v1982_v5 = vadd.f32 %v1934_v37, %v1823_v50 }
 0x2aa   : > { %v2018_v60 = vadd.f32 %v3856_v12, %v1982_v5 }
 0x2ab   : > { %v1618_v40 = vpop.f32.mrf.mxu2 }
 0x2ac   : > { %v1778_v8 = vpop.f32.mrf.mxu3  ;;  %v2050_v44 = vmax.f32 %v2018_v60, 0.0  ;;  %v1664_v61 = vadd.f32 %v1618_v40, %v1508_v10  ;;  %v1465_v13 = vpop.f32.mrf.mxu1 }
 0x2ad   : > { %v1509_v52 = vadd.f32 %v1465_v13, %v3788_v53 }
 0x2ae   : > { %2082 = vst [vmem:[%s3870_s9 + $0xc0] sm:$0xff] %v2050_v44  ;;  %v1824_v1 = vadd.f32 %v1778_v8, %v1664_v61 }
 0x2af   : > { %v1940_v23 = vpop.f32.mrf.mxu0 }
 0x2b0   : > { %v1983_v4 = vadd.f32 %v1937_v18, %v1824_v1 }
 0x2b2   : > { %v2019_v20 = vadd.f32 %v3856_v12, %v1983_v4 }
 0x2b3   : > { %v1621_v55 = vpop.f32.mrf.mxu2 }
 0x2b4   : > { %v1781_v32 = vpop.f32.mrf.mxu3  ;;  %v2051_v35 = vmax.f32 %v2019_v20, 0.0  ;;  %v1665_v21 = vadd.f32 %v1621_v55, %v1509_v52  ;;  %v1468_v54 = vpop.f32.mrf.mxu1 }
 0x2b5   : > { %v1510_v22 = vadd.f32 %v1468_v54, %v3799_v42 }
 0x2b6   : > { %2083 = vst [vmem:[%s3870_s9 + $0xc8] sm:$0xff] %v2051_v35  ;;  %v1825_v24 = vadd.f32 %v1781_v32, %v1665_v21 }
 0x2b7   : > { %v1943_v58 = vpop.f32.mrf.mxu0 }
 0x2b8   : > { %v1984_v11 = vadd.f32 %v1940_v23, %v1825_v24 }
 0x2ba   : > { %v2020_v33 = vadd.f32 %v3856_v12, %v1984_v11 }
 0x2bb   : > { %v1624_v31 = vpop.f32.mrf.mxu2 }
 0x2bc   : > { %v1784_v57 = vpop.f32.mrf.mxu3  ;;  %v2052_v53 = vmax.f32 %v2020_v33, 0.0  ;;  %v1666_v14 = vadd.f32 %v1624_v31, %v1510_v22  ;;  %v1471_v16 = vpop.f32.mrf.mxu1 }
 0x2bd   : > { %v1511_v46 = vadd.f32 %v1471_v16, %v3810_v30 }
 0x2be   : > { %2084 = vst [vmem:[%s3870_s9 + $0xd0] sm:$0xff] %v2052_v53  ;;  %v1826_v62 = vadd.f32 %v1784_v57, %v1666_v14 }
 0x2bf   : > { %v1946_v63 = vpop.f32.mrf.mxu0 }
 0x2c0   : > { %v1985_v39 = vadd.f32 %v1943_v58, %v1826_v62 }
 0x2c2   : > { %v2021_v34 = vadd.f32 %v3856_v12, %v1985_v39 }
 0x2c3   : > { %v1627_v3 = vpop.f32.mrf.mxu2 }
 0x2c4   : > { %v1787_v7 = vpop.f32.mrf.mxu3  ;;  %v2053_v42 = vmax.f32 %v2021_v34, 0.0  ;;  %v1667_v47 = vadd.f32 %v1627_v3, %v1511_v46  ;;  %v1474_v9 = vpop.f32.mrf.mxu1 }
 0x2c5   : > { %v1512_v38 = vadd.f32 %v1474_v9, %v3821_v59 }
 0x2c6   : > { %2085 = vst [vmem:[%s3870_s9 + $0xd8] sm:$0xff] %v2053_v42  ;;  %v1827_v19 = vadd.f32 %v1787_v7, %v1667_v47 }
 0x2c7   : > { %v1949_v28 = vpop.f32.mrf.mxu0 }
 0x2c8   : > { %v1986_v26 = vadd.f32 %v1946_v63, %v1827_v19 }
 0x2ca   : > { %v2022_v15 = vadd.f32 %v3856_v12, %v1986_v26 }
 0x2cb   : > { %v1630_v2 = vpop.f32.mrf.mxu2 }
 0x2cc   : > { %v1790_v56 = vpop.f32.mrf.mxu3  ;;  %v2054_v30 = vmax.f32 %v2022_v15, 0.0  ;;  %v1668_v45 = vadd.f32 %v1630_v2, %v1512_v38  ;;  %v1477_v17 = vpop.f32.mrf.mxu1 }
 0x2cd   : > { %v1513_v29 = vadd.f32 %v1477_v17, %v3832_v6 }
 0x2ce   : > { %2086 = vst [vmem:[%s3870_s9 + $0xe0] sm:$0xff] %v2054_v30  ;;  %v1828_v51 = vadd.f32 %v1790_v56, %v1668_v45 }
 0x2cf   : > { %v1952_v41 = vpop.f32.mrf.mxu0 }
 0x2d0   : > { %v1987_v37 = vadd.f32 %v1949_v28, %v1828_v51 }
 0x2d2   : > { %v2023_v48 = vadd.f32 %v3856_v12, %v1987_v37 }
 0x2d3   : > { %v1633_v43 = vpop.f32.mrf.mxu2 }
 0x2d4   : > { %v1793_v0 = vpop.f32.mrf.mxu3  ;;  %v2055_v59 = vmax.f32 %v2023_v48, 0.0  ;;  %v1669_v25 = vadd.f32 %v1633_v43, %v1513_v29  ;;  %v1480_v49 = vpop.f32.mrf.mxu1 }
 0x2d5   : > { %v1514_v18 = vadd.f32 %v1480_v49, %v3843_v27 }
 0x2d6   : > { %2087 = vst [vmem:[%s3870_s9 + $0xe8] sm:$0xff] %v2055_v59  ;;  %v1829_v36 = vadd.f32 %v1793_v0, %v1669_v25 }
 0x2d7   : > { %v1955_v8 = vpop.f32.mrf.mxu0 }
 0x2d8   : > { %v1988_v50 = vadd.f32 %v1952_v41, %v1829_v36 }
 0x2da   : > { %v2024_v5 = vadd.f32 %v3856_v12, %v1988_v50 }
 0x2db   : > { %v1636_v6 = vpop.f32.mrf.mxu2 }
 0x2dc   : > { %v1796_v10 = vpop.f32.mrf.mxu3  ;;  %v2056_v60 = vmax.f32 %v2024_v5, 0.0  ;;  %v1670_v40 = vadd.f32 %v1636_v6, %v1514_v18 }
 0x2de   : > { %2088 = vst [vmem:[%s3870_s9 + $0xf0] sm:$0xff] %v2056_v60  ;;  %v1830_v44 = vadd.f32 %v1796_v10, %v1670_v40 }
 0x2e0   : > { %v1989_v61 = vadd.f32 %v1955_v8, %v1830_v44 }
 0x2e2   : > { %v2025_v27 = vadd.f32 %v3856_v12, %v1989_v61 }
 0x2e4   : > { %v2057_v13 = vmax.f32 %v2025_v27, 0.0 }
 0x2e6   : > { %2089 = vst [vmem:[%s3870_s9 + $0xf8] sm:$0xff] %v2057_v13 }
 0x2e7   : > { %2621 = shalt.err (!%p2618_p5)
}
 0x2e8   : > { %s2674_s5 = smov 128   ;;  %s2675_s7 = smov 8  }
 0x2e9   : > { %2512 = dma.vmem_to_hbm [thread:$0]  (%p2736_p4), %s2106_s21, 4096, %s2108_s23, %s2091_s15, %s2674_s5, %s2674_s5, %s2675_s7  }
 0x2ea PF: > { %p2518_p6 = scmp.ge.s32.totalorder %s2672_s17, 2  ;;  %s2122_s8 = sand.u32 1, %s2652_s12  }
 0x2eb   : > { %s2123_s9 = scalar_lea.sflag [#allocation3], %s2122_s8 }
 0x2ec   : > { %p2515_p7 = pnand %p2518_p6, %p2743_p8 }
 0x2ee   : > { %p2516_p9 = pneg %p2515_p7 }
 0x2f0   : > { %2647 = dma.done.wait (%p2516_p9), %s2123_s9, 4096  }
 0x2f1   : > { %2649 = vsyncadd (%p2516_p9), %s2123_s9, 4294963200  ;;  %s16_s17 = sadd.s32 1, %s2672_s17   ;;  %s4337_s12 = smov %s2656_s13 }
 0x2f2   : > { %p13_p10 = scmp.ge.s32.totalorder %s16_s17, 4   ;;  %s4338_s13 = smov %s2660_s14 }
 0x2f3   : > { %s4339_s14 = smov %s2749_s25  ;;  %s4340_s15 = smov %s2668_s16 }
 0x2f4   : > { %s4341_s16 = smov %s4343_s20  ;;  %15 = sbr.rel (!%p13_p10) target bundleno = 4 (0x4), region = 75 }
 0x2f9   :  { %2129 = vsyncpa [#allocation3], 1 }
 0x2fa   :  { %2131 = vsyncpa [#allocation3 + $0x1], 1 }

// kernel: tpu_custom_call.1
= control target key start
LH: loop header
LB: loop body
LE: loop exit
PB: predicated region body
PF: predicated region fallthrough
CT: control target
= control target key end

     0   :  { %8 = vsyncpa [#allocation3], 0  ;;  %s4118_s0 = inlined_call_operand.vmem [shape: f32[2,1,18,18,4], index: 0, kind: input, shape index: {}]   ;;  %s4119_s1 = inlined_call_operand.vmem [shape: f32[9,4,128], index: 1, kind: input, shape index: {}]   ;;  %s4120_s2 = inlined_call_operand.vmem [shape: f32[1,128], index: 2, kind: input, shape index: {}]   ;;  %s4121_s3 = inlined_call_operand.hbm [shape: f32[2,1,256,128], index: 3, kind: output, shape index: {}]  }
   0x1   :  { %10 = vsyncpa [#allocation3 + $0x1], 0  ;;  %s2696_s12 = smov 0   ;;  %s2698_s13 = smov 0  }
   0x2   :  { %s2700_s14 = smov 0   ;;  %s2702_s15 = smov 0  }
   0x3   :  { %s2704_s16 = smov 0   ;;  %s2706_s17 = smov 0  }
   0x4 LB: > { %s2190_s18 = sadd.s32 4294967295, %s2672_s17   ;;  %s2191_s19 = sadd.s32 4294967294, %s2672_s17   ;;  %s2672_s17 = sphi %s2706_s17, %s16_s17   ;;  %s2668_s16 = sphi %s2704_s16, %s4341_s16   ;;  %s2664_s15 = sphi %s2702_s15, %s4340_s15   ;;  %s2660_s14 = sphi %s2700_s14, %s4339_s14   ;;  %s2656_s13 = sphi %s2698_s13, %s4338_s13   ;;  %s2652_s12 = sphi %s2696_s12, %s4337_s12  }
   0x5   : > { %s28_s20 = sadd.s32 1, %s2668_s16  ;;  %s107_s21 = sadd.s32 1, %s2660_s14 }
   0x6   : > { %p30_p0 = scmp.ge.s32.totalorder %s28_s20, 2  ;;  %p117_p1 = scmp.ne.s32.totalorder %s2660_s14, %s2656_s13 }
   0x7   : > { %p118_p2 = scmp.eq.s32.totalorder %s2190_s18, 1  ;;  %p123_p3 = scmp.ne.s32.totalorder %s2656_s13, %s2652_s12 }
   0x8   : > { %s4343_s20 = smov (%p30_p0, %s28_s20), 0  ;;  %p124_p5 = scmp.eq.s32.totalorder %s2191_s19, 1 }
   0x9   : > { %p2736_p4 = por %p118_p2, %p117_p1  ;;  %s102_s23 = ssub.s32 %s2668_s16, %s4343_s20 }
   0xa   : > { %p2194_p6 = scmp.ge.s32.totalorder %s2672_s17, 1  ;;  %p105_p7 = scmp.eq.s32.totalorder %s102_s23, 0 }
   0xb   : > { %p2743_p8 = por %p124_p5, %p123_p3  ;;  %p160_p9 = scmp.lt.s32.totalorder %s2672_s17, 3 }
   0xc   : > { %s2749_s25 = scalar_select %p105_p7, %s2660_s14, %s107_s21  }
   0xd   : > { %p161_p10 = pnand %p2194_p6, %p160_p9 }
   0xf   : > { %164 = sbr.rel (%p161_p10) target bundleno = 746 (0x2ea), region = 32 }
  0x14   : > { %v2197_v0 = vld [vmem:[%s4119_s1 + $0x4] sm:$0xf]  ;;  %vm448_vm0 = vcmask 1043456   ;;  %p188_p11 = scmp.lt.s32.totalorder %s2664_s15, 1  ;;  %v2264_v1 = vld [vmem:[%s4119_s1 + $0x8] sm:$0xf] }
  0x15   : > { %2508 = vmatpush.msk.msra.mxu1 %vm448_vm0, %v2197_v0  ;;  %2509 = vmatpush.msk.msra.mxu2 %vm448_vm0, %v2197_v0  ;;  %v2298_v2 = vld [vmem:[%s4119_s1 + $0xc] sm:$0xf]  ;;  %v251_v3 = vld [vmem:[%s4119_s1] sm:$0xf]  ;;  %v2332_v4 = vld [vmem:[%s4119_s1 + $0x10] sm:$0xf] }
  0x16   : > { %s189_s7 = scalar_select %p188_p11, %s2664_s15, 1  ;;  %2510 = vmatpush.msk.msra.mxu3 %vm448_vm0, %v2197_v0  ;;  %2198 = vmatpush.msk.msra.mxu0 %vm448_vm0, %v2197_v0  ;;  %vm300_vm1 = vcmask 1046528   ;;  %vm383_vm2 = vcmask 31744   ;;  %vm745_vm3 = vcmask 1045504  }
  0x17   : > { %2265 = vmatpush.msk.msrb.mxu2 %vm448_vm0, %v2264_v1  ;;  %2231 = vmatpush.msk.msrb.mxu1 %vm448_vm0, %v251_v3  ;;  %s185_s5 = sand.u32 1, %s2656_s13   ;;  %s2614_s30 = scalar_lea.hbm %s4121_s3, 512 }
  0x18   : > { %2299 = vmatpush.msk.msrb.mxu3 %vm448_vm0, %v2298_v2  ;;  %s2511_s10 = smul.u32 432, %s189_s7  ;;  %2333 = vmatpush.msk.msrb.mxu0 %vm448_vm0, %v2332_v4  ;;  %s2195_s8 = sshll.u32 %s185_s5, 8 }
  0x19   : > { %s3870_s9 = scalar_lea.vmem [#allocation2], %s2195_s8 }
  0x1a   : > { %s2779_s19 = scalar_lea.vmem %s4118_s0, %s2511_s10  ;;  %s2507_s10 = sshll.u32 %s2664_s15, 8 }
  0x1b   : > { %v2782_v5 = vld [vmem:[%s2779_s19 + $0x60] sm:$0xff]  ;;  %v2785_v6 = vld [vmem:[%s2779_s19 + $0x68] sm:$0xff]  ;;  %v2806_v17 = vld [vmem:[%s2779_s19 + $0x70] sm:$0x3]  ;;  %s2105_s21 = sshll.u32 %s3870_s9, 4  ;;  %s2091_s15 = scalar_lea.sflag [#allocation3], %s185_s5  ;;  %s2106_s21 = int_to_ptr.vmem [resolvable:$true] %s2105_s21 }
  0x1c   : > { %v2788_v7 = vld [vmem:[%s2779_s19 + $0xc0] sm:$0xff]  ;;  %v321_v8 = vrot.slane %v2782_v5, 1  ;;  %v322_v9 = vrot.slane %v2785_v6, 1  ;;  %v2793_v10 = vld [vmem:[%s2779_s19 + $0xc8] sm:$0xff]  ;;  %v2815_v20 = vld [vmem:[%s2779_s19 + $0xd0] sm:$0x3] }
  0x1d   : > { %v341_v11 = vrot.slane %v2788_v7, 1  ;;  %v2797_v12 = vld [vmem:[%s2779_s19 + $0x120] sm:$0xff]  ;;  %v2800_v13 = vld [vmem:[%s2779_s19 + $0x128] sm:$0xff]  ;;  %v342_v14 = vrot.slane %v2793_v10, 1  ;;  %v2831_v26 = vld [vmem:[%s2779_s19 + $0x130] sm:$0x3] }
  0x1e   : > { %4199 = vst [vmem:[#allocation5_spill] sm:$0xff] %v2797_v12  ;;  %v361_v15 = vrot.slane %v2797_v12, 1  ;;  %v362_v16 = vrot.slane %v2800_v13, 1  ;;  %v2809_v18 = vld [vmem:[%s2779_s19] sm:$0xff]  ;;  %v2812_v19 = vsel %vm300_vm1, %v321_v8, %v322_v9  ;;  %v2818_v21 = vld [vmem:[%s2779_s19 + $0x8] sm:$0xff]  ;;  %v324_v27 = vrot.slane %v2806_v17, 1 }
  0x1f   : > { %4200 = vst [vmem:[#allocation6_spill] sm:$0xff] %v2800_v13  ;;  %v301_v22 = vrot.slane %v2809_v18, 1  ;;  %2207 = vmatmul.msk.f32.vlgmr.msra.gmra.mxu1 %vm383_vm2, %v2812_v19  ;;  %v2824_v23 = vsel %vm300_vm1, %v341_v11, %v342_v14  ;;  %v302_v25 = vrot.slane %v2818_v21, 1  ;;  %v2839_v28 = vld [vmem:[%s2779_s19 + $0x10] sm:$0x3]  ;;  %v344_v29 = vrot.slane %v2815_v20, 1 }
  0x20   : > { %4201 = vst [vmem:[#allocation7_spill] sm:$0xff] %v2824_v23  ;;  %v2827_v24 = vsel %vm300_vm1, %v361_v15, %v362_v16  ;;  %2215 = vmatmul.msk.f32.vlgmr.msra.gmra.mxu2 %vm383_vm2, %v2824_v23  ;;  %v364_v31 = vrot.slane %v2831_v26, 1  ;;  %v304_v32 = vrot.slane %v2839_v28, 1  ;;  %v2847_v33 = vsel %vm300_vm1, %v322_v9, %v324_v27  ;;  %v2856_v36 = vld [vmem:[%s2779_s19 + $0x78] sm:$0xff]  ;;  %v2859_v37 = vld [vmem:[%s2779_s19 + $0x80] sm:$0xff]  ;;  %v2941_v4 = vld [vmem:[%s2779_s19 + $0x90] sm:$0xff] }
  0x21   : > { %4202 = vst [vmem:[#allocation8_spill] sm:$0xff] %v2827_v24  ;;  %2223 = vmatmul.msk.f32.vlgmr.msra.gmra.mxu3 %vm383_vm2, %v2827_v24  ;;  %v303_v30 = vsel %vm300_vm1, %v301_v22, %v302_v25  ;;  %v2850_v34 = vsel %vm300_vm1, %v342_v14, %v344_v29  ;;  %v2862_v38 = vld [vmem:[%s2779_s19 + $0xd8] sm:$0xff]  ;;  %v2865_v39 = vld [vmem:[%s2779_s19 + $0xe0] sm:$0xff]  ;;  %v326_v43 = vrot.slane %v2856_v36, 1  ;;  %v327_v44 = vrot.slane %v2859_v37, 1  ;;  %v2947_v9 = vld [vmem:[%s2779_s19 + $0xf0] sm:$0xff] }
  0x22   : > { %4203 = vst [vmem:[#allocation9_spill] sm:$0xff] %v2831_v26  ;;  %2199 = vmatmul.msk.f32.vlgmr.msra.gmra.mxu0 %vm383_vm2, %v303_v30  ;;  %v2853_v35 = vsel %vm300_vm1, %v362_v16, %v364_v31  ;;  %v2868_v40 = vld [vmem:[%s2779_s19 + $0x138] sm:$0xff]  ;;  %v2871_v41 = vld [vmem:[%s2779_s19 + $0x140] sm:$0xff]  ;;  %v305_v42 = vsel %vm300_vm1, %v302_v25, %v304_v32  ;;  %v346_v47 = vrot.slane %v2862_v38, 1  ;;  %v347_v48 = vrot.slane %v2865_v39, 1  ;;  %v2953_v14 = vld [vmem:[%s2779_s19 + $0x150] sm:$0xff] }
  0x23   : > { %4204 = vst [vmem:[#allocation10_spill] sm:$0xff] %v2847_v33  ;;  %v2883_v45 = vld [vmem:[%s2779_s19 + $0x18] sm:$0xff]  ;;  %v2886_v46 = vld [vmem:[%s2779_s19 + $0x20] sm:$0xff]  ;;  %v366_v49 = vrot.slane %v2868_v40, 1  ;;  %v367_v50 = vrot.slane %v2871_v41, 1  ;;  %v2896_v53 = vsel %vm300_vm1, %v326_v43, %v327_v44  ;;  %v331_v22 = vrot.slane %v2941_v4, 1 }
  0x24   : > { %4205 = vst [vmem:[#allocation11_spill] sm:$0xff] %v2850_v34  ;;  %v306_v51 = vrot.slane %v2883_v45, 1  ;;  %v307_v52 = vrot.slane %v2886_v46, 1  ;;  %v2899_v54 = vsel %vm300_vm1, %v346_v47, %v347_v48  ;;  %v2905_v56 = vld [vmem:[%s2779_s19 + $0x88] sm:$0x3]  ;;  %v2944_v8 = vld [vmem:[%s2779_s19 + $0x98] sm:$0xff] }
  0x25   : > { %4206 = vst [vmem:[#allocation12_spill] sm:$0xff] %v2853_v35  ;;  %v2902_v55 = vsel %vm300_vm1, %v366_v49, %v367_v50  ;;  %v2908_v57 = vld [vmem:[%s2779_s19 + $0xe8] sm:$0x3]  ;;  %v329_v60 = vrot.slane %v2905_v56, 1  ;;  %v2950_v11 = vld [vmem:[%s2779_s19 + $0xf8] sm:$0xff]  ;;  %v332_v25 = vrot.slane %v2944_v8, 1 }
  0x26   : > { %4207 = vst [vmem:[#allocation13_spill] sm:$0xff] %v2868_v40  ;;  %v2911_v58 = vld [vmem:[%s2779_s19 + $0x148] sm:$0x3]  ;;  %v2916_v59 = vsel %vm300_vm1, %v306_v51, %v307_v52  ;;  %v349_v62 = vrot.slane %v2908_v57, 1  ;;  %v2956_v15 = vld [vmem:[%s2779_s19 + $0x158] sm:$0xff]  ;;  %v2970_v27 = vld [vmem:[%s2779_s19 + $0x30] sm:$0xff] }
  0x27   : > { %4208 = vst [vmem:[#allocation14_spill] sm:$0xff] %v2871_v41  ;;  %2208 = vmatmul.msk.f32.gmra.mxu1 %vm383_vm2, %v2847_v33  ;;  %v2924_v61 = vld [vmem:[%s2779_s19 + $0x28] sm:$0x3]  ;;  %v369_v63 = vrot.slane %v2911_v58, 1  ;;  %v2932_v1 = vsel %vm300_vm1, %v327_v44, %v329_v60  ;;  %v2973_v29 = vld [vmem:[%s2779_s19 + $0x38] sm:$0xff]  ;;  %v351_v30 = vrot.slane %v2947_v9, 1  ;;  %v2984_v47 = vsel %vm300_vm1, %v331_v22, %v332_v25 }
  0x28   : > { %2216 = vmatmul.msk.f32.gmra.mxu2 %vm383_vm2, %v2850_v34  ;;  %4209 = vst [vmem:[#allocation15_spill] sm:$0xff] %v2896_v53  ;;  %v309_v0 = vrot.slane %v2924_v61, 1  ;;  %v2935_v2 = vsel %vm300_vm1, %v347_v48, %v349_v62  ;;  %v352_v31 = vrot.slane %v2950_v11, 1  ;;  %v371_v32 = vrot.slane %v2953_v14, 1  ;;  %v2987_v48 = vld [vmem:[%s2779_s19 + $0xa0] sm:$0x3] }
  0x29   : > { %2224 = vmatmul.msk.f32.gmra.mxu3 %vm383_vm2, %v2853_v35  ;;  %4210 = vst [vmem:[#allocation16_spill] sm:$0xff] %v2902_v55  ;;  %v2938_v3 = vsel %vm300_vm1, %v367_v50, %v369_v63  ;;  %v311_v43 = vrot.slane %v2970_v27, 1  ;;  %v312_v44 = vrot.slane %v2973_v29, 1  ;;  %v2996_v51 = vld [vmem:[%s2779_s19 + $0x100] sm:$0x3]  ;;  %v334_v60 = vrot.slane %v2987_v48, 1 }
  0x2a   : > { %2200 = vmatmul.msk.f32.gmra.mxu0 %vm383_vm2, %v305_v42  ;;  %4211 = vst [vmem:[#allocation17_spill] sm:$0xff] %v2911_v58  ;;  %v2961_v16 = vsel %vm300_vm1, %v307_v52, %v309_v0  ;;  %v372_v42 = vrot.slane %v2956_v15, 1  ;;  %v2990_v49 = vsel %vm300_vm1, %v351_v30, %v352_v31  ;;  %v2999_v52 = vld [vmem:[%s2779_s19 + $0x160] sm:$0x3]  ;;  %v2400_v0 = vld [vmem:[%s4119_s1 + $0x18] sm:$0xf] }
  0x2b   : > { %4212 = vst [vmem:[#allocation18_spill] sm:$0xff] %v2932_v1  ;;  %v3005_v62 = vsel %vm300_vm1, %v311_v43, %v312_v44  ;;  %v3008_v63 = vld [vmem:[%s2779_s19 + $0x40] sm:$0x3]  ;;  %v2434_v22 = vld [vmem:[%s4119_s1 + $0x1c] sm:$0xf]  ;;  %v374_v43 = vrot.slane %v2999_v52, 1  ;;  %2401 = vmatpush.msk.msra.mxu2 %vm448_vm0, %v2400_v0 }
  0x2c   : > { %4213 = vst [vmem:[#allocation19_spill] sm:$0xff] %v2938_v3  ;;  %v2993_v50 = vsel %vm300_vm1, %v371_v32, %v372_v42  ;;  %v2366_v30 = vld [vmem:[%s4119_s1 + $0x14] sm:$0xf]  ;;  %v354_v32 = vrot.slane %v2996_v51, 1  ;;  %2435 = vmatpush.msk.msra.mxu3 %vm448_vm0, %v2434_v22  ;;  %v3041_v0 = vld [vmem:[%s2779_s19 + $0xa8] sm:$0xff] }
  0x2d   : > { %4214 = vst [vmem:[#allocation20_spill] sm:$0xff] %v2953_v14  ;;  %2367 = vmatpush.msk.msra.mxu1 %vm448_vm0, %v2366_v30  ;;  %v3044_v22 = vld [vmem:[%s2779_s19 + $0xb0] sm:$0xff]  ;;  %v3047_v14 = vld [vmem:[%s2779_s19 + $0x108] sm:$0xff]  ;;  %v3100_v24 = vld [vmem:[%s2779_s19 + $0x118] sm:$0x3] }
  0x2e   : > { %4215 = vst [vmem:[#allocation21_spill] sm:$0xff] %v2956_v15  ;;  %v314_v15 = vrot.slane %v3008_v63, 1  ;;  %v3035_v58 = vsel %vm300_vm1, %v352_v31, %v354_v32  ;;  %v3050_v30 = vld [vmem:[%s2779_s19 + $0x110] sm:$0xff]  ;;  %v336_v31 = vrot.slane %v3041_v0, 1 }
  0x2f   : > { %2209 = vmatmul.msk.f32.gmra.mxu1 %vm383_vm2, %v2896_v53  ;;  %4216 = vst [vmem:[#allocation22_spill] sm:$0xff] %v2984_v47  ;;  %v3056_v41 = vld [vmem:[%s2779_s19 + $0x170] sm:$0xff] }
  0x30   : > { %2217 = vmatmul.msk.f32.gmra.mxu2 %vm383_vm2, %v2899_v54  ;;  %4217 = vst [vmem:[#allocation23_spill] sm:$0xff] %v2993_v50  ;;  %v3073_v32 = vld [vmem:[%s2779_s19 + $0x50] sm:$0xff] }
  0x31   : > { %2225 = vmatmul.msk.f32.gmra.mxu3 %vm383_vm2, %v2902_v55  ;;  %4218 = vst [vmem:[#allocation24_spill] sm:$0xff] %v2996_v51  ;;  %v377_v55 = vrot.slane %v3056_v41, 1  ;;  %v317_v40 = vrot.slane %v3073_v32, 1 }
  0x32   : > { %2201 = vmatmul.msk.f32.gmra.mxu0 %vm383_vm2, %v2916_v59  ;;  %4219 = vst [vmem:[#allocation25_spill] sm:$0xff] %v2999_v52  ;;  %v3038_v52 = vsel %vm300_vm1, %v372_v42, %v374_v43  ;;  %v337_v42 = vrot.slane %v3044_v22, 1  ;;  %v357_v43 = vrot.slane %v3050_v30, 1 }
  0x33   : > { %4221 = vst [vmem:[#allocation27_spill] sm:$0xff] %v3038_v52 }
  0x34   : > { %4222 = vst [vmem:[#allocation28_spill] sm:$0xff] %v3050_v30  ;;  %v3088_v35 = vsel %vm300_vm1, %v336_v31, %v337_v42  ;;  %v3116_v31 = vld [vmem:[%s2779_s19 + $0x58] sm:$0x3] }
  0x35   : > { %4224 = vst [vmem:[#allocation30_spill] sm:$0xff] %v3056_v41  ;;  %v3097_v41 = vld [vmem:[%s2779_s19 + $0xb8] sm:$0x3] }
  0x36   : > { %4225 = vst [vmem:[#allocation31_spill] sm:$0xff] %v3088_v35 }
  0x37   : > { %2210 = vmatmul.msk.f32.gmra.mxu1 %vm383_vm2, %v2932_v1  ;;  %4228 = vst [vmem:[#allocation34_spill] sm:$0xff] %v3100_v24 }
  0x38   : > { %2218 = vmatmul.msk.f32.gmra.mxu2 %vm383_vm2, %v2935_v2 }
  0x39   : > { %2226 = vmatmul.msk.f32.gmra.mxu3 %vm383_vm2, %v2938_v3  ;;  %v3053_v3 = vld [vmem:[%s2779_s19 + $0x168] sm:$0xff] }
  0x3a   : > { %2202 = vmatmul.msk.f32.gmra.mxu0 %vm383_vm2, %v2961_v16  ;;  %4223 = vst [vmem:[#allocation29_spill] sm:$0xff] %v3053_v3 }
  0x3f   : > { %2211 = vmatmul.msk.f32.gmra.mxu1 %vm383_vm2, %v2984_v47 }
  0x40   : > { %2219 = vmatmul.msk.f32.gmra.mxu2 %vm383_vm2, %v2990_v49 }
  0x41   : > { %2227 = vmatmul.msk.f32.gmra.mxu3 %vm383_vm2, %v2993_v50  ;;  %v3032_v50 = vsel %vm300_vm1, %v332_v25, %v334_v60  ;;  %v3061_v25 = vsel %vm300_vm1, %v312_v44, %v314_v15  ;;  %v3070_v60 = vld [vmem:[%s2779_s19 + $0x48] sm:$0xff]  ;;  %v2468_v15 = vld [vmem:[%s4119_s1 + $0x20] sm:$0xf]  ;;  %v356_v44 = vrot.slane %v3047_v14, 1 }
  0x42   : > { %2203 = vmatmul.msk.f32.gmra.mxu0 %vm383_vm2, %v3005_v62  ;;  %4220 = vst [vmem:[#allocation26_spill] sm:$0xff] %v3032_v50  ;;  %v316_v26 = vrot.slane %v3070_v60, 1 }
  0x43   : > { %2469 = vmatpush.msk.msra.mxu0 %vm448_vm0, %v2468_v15  ;;  %v3091_v13 = vsel %vm300_vm1, %v356_v44, %v357_v43  ;;  %v3103_v15 = vld [vmem:[%s2779_s19 + $0x178] sm:$0x3]  ;;  %v359_v44 = vrot.slane %v3100_v24, 1 }
  0x44   : > { %4226 = vst [vmem:[#allocation32_spill] sm:$0xff] %v3091_v13  ;;  %v3108_v12 = vsel %vm300_vm1, %v316_v26, %v317_v40  ;;  %v379_v30 = vrot.slane %v3103_v15, 1  ;;  %v319_v26 = vrot.slane %v3116_v31, 1 }
  0x46   : > { %v3135_v24 = vsel %vm300_vm1, %v317_v40, %v319_v26  ;;  %v749_v40 = vrot.slane %v2839_v28, 2  ;;  %v761_v26 = vrot.slane %v3070_v60, 2 }
  0x47   : > { %2212 = vmatmul.msk.f32.gmra.mxu1 %vm383_vm2, %v3032_v50 }
  0x48   : > { %2220 = vmatmul.msk.f32.gmra.mxu2 %vm383_vm2, %v3035_v58 }
  0x49   : > { %2228 = vmatmul.msk.f32.gmra.mxu3 %vm383_vm2, %v3038_v52  ;;  %v376_v52 = vrot.slane %v3053_v3, 1 }
  0x4a   : > { %2204 = vmatmul.msk.f32.gmra.mxu0 %vm383_vm2, %v3061_v25 }
  0x4b   : > { %v3094_v3 = vsel %vm300_vm1, %v376_v52, %v377_v55  ;;  %v339_v52 = vrot.slane %v3097_v41, 1 }
  0x4c   : > { %4227 = vst [vmem:[#allocation33_spill] sm:$0xff] %v3094_v3 }
  0x4d   : > { %v3124_v51 = vsel %vm300_vm1, %v337_v42, %v339_v52  ;;  %v746_v42 = vrot.slane %v2809_v18, 2  ;;  %v752_v52 = vrot.slane %v2886_v46, 2 }
  0x4e   : > { %4229 = vst [vmem:[#allocation35_spill] sm:$0xff] %v3124_v51 }
  0x4f   : > { %2213 = vmatmul.msk.f32.gmra.mxu1 %vm383_vm2, %v3088_v35 }
  0x50   : > { %2221 = vmatmul.msk.f32.gmra.mxu2 %vm383_vm2, %v3091_v13  ;;  %v3127_v13 = vsel %vm300_vm1, %v357_v43, %v359_v44  ;;  %v747_v43 = vrot.slane %v2818_v21, 2 }
  0x51   : > { %2229 = vmatmul.msk.f32.gmra.mxu3 %vm383_vm2, %v3094_v3  ;;  %v3130_v3 = vsel %vm300_vm1, %v377_v55, %v379_v30 }
  0x52   : > { %2205 = vmatmul.msk.f32.gmra.mxu0 %vm383_vm2, %v3108_v12  ;;  %4230 = vst [vmem:[#allocation36_spill] sm:$0xff] %v3130_v3  ;;  %v748_v55 = vsel %vm745_vm3, %v746_v42, %v747_v43  ;;  %v750_v30 = vsel %vm745_vm3, %v747_v43, %v749_v40  ;;  %v762_v42 = vrot.slane %v3073_v32, 2  ;;  %v764_v43 = vrot.slane %v3116_v31, 2 }
  0x53   : > { %v766_v40 = vrot.slane %v2782_v5, 2 }
  0x57   : > { %2214 = vmatmul.msk.f32.gmra.mxu1 %vm383_vm2, %v3124_v51 }
  0x58   : > { %2222 = vmatmul.msk.f32.gmra.mxu2 %vm383_vm2, %v3127_v13 }
  0x59   : > { %2230 = vmatmul.msk.f32.gmra.mxu3 %vm383_vm2, %v3130_v3 }
  0x5a   : > { %2206 = vmatmul.msk.f32.gmra.mxu0 %vm383_vm2, %v3135_v24 }
  0x5f   : > { %2232 = vmatmul.msk.f32.vlgmr.msrb.gmra.mxu1 %vm383_vm2, %v2809_v18  ;;  %v751_v18 = vrot.slane %v2883_v45, 2 }
  0x60   : > { %2266 = vmatmul.msk.f32.vlgmr.msrb.gmra.mxu2 %vm383_vm2, %v748_v55  ;;  %v3227_v55 = vsel %vm745_vm3, %v762_v42, %v764_v43 }
  0x61   : > { %2300 = vmatmul.msk.f32.vlgmr.msrb.gmra.mxu3 %vm383_vm2, %v2883_v45  ;;  %v3165_v28 = vsel %vm745_vm3, %v751_v18, %v752_v52 }
  0x62   : > { %2334 = vmatmul.msk.f32.vlgmr.msrb.gmra.mxu0 %vm383_vm2, %v2916_v59 }
  0x67   : > { %2233 = vmatmul.msk.f32.gmra.mxu1 %vm383_vm2, %v2818_v21  ;;  %v754_v21 = vrot.slane %v2924_v61, 2 }
  0x68   : > { %2267 = vmatmul.msk.f32.gmra.mxu2 %vm383_vm2, %v750_v30  ;;  %v767_v30 = vrot.slane %v2785_v6, 2 }
  0x69   : > { %2301 = vmatmul.msk.f32.gmra.mxu3 %vm383_vm2, %v2886_v46  ;;  %v3177_v59 = vsel %vm745_vm3, %v752_v52, %v754_v21  ;;  %v769_v21 = vrot.slane %v2806_v17, 2  ;;  %v771_v17 = vrot.slane %v2856_v36, 2 }
  0x6a   : > { %2335 = vmatmul.msk.f32.gmra.mxu0 %vm383_vm2, %v2961_v16  ;;  %v757_v16 = vrot.slane %v2973_v29, 2  ;;  %v3242_v18 = vsel %vm745_vm3, %v766_v40, %v767_v30 }
  0x6b   : > { %4231 = vst [vmem:[#allocation37_spill] sm:$0xff] %v3242_v18 }
  0x6f   : > { %2234 = vmatmul.msk.f32.gmra.mxu1 %vm383_vm2, %v2883_v45  ;;  %v756_v45 = vrot.slane %v2970_v27, 2 }
  0x70   : > { %2268 = vmatmul.msk.f32.gmra.mxu2 %vm383_vm2, %v3165_v28 }
  0x71   : > { %2302 = vmatmul.msk.f32.gmra.mxu3 %vm383_vm2, %v2970_v27  ;;  %v3190_v61 = vsel %vm745_vm3, %v756_v45, %v757_v16 }
  0x72   : > { %2336 = vmatmul.msk.f32.gmra.mxu0 %vm383_vm2, %v3005_v62 }
  0x77   : > { %2235 = vmatmul.msk.f32.gmra.mxu1 %vm383_vm2, %v2886_v46  ;;  %v759_v46 = vrot.slane %v3008_v63, 2  ;;  %v3215_v63 = vsel %vm745_vm3, %v761_v26, %v762_v42  ;;  %v772_v42 = vrot.slane %v2859_v37, 2 }
  0x78   : > { %2269 = vmatmul.msk.f32.gmra.mxu2 %vm383_vm2, %v3177_v59 }
  0x79   : > { %2303 = vmatmul.msk.f32.gmra.mxu3 %vm383_vm2, %v2973_v29  ;;  %v3202_v44 = vsel %vm745_vm3, %v757_v16, %v759_v46 }
  0x7a   : > { %2337 = vmatmul.msk.f32.gmra.mxu0 %vm383_vm2, %v3061_v25 }
  0x7f   : > { %2236 = vmatmul.msk.f32.gmra.mxu1 %vm383_vm2, %v2970_v27 }
  0x80   : > { %2270 = vmatmul.msk.f32.gmra.mxu2 %vm383_vm2, %v3190_v61 }
  0x81   : > { %2304 = vmatmul.msk.f32.gmra.mxu3 %vm383_vm2, %v3070_v60 }
  0x82   : > { %2338 = vmatmul.msk.f32.gmra.mxu0 %vm383_vm2, %v3108_v12 }
  0x87   : > { %2237 = vmatmul.msk.f32.gmra.mxu1 %vm383_vm2, %v2973_v29 }
  0x88   : > { %2271 = vmatmul.msk.f32.gmra.mxu2 %vm383_vm2, %v3202_v44 }
  0x89   : > { %2305 = vmatmul.msk.f32.gmra.mxu3 %vm383_vm2, %v3073_v32 }
  0x8a   : > { %2339 = vmatmul.msk.f32.gmra.mxu0 %vm383_vm2, %v3135_v24 }
  0x8f   : > { %2238 = vmatmul.msk.f32.gmra.mxu1 %vm383_vm2, %v3070_v60 }
  0x90   : > { %2272 = vmatmul.msk.f32.gmra.mxu2 %vm383_vm2, %v3215_v63 }
  0x91   : > { %2306 = vmatmul.msk.f32.gmra.mxu3 %vm383_vm2, %v2782_v5 }
  0x92   : > { %2340 = vmatmul.msk.f32.gmra.mxu0 %vm383_vm2, %v2812_v19 }
  0x97   : > { %2239 = vmatmul.msk.f32.gmra.mxu1 %vm383_vm2, %v3073_v32 }
  0x98   : > { %2273 = vmatmul.msk.f32.gmra.mxu2 %vm383_vm2, %v3227_v55 }
  0x99   : > { %2307 = vmatmul.msk.f32.gmra.mxu3 %vm383_vm2, %v2785_v6 }
  0x9a   : > { %2341 = vmatmul.msk.f32.gmra.mxu0 %vm383_vm2, %v2847_v33 }
  0x9c   : > { %v3239_v31 = vpop.f32.mrf.mxu1 }
  0x9f   : > { %2240 = vmatmul.msk.f32.gmra.mxu1 %vm383_vm2, %v2782_v5  ;;  %v3246_v52 = vpop.f32.mrf.mxu0  ;;  %v3262_v5 = vsel %vm745_vm3, %v767_v30, %v769_v21  ;;  %v3283_v30 = vsel %vm745_vm3, %v771_v17, %v772_v42 }
  0xa0   : > { %2274 = vmatmul.msk.f32.gmra.mxu2 %vm383_vm2, %v3242_v18  ;;  %4233 = vst [vmem:[#allocation39_spill] sm:$0xff] %v3262_v5 }
  0xa1   : > { %2308 = vmatmul.msk.f32.gmra.mxu3 %vm383_vm2, %v2856_v36  ;;  %4235 = vst [vmem:[#allocation41_spill] sm:$0xff] %v3283_v30 }
  0xa2   : > { %2342 = vmatmul.msk.f32.gmra.mxu0 %vm383_vm2, %v2896_v53 }
  0xa3   : > { %v3255_v45 = vpop.f32.mrf.mxu2 }
  0xa4   : > { %v3257_v16 = vpop.f32.mrf.mxu3  ;;  %v3259_v46 = vpop.f32.mrf.mxu1 }
  0xa5   : > { %4232 = vst [vmem:[#allocation38_spill] sm:$0xff] %v3257_v16  ;;  %v774_v16 = vrot.slane %v2905_v56, 2  ;;  %v776_v56 = vrot.slane %v2941_v4, 2 }
  0xa7   : > { %2241 = vmatmul.msk.f32.gmra.mxu1 %vm383_vm2, %v2785_v6  ;;  %v3266_v26 = vpop.f32.mrf.mxu0 }
  0xa8   : > { %2275 = vmatmul.msk.f32.gmra.mxu2 %vm383_vm2, %v3262_v5 }
  0xa9   : > { %2309 = vmatmul.msk.f32.gmra.mxu3 %vm383_vm2, %v2859_v37 }
  0xaa   : > { %2343 = vmatmul.msk.f32.gmra.mxu0 %vm383_vm2, %v2932_v1 }
  0xab   : > { %v3276_v43 = vpop.f32.mrf.mxu2 }
  0xac   : > { %v3278_v40 = vpop.f32.mrf.mxu3  ;;  %v3280_v6 = vpop.f32.mrf.mxu1 }
  0xad   : > { %4234 = vst [vmem:[#allocation40_spill] sm:$0xff] %v3278_v40 }
  0xaf   : > { %2242 = vmatmul.msk.f32.gmra.mxu1 %vm383_vm2, %v2856_v36  ;;  %v3287_v21 = vpop.f32.mrf.mxu0  ;;  %v3303_v36 = vsel %vm745_vm3, %v772_v42, %v774_v16 }
  0xb0   : > { %2276 = vmatmul.msk.f32.gmra.mxu2 %vm383_vm2, %v3283_v30  ;;  %4237 = vst [vmem:[#allocation43_spill] sm:$0xff] %v3303_v36 }
  0xb1   : > { %2310 = vmatmul.msk.f32.gmra.mxu3 %vm383_vm2, %v2941_v4 }
  0xb2   : > { %2344 = vmatmul.msk.f32.gmra.mxu0 %vm383_vm2, %v2984_v47 }
  0xb3   : > { %v3296_v40 = vpop.f32.mrf.mxu2 }
  0xb4   : > { %v3298_v17 = vpop.f32.mrf.mxu3  ;;  %v3300_v1 = vpop.f32.mrf.mxu1 }
  0xb5   : > { %4236 = vst [vmem:[#allocation42_spill] sm:$0xff] %v3298_v17  ;;  %v777_v17 = vrot.slane %v2944_v8, 2 }
  0xb7   : > { %2243 = vmatmul.msk.f32.gmra.mxu1 %vm383_vm2, %v2859_v37  ;;  %v3307_v30 = vpop.f32.mrf.mxu0  ;;  %v3324_v47 = vsel %vm745_vm3, %v776_v56, %v777_v17 }
  0xb8   : > { %2277 = vmatmul.msk.f32.gmra.mxu2 %vm383_vm2, %v3303_v36  ;;  %4239 = vst [vmem:[#allocation45_spill] sm:$0xff] %v3324_v47 }
  0xb9   : > { %2311 = vmatmul.msk.f32.gmra.mxu3 %vm383_vm2, %v2944_v8 }
  0xba   : > { %2345 = vmatmul.msk.f32.gmra.mxu0 %vm383_vm2, %v3032_v50  ;;  %v779_v50 = vrot.slane %v2987_v48, 2  ;;  %v781_v48 = vrot.slane %v3041_v0, 2 }
  0xbb   : > { %v3317_v16 = vpop.f32.mrf.mxu2 }
  0xbc   : > { %v3319_v42 = vpop.f32.mrf.mxu3  ;;  %v3321_v37 = vpop.f32.mrf.mxu1 }
  0xbd   : > { %4238 = vst [vmem:[#allocation44_spill] sm:$0xff] %v3319_v42 }
  0xbf   : > { %2244 = vmatmul.msk.f32.gmra.mxu1 %vm383_vm2, %v2941_v4  ;;  %v3328_v36 = vpop.f32.mrf.mxu0  ;;  %v3344_v4 = vsel %vm745_vm3, %v777_v17, %v779_v50 }
  0xc0   : > { %2278 = vmatmul.msk.f32.gmra.mxu2 %vm383_vm2, %v3324_v47  ;;  %4241 = vst [vmem:[#allocation47_spill] sm:$0xff] %v3344_v4 }
  0xc1   : > { %2312 = vmatmul.msk.f32.gmra.mxu3 %vm383_vm2, %v3041_v0 }
  0xc2   : > { %2346 = vmatmul.msk.f32.gmra.mxu0 %vm383_vm2, %v3088_v35 }
  0xc3   : > { %v3337_v42 = vpop.f32.mrf.mxu2 }
  0xc4   : > { %v3339_v56 = vpop.f32.mrf.mxu3  ;;  %v3341_v53 = vpop.f32.mrf.mxu1 }
  0xc5   : > { %4240 = vst [vmem:[#allocation46_spill] sm:$0xff] %v3339_v56  ;;  %v782_v56 = vrot.slane %v3044_v22, 2 }
  0xc7   : > { %2245 = vmatmul.msk.f32.gmra.mxu1 %vm383_vm2, %v2944_v8  ;;  %v3348_v47 = vpop.f32.mrf.mxu0  ;;  %v3365_v35 = vsel %vm745_vm3, %v781_v48, %v782_v56 }
  0xc8   : > { %2279 = vmatmul.msk.f32.gmra.mxu2 %vm383_vm2, %v3344_v4  ;;  %4244 = vst [vmem:[#allocation50_spill] sm:$0xff] %v3365_v35 }
  0xc9   : > { %2313 = vmatmul.msk.f32.gmra.mxu3 %vm383_vm2, %v3044_v22 }
  0xca   : > { %2347 = vmatmul.msk.f32.gmra.mxu0 %vm383_vm2, %v3124_v51  ;;  %v784_v51 = vrot.slane %v3097_v41, 2  ;;  %v786_v41 = vrot.slane %v2788_v7, 2 }
  0xcb   : > { %v3358_v50 = vpop.f32.mrf.mxu2 }
  0xcc   : > { %4242 = vst [vmem:[#allocation48_spill] sm:$0xff] %v3358_v50  ;;  %v3360_v17 = vpop.f32.mrf.mxu3  ;;  %v3362_v8 = vpop.f32.mrf.mxu1 }
  0xcd   : > { %4243 = vst [vmem:[#allocation49_spill] sm:$0xff] %v3360_v17 }
  0xcf   : > { %2246 = vmatmul.msk.f32.gmra.mxu1 %vm383_vm2, %v3041_v0  ;;  %v3369_v4 = vpop.f32.mrf.mxu0  ;;  %v3385_v0 = vsel %vm745_vm3, %v782_v56, %v784_v51 }
  0xd0   : > { %2280 = vmatmul.msk.f32.gmra.mxu2 %vm383_vm2, %v3365_v35  ;;  %4247 = vst [vmem:[#allocation53_spill] sm:$0xff] %v3385_v0 }
  0xd1   : > { %2314 = vmatmul.msk.f32.gmra.mxu3 %vm383_vm2, %v2788_v7 }
  0xd2   : > { %2348 = vmatmul.msk.f32.gmra.mxu0 %vm383_vm2, %v2824_v23 }
  0xd3   : > { %v3378_v17 = vpop.f32.mrf.mxu2 }
  0xd4   : > { %4245 = vst [vmem:[#allocation51_spill] sm:$0xff] %v3378_v17  ;;  %v3380_v48 = vpop.f32.mrf.mxu3  ;;  %v3382_v5 = vpop.f32.mrf.mxu1 }
  0xd5   : > { %4246 = vst [vmem:[#allocation52_spill] sm:$0xff] %v3380_v48  ;;  %v787_v48 = vrot.slane %v2793_v10, 2 }
  0xd7   : > { %2247 = vmatmul.msk.f32.gmra.mxu1 %vm383_vm2, %v3044_v22  ;;  %v3389_v35 = vpop.f32.mrf.mxu0  ;;  %v3404_v23 = vsel %vm745_vm3, %v786_v41, %v787_v48 }
  0xd8   : > { %2281 = vmatmul.msk.f32.gmra.mxu2 %vm383_vm2, %v3385_v0  ;;  %4250 = vst [vmem:[#allocation56_spill] sm:$0xff] %v3404_v23 }
  0xd9   : > { %2315 = vmatmul.msk.f32.gmra.mxu3 %vm383_vm2, %v2793_v10 }
  0xda   : > { %2349 = vmatmul.msk.f32.gmra.mxu0 %vm383_vm2, %v2850_v34  ;;  %v789_v34 = vrot.slane %v2815_v20, 2  ;;  %v791_v20 = vrot.slane %v2862_v38, 2 }
  0xdb   : > { %v3399_v51 = vpop.f32.mrf.mxu2 }
  0xdc   : > { %4248 = vst [vmem:[#allocation54_spill] sm:$0xff] %v3399_v51  ;;  %v3401_v56 = vpop.f32.mrf.mxu3  ;;  %v649_v22 = vpop.f32.mrf.mxu1 }
  0xdd   : > { %4249 = vst [vmem:[#allocation55_spill] sm:$0xff] %v3401_v56  ;;  %v650_v51 = vadd.f32 %v649_v22, %v3246_v52  ;;  %v792_v52 = vrot.slane %v2865_v39, 2 }
  0xdf   : > { %2248 = vmatmul.msk.f32.gmra.mxu1 %vm383_vm2, %v2788_v7  ;;  %v1228_v0 = vpop.f32.mrf.mxu0  ;;  %v3417_v7 = vsel %vm745_vm3, %v787_v48, %v789_v34 }
  0xe0   : > { %2282 = vmatmul.msk.f32.gmra.mxu2 %vm383_vm2, %v3404_v23 }
  0xe1   : > { %2316 = vmatmul.msk.f32.gmra.mxu3 %vm383_vm2, %v2862_v38 }
  0xe2   : > { %2350 = vmatmul.msk.f32.gmra.mxu0 %vm383_vm2, %v2899_v54 }
  0xe3   : > { %v912_v56 = vpop.f32.mrf.mxu2 }
  0xe4   : > { %v1068_v41 = vpop.f32.mrf.mxu3  ;;  %v1008_v17 = vadd.f32 %v912_v56, %v650_v51  ;;  %v652_v50 = vpop.f32.mrf.mxu1 }
  0xe5   : > { %v653_v34 = vadd.f32 %v652_v50, %v3266_v26  ;;  %v794_v26 = vrot.slane %v2908_v57, 2  ;;  %v796_v57 = vrot.slane %v2947_v9, 2 }
  0xe6   : > { %v1164_v33 = vadd.f32 %v1068_v41, %v1008_v17 }
  0xe7   : > { %2249 = vmatmul.msk.f32.gmra.mxu1 %vm383_vm2, %v2793_v10  ;;  %v1231_v23 = vpop.f32.mrf.mxu0 }
  0xe8   : > { %v3421_v18 = vadd.f32 %v1228_v0, %v1164_v33  ;;  %2283 = vmatmul.msk.f32.gmra.mxu2 %vm383_vm2, %v3417_v7  ;;  %v3433_v0 = vsel %vm745_vm3, %v791_v20, %v792_v52 }
  0xe9   : > { %2317 = vmatmul.msk.f32.gmra.mxu3 %vm383_vm2, %v2865_v39 }
  0xea   : > { %2351 = vmatmul.msk.f32.gmra.mxu0 %vm383_vm2, %v2935_v2 }
  0xeb   : > { %v915_v17 = vpop.f32.mrf.mxu2 }
  0xec   : > { %v1071_v10 = vpop.f32.mrf.mxu3  ;;  %v1009_v48 = vadd.f32 %v915_v17, %v653_v34  ;;  %v655_v33 = vpop.f32.mrf.mxu1 }
  0xed   : > { %v656_v50 = vadd.f32 %v655_v33, %v3287_v21  ;;  %v797_v21 = vrot.slane %v2950_v11, 2 }
  0xee   : > { %v1165_v51 = vadd.f32 %v1071_v10, %v1009_v48 }
  0xef   : > { %2250 = vmatmul.msk.f32.gmra.mxu1 %vm383_vm2, %v2862_v38  ;;  %v1234_v56 = vpop.f32.mrf.mxu0 }
  0xf0   : > { %v3437_v22 = vadd.f32 %v1231_v23, %v1165_v51  ;;  %2284 = vmatmul.msk.f32.gmra.mxu2 %vm383_vm2, %v3433_v0  ;;  %v3448_v23 = vsel %vm745_vm3, %v792_v52, %v794_v26  ;;  %v3464_v26 = vsel %vm745_vm3, %v796_v57, %v797_v21 }
  0xf1   : > { %2318 = vmatmul.msk.f32.gmra.mxu3 %vm383_vm2, %v2947_v9 }
  0xf2   : > { %2352 = vmatmul.msk.f32.gmra.mxu0 %vm383_vm2, %v2990_v49 }
  0xf3   : > { %v918_v41 = vpop.f32.mrf.mxu2 }
  0xf4   : > { %v1074_v20 = vpop.f32.mrf.mxu3  ;;  %v1010_v34 = vadd.f32 %v918_v41, %v656_v50  ;;  %v658_v38 = vpop.f32.mrf.mxu1 }
  0xf5   : > { %v659_v52 = vadd.f32 %v658_v38, %v3307_v30  ;;  %v4252_v30 = vld [vmem:[#allocation24_spill] sm:$0xff] }
  0xf6   : > { %v1166_v17 = vadd.f32 %v1074_v20, %v1010_v34  ;;  %v799_v34 = vrot.slane %v4252_v30, 2 }
  0xf7   : > { %2251 = vmatmul.msk.f32.gmra.mxu1 %vm383_vm2, %v2865_v39  ;;  %v1237_v10 = vpop.f32.mrf.mxu0 }
  0xf8   : > { %v3452_v48 = vadd.f32 %v1234_v56, %v1166_v17  ;;  %2285 = vmatmul.msk.f32.gmra.mxu2 %vm383_vm2, %v3448_v23  ;;  %v4253_v17 = vld [vmem:[#allocation32_spill] sm:$0xff] }
  0xf9   : > { %2319 = vmatmul.msk.f32.gmra.mxu3 %vm383_vm2, %v2950_v11 }
  0xfa   : > { %2353 = vmatmul.msk.f32.gmra.mxu0 %vm383_vm2, %v3035_v58 }
  0xfb   : > { %v921_v33 = vpop.f32.mrf.mxu2 }
  0xfc   : > { %v1077_v39 = vpop.f32.mrf.mxu3  ;;  %v1011_v51 = vadd.f32 %v921_v33, %v659_v52  ;;  %v661_v56 = vpop.f32.mrf.mxu1 }
  0xfd   : > { %v662_v38 = vadd.f32 %v661_v56, %v3328_v36  ;;  %v4255_v36 = vld [vmem:[#allocation28_spill] sm:$0xff]  ;;  %v801_v56 = vrot.slane %v3047_v14, 2 }
  0xfe   : > { %v1167_v50 = vadd.f32 %v1077_v39, %v1011_v51  ;;  %v802_v30 = vrot.slane %v4255_v36, 2 }
  0xff   : > { %2252 = vmatmul.msk.f32.gmra.mxu1 %vm383_vm2, %v2947_v9  ;;  %v1240_v41 = vpop.f32.mrf.mxu0 }
 0x100   : > { %v3468_v20 = vadd.f32 %v1237_v10, %v1167_v50  ;;  %2286 = vmatmul.msk.f32.gmra.mxu2 %vm383_vm2, %v3464_v26  ;;  %v3479_v10 = vsel %vm745_vm3, %v797_v21, %v799_v34 }
 0x101   : > { %2320 = vmatmul.msk.f32.gmra.mxu3 %vm383_vm2, %v3047_v14 }
 0x102   : > { %4251 = vst [vmem:[#allocation57_spill] sm:$0xff] %v3468_v20  ;;  %2354 = vmatmul.msk.f32.gmra.mxu0 %vm383_vm2, %v4253_v17 }
 0x103   : > { %v924_v57 = vpop.f32.mrf.mxu2 }
 0x104   : > { %v1080_v52 = vpop.f32.mrf.mxu3  ;;  %v1012_v33 = vadd.f32 %v924_v57, %v662_v38  ;;  %v664_v9 = vpop.f32.mrf.mxu1  ;;  %v3495_v57 = vsel %vm745_vm3, %v801_v56, %v802_v30 }
 0x105   : > { %v665_v21 = vadd.f32 %v664_v9, %v3348_v47  ;;  %v4257_v47 = vld [vmem:[#allocation5_spill] sm:$0xff]  ;;  %v4258_v9 = vld [vmem:[#allocation34_spill] sm:$0xff] }
 0x106   : > { %v1168_v39 = vadd.f32 %v1080_v52, %v1012_v33 }
 0x107   : > { %2253 = vmatmul.msk.f32.gmra.mxu1 %vm383_vm2, %v2950_v11  ;;  %v1243_v51 = vpop.f32.mrf.mxu0 }
 0x108   : > { %v3483_v50 = vadd.f32 %v1240_v41, %v1168_v39  ;;  %2287 = vmatmul.msk.f32.gmra.mxu2 %vm383_vm2, %v3479_v10 }
 0x109   : > { %2321 = vmatmul.msk.f32.gmra.mxu3 %vm383_vm2, %v4255_v36 }
 0x10a   : > { %4254 = vst [vmem:[#allocation24_spill] sm:$0xff] %v3483_v50  ;;  %2355 = vmatmul.msk.f32.gmra.mxu0 %vm383_vm2, %v3127_v13  ;;  %v804_v50 = vrot.slane %v4258_v9, 2 }
 0x10b   : > { %v927_v34 = vpop.f32.mrf.mxu2 }
 0x10c   : > { %v1083_v11 = vpop.f32.mrf.mxu3  ;;  %v1013_v38 = vadd.f32 %v927_v34, %v665_v21  ;;  %v667_v41 = vpop.f32.mrf.mxu1  ;;  %v4259_v34 = vld [vmem:[#allocation8_spill] sm:$0xff] }
 0x10d   : > { %v668_v21 = vadd.f32 %v667_v41, %v3369_v4  ;;  %v4261_v4 = vld [vmem:[#allocation6_spill] sm:$0xff]  ;;  %v806_v41 = vrot.slane %v4257_v47, 2 }
 0x10e   : > { %v1169_v52 = vadd.f32 %v1083_v11, %v1013_v38  ;;  %v807_v9 = vrot.slane %v4261_v4, 2 }
 0x10f   : > { %2254 = vmatmul.msk.f32.gmra.mxu1 %vm383_vm2, %v3047_v14  ;;  %v1246_v33 = vpop.f32.mrf.mxu0 }
 0x110   : > { %v3499_v39 = vadd.f32 %v1243_v51, %v1169_v52  ;;  %2288 = vmatmul.msk.f32.gmra.mxu2 %vm383_vm2, %v3495_v57  ;;  %v3510_v51 = vsel %vm745_vm3, %v802_v30, %v804_v50  ;;  %v4262_v30 = vld [vmem:[#allocation12_spill] sm:$0xff] }
 0x111   : > { %2322 = vmatmul.msk.f32.gmra.mxu3 %vm383_vm2, %v4257_v47 }
 0x112   : > { %4256 = vst [vmem:[#allocation32_spill] sm:$0xff] %v3499_v39  ;;  %2356 = vmatmul.msk.f32.gmra.mxu0 %vm383_vm2, %v4259_v34 }
 0x113   : > { %v930_v56 = vpop.f32.mrf.mxu2 }
 0x114   : > { %v1086_v11 = vpop.f32.mrf.mxu3  ;;  %v1014_v38 = vadd.f32 %v930_v56, %v668_v21  ;;  %v670_v14 = vpop.f32.mrf.mxu1 }
 0x115   : > { %v671_v50 = vadd.f32 %v670_v14, %v3389_v35  ;;  %v4265_v35 = vld [vmem:[#allocation13_spill] sm:$0xff] }
 0x116   : > { %v1170_v52 = vadd.f32 %v1086_v11, %v1014_v38  ;;  %v3526_v11 = vsel %vm745_vm3, %v806_v41, %v807_v9  ;;  %v4266_v14 = vld [vmem:[#allocation9_spill] sm:$0xff] }
 0x117   : > { %2255 = vmatmul.msk.f32.gmra.mxu1 %vm383_vm2, %v4255_v36  ;;  %v1249_v39 = vpop.f32.mrf.mxu0  ;;  %4263 = vst [vmem:[#allocation5_spill] sm:$0xff] %v3526_v11 }
 0x118   : > { %v3514_v20 = vadd.f32 %v1246_v33, %v1170_v52  ;;  %2289 = vmatmul.msk.f32.gmra.mxu2 %vm383_vm2, %v3510_v51 }
 0x119   : > { %2323 = vmatmul.msk.f32.gmra.mxu3 %vm383_vm2, %v4261_v4 }
 0x11a   : > { %4260 = vst [vmem:[#allocation28_spill] sm:$0xff] %v3514_v20  ;;  %2357 = vmatmul.msk.f32.gmra.mxu0 %vm383_vm2, %v4262_v30  ;;  %v809_v30 = vrot.slane %v4266_v14, 2 }
 0x11b   : > { %v933_v21 = vpop.f32.mrf.mxu2 }
 0x11c   : > { %v1089_v36 = vpop.f32.mrf.mxu3  ;;  %v1015_v56 = vadd.f32 %v933_v21, %v671_v50  ;;  %v673_v33 = vpop.f32.mrf.mxu1  ;;  %v4267_v21 = vld [vmem:[#allocation16_spill] sm:$0xff] }
 0x11d   : > { %v674_v50 = vadd.f32 %v673_v33, %v3239_v31  ;;  %v4269_v31 = vld [vmem:[#allocation14_spill] sm:$0xff]  ;;  %v811_v33 = vrot.slane %v4265_v35, 2 }
 0x11e   : > { %v1171_v38 = vadd.f32 %v1089_v36, %v1015_v56  ;;  %v812_v14 = vrot.slane %v4269_v31, 2 }
 0x11f   : > { %2256 = vmatmul.msk.f32.gmra.mxu1 %vm383_vm2, %v4257_v47  ;;  %v1252_v52 = vpop.f32.mrf.mxu0 }
 0x120   : > { %v3530_v20 = vadd.f32 %v1249_v39, %v1171_v38  ;;  %2290 = vmatmul.msk.f32.gmra.mxu2 %vm383_vm2, %v3526_v11  ;;  %v3541_v39 = vsel %vm745_vm3, %v807_v9, %v809_v30  ;;  %v4270_v30 = vld [vmem:[#allocation19_spill] sm:$0xff] }
 0x121   : > { %2324 = vmatmul.msk.f32.gmra.mxu3 %vm383_vm2, %v4265_v35 }
 0x122   : > { %4264 = vst [vmem:[#allocation34_spill] sm:$0xff] %v3530_v20  ;;  %2358 = vmatmul.msk.f32.gmra.mxu0 %vm383_vm2, %v4267_v21 }
 0x123   : > { %v936_v41 = vpop.f32.mrf.mxu2 }
 0x124   : > { %v1092_v36 = vpop.f32.mrf.mxu3  ;;  %v1016_v56 = vadd.f32 %v936_v41, %v674_v50  ;;  %v676_v47 = vpop.f32.mrf.mxu1 }
 0x125   : > { %v677_v9 = vadd.f32 %v676_v47, %v3259_v46  ;;  %v4273_v46 = vld [vmem:[#allocation20_spill] sm:$0xff]  ;;  %v4274_v47 = vld [vmem:[#allocation17_spill] sm:$0xff] }
 0x126   : > { %v1172_v38 = vadd.f32 %v1092_v36, %v1016_v56  ;;  %v3557_v36 = vsel %vm745_vm3, %v811_v33, %v812_v14 }
 0x127   : > { %2257 = vmatmul.msk.f32.gmra.mxu1 %vm383_vm2, %v4261_v4  ;;  %v1255_v20 = vpop.f32.mrf.mxu0  ;;  %4271 = vst [vmem:[#allocation6_spill] sm:$0xff] %v3557_v36 }
 0x128   : > { %v3545_v11 = vadd.f32 %v1252_v52, %v1172_v38  ;;  %2291 = vmatmul.msk.f32.gmra.mxu2 %vm383_vm2, %v3541_v39 }
 0x129   : > { %2325 = vmatmul.msk.f32.gmra.mxu3 %vm383_vm2, %v4269_v31 }
 0x12a   : > { %4268 = vst [vmem:[#allocation8_spill] sm:$0xff] %v3545_v11  ;;  %2359 = vmatmul.msk.f32.gmra.mxu0 %vm383_vm2, %v4270_v30  ;;  %v814_v30 = vrot.slane %v4274_v47, 2 }
 0x12b   : > { %v939_v50 = vpop.f32.mrf.mxu2 }
 0x12c   : > { %v1095_v4 = vpop.f32.mrf.mxu3  ;;  %v1017_v41 = vadd.f32 %v939_v50, %v677_v9  ;;  %v679_v52 = vpop.f32.mrf.mxu1  ;;  %v4275_v50 = vld [vmem:[#allocation23_spill] sm:$0xff] }
 0x12d   : > { %v680_v9 = vadd.f32 %v679_v52, %v3280_v6  ;;  %v4277_v6 = vld [vmem:[#allocation21_spill] sm:$0xff]  ;;  %v816_v52 = vrot.slane %v4273_v46, 2 }
 0x12e   : > { %v1173_v56 = vadd.f32 %v1095_v4, %v1017_v41  ;;  %v817_v47 = vrot.slane %v4277_v6, 2 }
 0x12f   : > { %2258 = vmatmul.msk.f32.gmra.mxu1 %vm383_vm2, %v4265_v35  ;;  %v1258_v38 = vpop.f32.mrf.mxu0 }
 0x130   : > { %v3561_v11 = vadd.f32 %v1255_v20, %v1173_v56  ;;  %2292 = vmatmul.msk.f32.gmra.mxu2 %vm383_vm2, %v3557_v36  ;;  %v3572_v20 = vsel %vm745_vm3, %v812_v14, %v814_v30  ;;  %v4278_v30 = vld [vmem:[#allocation27_spill] sm:$0xff] }
 0x131   : > { %2326 = vmatmul.msk.f32.gmra.mxu3 %vm383_vm2, %v4273_v46 }
 0x132   : > { %4272 = vst [vmem:[#allocation13_spill] sm:$0xff] %v3561_v11  ;;  %2360 = vmatmul.msk.f32.gmra.mxu0 %vm383_vm2, %v4275_v50 }
 0x133   : > { %v942_v33 = vpop.f32.mrf.mxu2 }
 0x134   : > { %v1098_v4 = vpop.f32.mrf.mxu3  ;;  %v1018_v41 = vadd.f32 %v942_v33, %v680_v9  ;;  %v682_v35 = vpop.f32.mrf.mxu1 }
 0x135   : > { %v683_v14 = vadd.f32 %v682_v35, %v3300_v1  ;;  %v4281_v1 = vld [vmem:[#allocation29_spill] sm:$0xff] }
 0x136   : > { %v1174_v56 = vadd.f32 %v1098_v4, %v1018_v41  ;;  %v3588_v4 = vsel %vm745_vm3, %v816_v52, %v817_v47  ;;  %v4282_v35 = vld [vmem:[#allocation25_spill] sm:$0xff] }
 0x137   : > { %2259 = vmatmul.msk.f32.gmra.mxu1 %vm383_vm2, %v4269_v31  ;;  %v1261_v11 = vpop.f32.mrf.mxu0  ;;  %4279 = vst [vmem:[#allocation16_spill] sm:$0xff] %v3588_v4  ;;  %v4283_v52 = vld [vmem:[#allocation33_spill] sm:$0xff] }
 0x138   : > { %v3576_v36 = vadd.f32 %v1258_v38, %v1174_v56  ;;  %2293 = vmatmul.msk.f32.gmra.mxu2 %vm383_vm2, %v3572_v20 }
 0x139   : > { %2327 = vmatmul.msk.f32.gmra.mxu3 %vm383_vm2, %v4277_v6 }
 0x13a   : > { %4276 = vst [vmem:[#allocation9_spill] sm:$0xff] %v3576_v36  ;;  %2361 = vmatmul.msk.f32.gmra.mxu0 %vm383_vm2, %v4278_v30 }
 0x13b   : > { %v945_v9 = vpop.f32.mrf.mxu2 }
 0x13c   : > { %v1101_v31 = vpop.f32.mrf.mxu3  ;;  %v1019_v33 = vadd.f32 %v945_v9, %v683_v14  ;;  %v685_v38 = vpop.f32.mrf.mxu1  ;;  %v819_v14 = vrot.slane %v4282_v35, 2  ;;  %v821_v35 = vrot.slane %v4281_v1, 2 }
 0x13d   : > { %v686_v9 = vadd.f32 %v685_v38, %v3321_v37  ;;  %v4285_v37 = vld [vmem:[#allocation30_spill] sm:$0xff] }
 0x13e   : > { %v1175_v41 = vadd.f32 %v1101_v31, %v1019_v33  ;;  %v3614_v38 = vld [vmem:[%s2779_s19 + $0x188] sm:$0xff] }
 0x13f   : > { %2260 = vmatmul.msk.f32.gmra.mxu1 %vm383_vm2, %v4273_v46  ;;  %v1264_v56 = vpop.f32.mrf.mxu0 }
 0x140   : > { %v3592_v36 = vadd.f32 %v1261_v11, %v1175_v41  ;;  %2294 = vmatmul.msk.f32.gmra.mxu2 %vm383_vm2, %v3588_v4  ;;  %v3603_v41 = vsel %vm745_vm3, %v817_v47, %v819_v14  ;;  %v822_v47 = vrot.slane %v4285_v37, 2 }
 0x141   : > { %2328 = vmatmul.msk.f32.gmra.mxu3 %vm383_vm2, %v4281_v1 }
 0x142   : > { %4280 = vst [vmem:[#allocation14_spill] sm:$0xff] %v3592_v36  ;;  %2362 = vmatmul.msk.f32.gmra.mxu0 %vm383_vm2, %v4283_v52 }
 0x143   : > { %v948_v31 = vpop.f32.mrf.mxu2 }
 0x144   : > { %v1104_v46 = vpop.f32.mrf.mxu3  ;;  %v1020_v33 = vadd.f32 %v948_v31, %v686_v9  ;;  %v688_v11 = vpop.f32.mrf.mxu1  ;;  %v3620_v9 = vld [vmem:[%s2779_s19 + $0x180] sm:$0xff]  ;;  %v1198_v31 = vrot.slane %v3614_v38, 1 }
 0x145   : > { %v689_v14 = vadd.f32 %v688_v11, %v3341_v53  ;;  %4286 = vst [vmem:[#allocation17_spill] sm:$0xff] %v3620_v9 }
 0x146   : > { %v1176_v36 = vadd.f32 %v1104_v46, %v1020_v33 }
 0x147   : > { %2261 = vmatmul.msk.f32.gmra.mxu1 %vm383_vm2, %v4277_v6  ;;  %v1267_v30 = vpop.f32.mrf.mxu0 }
 0x148   : > { %v3607_v4 = vadd.f32 %v1264_v56, %v1176_v36  ;;  %2295 = vmatmul.msk.f32.gmra.mxu2 %vm383_vm2, %v3603_v41  ;;  %v1197_v56 = vrot.slane %v3620_v9, 1 }
 0x149   : > { %2329 = vmatmul.msk.f32.gmra.mxu3 %vm383_vm2, %v4285_v37 }
 0x14a   : > { %4284 = vst [vmem:[#allocation20_spill] sm:$0xff] %v3607_v4  ;;  %2363 = vmatmul.msk.f32.gmra.mxu0 %vm383_vm2, %v3130_v3  ;;  %v3627_v4 = vsel %vm745_vm3, %v821_v35, %v822_v47  ;;  %v3632_v11 = vsel %vm300_vm1, %v1197_v56, %v1198_v31  ;;  %v824_v35 = vrot.slane %v3103_v15, 2 }
 0x14b   : > { %v951_v36 = vpop.f32.mrf.mxu2 }
 0x14c   : > { %v1107_v6 = vpop.f32.mrf.mxu3  ;;  %v1021_v46 = vadd.f32 %v951_v36, %v689_v14  ;;  %v691_v33 = vpop.f32.mrf.mxu1  ;;  %v3641_v14 = vld [vmem:[%s2779_s19 + $0x190] sm:$0x3] }
 0x14d   : > { %v692_v36 = vadd.f32 %v691_v33, %v3362_v8 }
 0x14e   : > { %v1177_v52 = vadd.f32 %v1107_v6, %v1021_v46  ;;  %v3649_v46 = vsel %vm745_vm3, %v822_v47, %v824_v35 }
 0x14f   : > { %2262 = vmatmul.msk.f32.gmra.mxu1 %vm383_vm2, %v4281_v1  ;;  %v1270_v53 = vpop.f32.mrf.mxu0 }
 0x150   : > { %v3634_v3 = vadd.f32 %v1267_v30, %v1177_v52  ;;  %2296 = vmatmul.msk.f32.gmra.mxu2 %vm383_vm2, %v3627_v4  ;;  %v1200_v30 = vrot.slane %v3641_v14, 1 }
 0x151   : > { %2330 = vmatmul.msk.f32.gmra.mxu3 %vm383_vm2, %v3620_v9 }
 0x152   : > { %4287 = vst [vmem:[#allocation23_spill] sm:$0xff] %v3634_v3  ;;  %2364 = vmatmul.msk.f32.gmra.mxu0 %vm383_vm2, %v3632_v11  ;;  %v3654_v15 = vsel %vm300_vm1, %v1198_v31, %v1200_v30 }
 0x153   : > { %v954_v1 = vpop.f32.mrf.mxu2 }
 0x154   : > { %v1110_v6 = vpop.f32.mrf.mxu3  ;;  %v1022_v52 = vadd.f32 %v954_v1, %v692_v36  ;;  %v694_v56 = vpop.f32.mrf.mxu1 }
 0x155   : > { %v695_v33 = vadd.f32 %v694_v56, %v3382_v5 }
 0x156   : > { %v1178_v3 = vadd.f32 %v1110_v6, %v1022_v52 }
 0x157   : > { %2263 = vmatmul.msk.f32.gmra.mxu1 %vm383_vm2, %v4285_v37  ;;  %v1273_v9 = vpop.f32.mrf.mxu0 }
 0x158   : > { %v3656_v8 = vadd.f32 %v1270_v53, %v1178_v3  ;;  %2297 = vmatmul.msk.f32.gmra.mxu2 %vm383_vm2, %v3649_v46 }
 0x159   : > { %2331 = vmatmul.msk.f32.gmra.mxu3 %vm383_vm2, %v3614_v38 }
 0x15a   : > { %2365 = vmatmul.msk.f32.gmra.mxu0 %vm383_vm2, %v3654_v15 }
 0x15b   : > { %v957_v47 = vpop.f32.mrf.mxu2 }
 0x15c   : > { %v1113_v35 = vpop.f32.mrf.mxu3  ;;  %v1023_v37 = vadd.f32 %v957_v47, %v695_v33  ;;  %v697_v36 = vpop.f32.mrf.mxu1 }
 0x15d   : > { %v698_v5 = vadd.f32 %v697_v36, %v3255_v45 }
 0x15e   : > { %v1179_v1 = vadd.f32 %v1113_v35, %v1023_v37 }
 0x15f   : > { %2368 = vmatmul.msk.f32.vlgmr.msra.gmra.mxu1 %vm383_vm2, %v3165_v28  ;;  %v1276_v3 = vpop.f32.mrf.mxu0 }
 0x160   : > { %v3667_v31 = vadd.f32 %v1273_v9, %v1179_v1  ;;  %2402 = vmatmul.msk.f32.vlgmr.msra.gmra.mxu2 %vm383_vm2, %v2970_v27 }
 0x161   : > { %2436 = vmatmul.msk.f32.vlgmr.msra.gmra.mxu3 %vm383_vm2, %v3005_v62 }
 0x162   : > { %2470 = vmatmul.msk.f32.vlgmr.msra.gmra.mxu0 %vm383_vm2, %v3190_v61 }
 0x163   : > { %v960_v53 = vpop.f32.mrf.mxu2 }
 0x164   : > { %v1116_v6 = vpop.f32.mrf.mxu3  ;;  %v1024_v30 = vadd.f32 %v960_v53, %v698_v5  ;;  %v700_v52 = vpop.f32.mrf.mxu1 }
 0x165   : > { %v701_v27 = vadd.f32 %v700_v52, %v3276_v43 }
 0x166   : > { %v1180_v56 = vadd.f32 %v1116_v6, %v1024_v30 }
 0x167   : > { %2369 = vmatmul.msk.f32.gmra.mxu1 %vm383_vm2, %v3177_v59  ;;  %v1279_v28 = vpop.f32.mrf.mxu0 }
 0x168   : > { %v3678_v9 = vadd.f32 %v1276_v3, %v1180_v56  ;;  %2403 = vmatmul.msk.f32.gmra.mxu2 %vm383_vm2, %v2973_v29 }
 0x169   : > { %2437 = vmatmul.msk.f32.gmra.mxu3 %vm383_vm2, %v3061_v25 }
 0x16a   : > { %2471 = vmatmul.msk.f32.gmra.mxu0 %vm383_vm2, %v3202_v44 }
 0x16b   : > { %v963_v62 = vpop.f32.mrf.mxu2 }
 0x16c   : > { %v1119_v45 = vpop.f32.mrf.mxu3  ;;  %v1025_v33 = vadd.f32 %v963_v62, %v701_v27  ;;  %v703_v47 = vpop.f32.mrf.mxu1 }
 0x16d   : > { %v704_v29 = vadd.f32 %v703_v47, %v3296_v40  ;;  %v2571_v47 = vld [vmem:[%s2779_s19 + $0x68] sm:$0xff] }
 0x16e   : > { %v1181_v35 = vadd.f32 %v1119_v45, %v1025_v33 }
 0x16f   : > { %2370 = vmatmul.msk.f32.gmra.mxu1 %vm383_vm2, %v3190_v61  ;;  %v1282_v59 = vpop.f32.mrf.mxu0 }
 0x170   : > { %v3689_v37 = vadd.f32 %v1279_v28, %v1181_v35  ;;  %2404 = vmatmul.msk.f32.gmra.mxu2 %vm383_vm2, %v3070_v60 }
 0x171   : > { %2438 = vmatmul.msk.f32.gmra.mxu3 %vm383_vm2, %v3108_v12 }
 0x172   : > { %2472 = vmatmul.msk.f32.gmra.mxu0 %vm383_vm2, %v3215_v63 }
 0x173   : > { %v966_v25 = vpop.f32.mrf.mxu2 }
 0x174   : > { %v1122_v43 = vpop.f32.mrf.mxu3  ;;  %v1026_v36 = vadd.f32 %v966_v25, %v704_v29  ;;  %v706_v1 = vpop.f32.mrf.mxu1 }
 0x175   : > { %v707_v12 = vadd.f32 %v706_v1, %v3317_v16  ;;  %v4288_v16 = vld [vmem:[#allocation37_spill] sm:$0xff] }
 0x176   : > { %v1182_v3 = vadd.f32 %v1122_v43, %v1026_v36 }
 0x177   : > { %2371 = vmatmul.msk.f32.gmra.mxu1 %vm383_vm2, %v3202_v44  ;;  %v1285_v61 = vpop.f32.mrf.mxu0 }
 0x178   : > { %v3700_v5 = vadd.f32 %v1282_v59, %v1182_v3  ;;  %2405 = vmatmul.msk.f32.gmra.mxu2 %vm383_vm2, %v3073_v32  ;;  %v2570_v32 = vld [vmem:[%s2779_s19 + $0x60] sm:$0xff]  ;;  %v4291_v59 = vld [vmem:[#allocation39_spill] sm:$0xff] }
 0x179   : > { %2439 = vmatmul.msk.f32.gmra.mxu3 %vm383_vm2, %v3135_v24 }
 0x17a   : > { %2473 = vmatmul.msk.f32.gmra.mxu0 %vm383_vm2, %v3227_v55 }
 0x17b   : > { %v969_v60 = vpop.f32.mrf.mxu2 }
 0x17c   : > { %v1125_v40 = vpop.f32.mrf.mxu3  ;;  %v1027_v53 = vadd.f32 %v969_v60, %v707_v12  ;;  %v709_v6 = vpop.f32.mrf.mxu1  ;;  %v4292_v12 = vld [vmem:[#allocation15_spill] sm:$0xff] }
 0x17d   : > { %v710_v24 = vadd.f32 %v709_v6, %v3337_v42  ;;  %v4290_v42 = vld [vmem:[#allocation48_spill] sm:$0xff]  ;;  %v4293_v60 = vld [vmem:[#allocation51_spill] sm:$0xff] }
 0x17e   : > { %v1183_v30 = vadd.f32 %v1125_v40, %v1027_v53  ;;  %v4294_v53 = vld [vmem:[#allocation41_spill] sm:$0xff] }
 0x17f   : > { %2372 = vmatmul.msk.f32.gmra.mxu1 %vm383_vm2, %v3215_v63  ;;  %v1288_v44 = vpop.f32.mrf.mxu0 }
 0x180   : > { %v3711_v52 = vadd.f32 %v1285_v61, %v1183_v30  ;;  %2406 = vmatmul.msk.f32.gmra.mxu2 %vm383_vm2, %v2570_v32  ;;  %v2572_v61 = vld [vmem:[%s2779_s19 + $0x78] sm:$0xff] }
 0x181   : > { %2440 = vmatmul.msk.f32.gmra.mxu3 %vm383_vm2, %v2812_v19  ;;  %v4289_v19 = vld [vmem:[#allocation10_spill] sm:$0xff] }
 0x182   : > { %2474 = vmatmul.msk.f32.gmra.mxu0 %vm383_vm2, %v4288_v16 }
 0x183   : > { %v972_v56 = vpop.f32.mrf.mxu2 }
 0x184   : > { %v1128_v28 = vpop.f32.mrf.mxu3  ;;  %v1028_v27 = vadd.f32 %v972_v56, %v710_v24  ;;  %v712_v62 = vpop.f32.mrf.mxu1 }
 0x185   : > { %v713_v35 = vadd.f32 %v712_v62, %v4290_v42  ;;  %v4296_v62 = vld [vmem:[#allocation54_spill] sm:$0xff] }
 0x186   : > { %v1184_v63 = vadd.f32 %v1128_v28, %v1028_v27  ;;  %v2573_v28 = vld [vmem:[%s2779_s19 + $0x80] sm:$0xff]  ;;  %v4295_v27 = vld [vmem:[#allocation18_spill] sm:$0xff] }
 0x187   : > { %2373 = vmatmul.msk.f32.gmra.mxu1 %vm383_vm2, %v3227_v55  ;;  %v1291_v45 = vpop.f32.mrf.mxu0 }
 0x188   : > { %v3722_v33 = vadd.f32 %v1288_v44, %v1184_v63  ;;  %2407 = vmatmul.msk.f32.gmra.mxu2 %vm383_vm2, %v2571_v47 }
 0x189   : > { %2441 = vmatmul.msk.f32.gmra.mxu3 %vm383_vm2, %v4289_v19 }
 0x18a   : > { %2475 = vmatmul.msk.f32.gmra.mxu0 %vm383_vm2, %v4291_v59 }
 0x18b   : > { %v975_v29 = vpop.f32.mrf.mxu2 }
 0x18c   : > { %v1131_v25 = vpop.f32.mrf.mxu3  ;;  %v1029_v43 = vadd.f32 %v975_v29, %v713_v35  ;;  %v715_v36 = vpop.f32.mrf.mxu1 }
 0x18d   : > { %v716_v40 = vadd.f32 %v715_v36, %v4293_v60  ;;  %v4298_v36 = vld [vmem:[#allocation22_spill] sm:$0xff] }
 0x18e   : > { %v1185_v55 = vadd.f32 %v1131_v25, %v1029_v43  ;;  %v2574_v43 = vld [vmem:[%s2779_s19 + $0x90] sm:$0xff] }
 0x18f   : > { %2374 = vmatmul.msk.f32.gmra.mxu1 %vm383_vm2, %v4288_v16  ;;  %v1294_v1 = vpop.f32.mrf.mxu0 }
 0x190   : > { %v3733_v3 = vadd.f32 %v1291_v45, %v1185_v55  ;;  %2408 = vmatmul.msk.f32.gmra.mxu2 %vm383_vm2, %v2572_v61  ;;  %v4297_v45 = vld [vmem:[#allocation43_spill] sm:$0xff]  ;;  %v4299_v55 = vld [vmem:[#allocation38_spill] sm:$0xff]  ;;  %v4300_v61 = vld [vmem:[#allocation45_spill] sm:$0xff] }
 0x191   : > { %2442 = vmatmul.msk.f32.gmra.mxu3 %vm383_vm2, %v4292_v12 }
 0x192   : > { %2476 = vmatmul.msk.f32.gmra.mxu0 %vm383_vm2, %v4294_v53 }
 0x193   : > { %v978_v6 = vpop.f32.mrf.mxu2 }
 0x194   : > { %v1134_v30 = vpop.f32.mrf.mxu3  ;;  %v1030_v44 = vadd.f32 %v978_v6, %v716_v40  ;;  %v718_v32 = vpop.f32.mrf.mxu1 }
 0x195   : > { %v719_v63 = vadd.f32 %v718_v32, %v4296_v62  ;;  %v2575_v32 = vld [vmem:[%s2779_s19 + $0x98] sm:$0xff] }
 0x196   : > { %v1186_v24 = vadd.f32 %v1134_v30, %v1030_v44 }
 0x197   : > { %2375 = vmatmul.msk.f32.gmra.mxu1 %vm383_vm2, %v4291_v59  ;;  %v1297_v16 = vpop.f32.mrf.mxu0 }
 0x198   : > { %v3744_v56 = vadd.f32 %v1294_v1, %v1186_v24  ;;  %2409 = vmatmul.msk.f32.gmra.mxu2 %vm383_vm2, %v2573_v28  ;;  %v4301_v24 = vld [vmem:[#allocation26_spill] sm:$0xff] }
 0x199   : > { %2443 = vmatmul.msk.f32.gmra.mxu3 %vm383_vm2, %v4295_v27  ;;  %v4303_v27 = vld [vmem:[#allocation47_spill] sm:$0xff] }
 0x19a   : > { %2477 = vmatmul.msk.f32.gmra.mxu0 %vm383_vm2, %v4297_v45 }
 0x19b   : > { %v981_v47 = vpop.f32.mrf.mxu2 }
 0x19c   : > { %v1137_v19 = vpop.f32.mrf.mxu3  ;;  %v1031_v42 = vadd.f32 %v981_v47, %v719_v63  ;;  %v721_v35 = vpop.f32.mrf.mxu1 }
 0x19d   : > { %v722_v1 = vadd.f32 %v721_v35, %v4299_v55  ;;  %v4306_v55 = vld [vmem:[#allocation50_spill] sm:$0xff] }
 0x19e   : > { %v1187_v59 = vadd.f32 %v1137_v19, %v1031_v42 }
 0x19f   : > { %2376 = vmatmul.msk.f32.gmra.mxu1 %vm383_vm2, %v4294_v53  ;;  %v1300_v29 = vpop.f32.mrf.mxu0 }
 0x1a0   : > { %v3755_v25 = vadd.f32 %v1297_v16, %v1187_v59  ;;  %2410 = vmatmul.msk.f32.gmra.mxu2 %vm383_vm2, %v2574_v43  ;;  %v4302_v16 = vld [vmem:[#allocation40_spill] sm:$0xff]  ;;  %v2576_v59 = vld [vmem:[%s2779_s19 + $0xa8] sm:$0xff] }
 0x1a1   : > { %2444 = vmatmul.msk.f32.gmra.mxu3 %vm383_vm2, %v4298_v36  ;;  %v4305_v43 = vld [vmem:[#allocation42_spill] sm:$0xff] }
 0x1a2   : > { %2478 = vmatmul.msk.f32.gmra.mxu0 %vm383_vm2, %v4300_v61 }
 0x1a3   : > { %v984_v12 = vpop.f32.mrf.mxu2 }
 0x1a4   : > { %v1140_v60 = vpop.f32.mrf.mxu3  ;;  %v1032_v40 = vadd.f32 %v984_v12, %v722_v1  ;;  %v724_v6 = vpop.f32.mrf.mxu1 }
 0x1a5   : > { %v725_v28 = vadd.f32 %v724_v6, %v4302_v16 }
 0x1a6   : > { %v1188_v53 = vadd.f32 %v1140_v60, %v1032_v40 }
 0x1a7   : > { %2377 = vmatmul.msk.f32.gmra.mxu1 %vm383_vm2, %v4297_v45  ;;  %v1303_v30 = vpop.f32.mrf.mxu0 }
 0x1a8   : > { %v3766_v44 = vadd.f32 %v1300_v29, %v1188_v53  ;;  %2411 = vmatmul.msk.f32.gmra.mxu2 %vm383_vm2, %v2575_v32  ;;  %v4304_v29 = vld [vmem:[#allocation31_spill] sm:$0xff] }
 0x1a9   : > { %2445 = vmatmul.msk.f32.gmra.mxu3 %vm383_vm2, %v4301_v24  ;;  %v4307_v32 = vld [vmem:[#allocation35_spill] sm:$0xff]  ;;  %v4308_v24 = vld [vmem:[#allocation44_spill] sm:$0xff] }
 0x1aa   : > { %2479 = vmatmul.msk.f32.gmra.mxu0 %vm383_vm2, %v4303_v27 }
 0x1ab   : > { %v987_v62 = vpop.f32.mrf.mxu2 }
 0x1ac   : > { %v1143_v63 = vpop.f32.mrf.mxu3  ;;  %v1033_v47 = vadd.f32 %v987_v62, %v725_v28  ;;  %v727_v19 = vpop.f32.mrf.mxu1  ;;  %v4309_v28 = vld [vmem:[#allocation53_spill] sm:$0xff] }
 0x1ad   : > { %v728_v36 = vadd.f32 %v727_v19, %v4305_v43  ;;  %v4311_v43 = vld [vmem:[#allocation46_spill] sm:$0xff] }
 0x1ae   : > { %v1189_v45 = vadd.f32 %v1143_v63, %v1033_v47 }
 0x1af   : > { %2378 = vmatmul.msk.f32.gmra.mxu1 %vm383_vm2, %v4300_v61  ;;  %v1306_v42 = vpop.f32.mrf.mxu0 }
 0x1b0   : > { %v3777_v35 = vadd.f32 %v1303_v30, %v1189_v45  ;;  %2412 = vmatmul.msk.f32.gmra.mxu2 %vm383_vm2, %v2576_v59  ;;  %v2577_v30 = vld [vmem:[%s2779_s19 + $0xb0] sm:$0xff]  ;;  %v2578_v59 = vld [vmem:[%s2779_s19 + $0xc0] sm:$0xff] }
 0x1b1   : > { %2446 = vmatmul.msk.f32.gmra.mxu3 %vm383_vm2, %v4304_v29  ;;  %v4310_v29 = vld [vmem:[#allocation7_spill] sm:$0xff] }
 0x1b2   : > { %2480 = vmatmul.msk.f32.gmra.mxu0 %vm383_vm2, %v4306_v55 }
 0x1b3   : > { %v990_v1 = vpop.f32.mrf.mxu2 }
 0x1b4   : > { %v1146_v12 = vpop.f32.mrf.mxu3  ;;  %v1034_v60 = vadd.f32 %v990_v1, %v728_v36  ;;  %v730_v40 = vpop.f32.mrf.mxu1  ;;  %v4312_v1 = vld [vmem:[#allocation56_spill] sm:$0xff] }
 0x1b5   : > { %v731_v16 = vadd.f32 %v730_v40, %v4308_v24  ;;  %v4313_v24 = vld [vmem:[#allocation11_spill] sm:$0xff] }
 0x1b6   : > { %v1190_v61 = vadd.f32 %v1146_v12, %v1034_v60 }
 0x1b7   : > { %2379 = vmatmul.msk.f32.gmra.mxu1 %vm383_vm2, %v4303_v27  ;;  %v1309_v6 = vpop.f32.mrf.mxu0 }
 0x1b8   : > { %v3788_v53 = vadd.f32 %v1306_v42, %v1190_v61  ;;  %2413 = vmatmul.msk.f32.gmra.mxu2 %vm383_vm2, %v2577_v30 }
 0x1b9   : > { %2447 = vmatmul.msk.f32.gmra.mxu3 %vm383_vm2, %v4307_v32  ;;  %v2579_v32 = vld [vmem:[%s2779_s19 + $0xc8] sm:$0xff] }
 0x1ba   : > { %2481 = vmatmul.msk.f32.gmra.mxu0 %vm383_vm2, %v4309_v28 }
 0x1bb   : > { %v993_v62 = vpop.f32.mrf.mxu2 }
 0x1bc   : > { %v1149_v63 = vpop.f32.mrf.mxu3  ;;  %v1035_v47 = vadd.f32 %v993_v62, %v731_v16  ;;  %v733_v19 = vpop.f32.mrf.mxu1  ;;  %v4314_v16 = vld [vmem:[#allocation49_spill] sm:$0xff] }
 0x1bd   : > { %v734_v36 = vadd.f32 %v733_v19, %v4311_v43  ;;  %v4315_v43 = vld [vmem:[#allocation52_spill] sm:$0xff] }
 0x1be   : > { %v1191_v27 = vadd.f32 %v1149_v63, %v1035_v47 }
 0x1bf   : > { %2380 = vmatmul.msk.f32.gmra.mxu1 %vm383_vm2, %v4306_v55  ;;  %v1312_v45 = vpop.f32.mrf.mxu0 }
 0x1c0   : > { %v3799_v42 = vadd.f32 %v1309_v6, %v1191_v27  ;;  %2414 = vmatmul.msk.f32.gmra.mxu2 %vm383_vm2, %v2578_v59 }
 0x1c1   : > { %2448 = vmatmul.msk.f32.gmra.mxu3 %vm383_vm2, %v4310_v29  ;;  %v2580_v29 = vld [vmem:[%s2779_s19 + $0xd8] sm:$0xff] }
 0x1c2   : > { %2482 = vmatmul.msk.f32.gmra.mxu0 %vm383_vm2, %v4312_v1 }
 0x1c3   : > { %v996_v12 = vpop.f32.mrf.mxu2 }
 0x1c4   : > { %v1152_v60 = vpop.f32.mrf.mxu3  ;;  %v1036_v40 = vadd.f32 %v996_v12, %v734_v36  ;;  %v736_v61 = vpop.f32.mrf.mxu1 }
 0x1c5   : > { %v737_v62 = vadd.f32 %v736_v61, %v4314_v16 }
 0x1c6   : > { %v1192_v55 = vadd.f32 %v1152_v60, %v1036_v40 }
 0x1c7   : > { %2381 = vmatmul.msk.f32.gmra.mxu1 %vm383_vm2, %v4309_v28  ;;  %v1315_v6 = vpop.f32.mrf.mxu0 }
 0x1c8   : > { %v3810_v30 = vadd.f32 %v1312_v45, %v1192_v55  ;;  %2415 = vmatmul.msk.f32.gmra.mxu2 %vm383_vm2, %v2579_v32  ;;  %v2581_v32 = vld [vmem:[%s2779_s19 + $0xe0] sm:$0xff] }
 0x1c9   : > { %2449 = vmatmul.msk.f32.gmra.mxu3 %vm383_vm2, %v4313_v24 }
 0x1ca   : > { %2483 = vmatmul.msk.f32.gmra.mxu0 %vm383_vm2, %v3417_v7 }
 0x1cb   : > { %v999_v63 = vpop.f32.mrf.mxu2 }
 0x1cc   : > { %v1155_v47 = vpop.f32.mrf.mxu3  ;;  %v1037_v19 = vadd.f32 %v999_v63, %v737_v62  ;;  %v739_v27 = vpop.f32.mrf.mxu1 }
 0x1cd   : > { %v740_v36 = vadd.f32 %v739_v27, %v4315_v43 }
 0x1ce   : > { %v1193_v28 = vadd.f32 %v1155_v47, %v1037_v19 }
 0x1cf   : > { %2382 = vmatmul.msk.f32.gmra.mxu1 %vm383_vm2, %v4312_v1  ;;  %v1318_v45 = vpop.f32.mrf.mxu0 }
 0x1d0   : > { %v3821_v59 = vadd.f32 %v1315_v6, %v1193_v28  ;;  %2416 = vmatmul.msk.f32.gmra.mxu2 %vm383_vm2, %v2580_v29  ;;  %v2582_v28 = vld [vmem:[%s2779_s19 + $0xf0] sm:$0xff] }
 0x1d1   : > { %2450 = vmatmul.msk.f32.gmra.mxu3 %vm383_vm2, %v2899_v54  ;;  %v4316_v54 = vld [vmem:[#allocation55_spill] sm:$0xff] }
 0x1d2   : > { %2484 = vmatmul.msk.f32.gmra.mxu0 %vm383_vm2, %v3433_v0 }
 0x1d3   : > { %v1002_v12 = vpop.f32.mrf.mxu2 }
 0x1d4   : > { %v1158_v60 = vpop.f32.mrf.mxu3  ;;  %v1038_v40 = vadd.f32 %v1002_v12, %v740_v36  ;;  %v742_v61 = vpop.f32.mrf.mxu1  ;;  %v3856_v12 = vld [vmem:[%s4120_s2] ss:$0 sm:$0xff] }
 0x1d5   : > { %v743_v24 = vadd.f32 %v742_v61, %v4316_v54 }
 0x1d6   : > { %v1194_v1 = vadd.f32 %v1158_v60, %v1038_v40  ;;  %v2583_v60 = vld [vmem:[%s2779_s19 + $0xf8] sm:$0xff] }
 0x1d7   : > { %2383 = vmatmul.msk.f32.gmra.mxu1 %vm383_vm2, %v3417_v7  ;;  %v1321_v55 = vpop.f32.mrf.mxu0 }
 0x1d8   : > { %v3832_v6 = vadd.f32 %v1318_v45, %v1194_v1  ;;  %2417 = vmatmul.msk.f32.gmra.mxu2 %vm383_vm2, %v2581_v32 }
 0x1d9   : > { %2451 = vmatmul.msk.f32.gmra.mxu3 %vm383_vm2, %v2935_v2 }
 0x1da   : > { %2485 = vmatmul.msk.f32.gmra.mxu0 %vm383_vm2, %v3448_v23 }
 0x1db   : > { %v1005_v16 = vpop.f32.mrf.mxu2 }
 0x1dc   : > { %v1161_v62 = vpop.f32.mrf.mxu3  ;;  %v1039_v63 = vadd.f32 %v1005_v16, %v743_v24  ;;  %v1387_v7 = vpop.f32.mrf.mxu1  ;;  %v2584_v16 = vld [vmem:[%s2779_s19 + $0x108] sm:$0xff] }
 0x1dd   : > { %v1483_v2 = vadd.f32 %v1387_v7, %v3421_v18 }
 0x1de   : > { %v1195_v47 = vadd.f32 %v1161_v62, %v1039_v63 }
 0x1df   : > { %2384 = vmatmul.msk.f32.gmra.mxu1 %vm383_vm2, %v3433_v0  ;;  %v1862_v19 = vpop.f32.mrf.mxu0 }
 0x1e0   : > { %v3843_v27 = vadd.f32 %v1321_v55, %v1195_v47  ;;  %2418 = vmatmul.msk.f32.gmra.mxu2 %vm383_vm2, %v2582_v28 }
 0x1e1   : > { %2452 = vmatmul.msk.f32.gmra.mxu3 %vm383_vm2, %v2990_v49 }
 0x1e2   : > { %2486 = vmatmul.msk.f32.gmra.mxu0 %vm383_vm2, %v3464_v26 }
 0x1e3   : > { %v1543_v45 = vpop.f32.mrf.mxu2 }
 0x1e4   : > { %v1703_v29 = vpop.f32.mrf.mxu3  ;;  %v1639_v43 = vadd.f32 %v1543_v45, %v1483_v2  ;;  %v1390_v0 = vpop.f32.mrf.mxu1 }
 0x1e5   : > { %v1484_v40 = vadd.f32 %v1390_v0, %v3437_v22 }
 0x1e6   : > { %v1799_v36 = vadd.f32 %v1703_v29, %v1639_v43  ;;  %v2585_v29 = vld [vmem:[%s2779_s19 + $0x110] sm:$0xff] }
 0x1e7   : > { %2385 = vmatmul.msk.f32.gmra.mxu1 %vm383_vm2, %v3448_v23  ;;  %v1865_v49 = vpop.f32.mrf.mxu0 }
 0x1e8   : > { %v1958_v18 = vadd.f32 %v1862_v19, %v1799_v36  ;;  %2419 = vmatmul.msk.f32.gmra.mxu2 %vm383_vm2, %v2583_v60 }
 0x1e9   : > { %2453 = vmatmul.msk.f32.gmra.mxu3 %vm383_vm2, %v3035_v58 }
 0x1ea   : > { %v1994_v61 = vadd.f32 %v3856_v12, %v1958_v18  ;;  %2487 = vmatmul.msk.f32.gmra.mxu0 %vm383_vm2, %v3479_v10 }
 0x1eb   : > { %v1546_v1 = vpop.f32.mrf.mxu2 }
 0x1ec   : > { %v1706_v23 = vpop.f32.mrf.mxu3  ;;  %v2026_v55 = vmax.f32 %v1994_v61, 0.0  ;;  %v1640_v32 = vadd.f32 %v1546_v1, %v1484_v40  ;;  %v1393_v54 = vpop.f32.mrf.mxu1  ;;  %v2586_v1 = vld [vmem:[%s2779_s19 + $0x120] sm:$0xff] }
 0x1ed   : > { %v1485_v62 = vadd.f32 %v1393_v54, %v3452_v48  ;;  %v4317_v48 = vld [vmem:[#allocation57_spill] sm:$0xff] }
 0x1ee   : > { %2058 = vst [vmem:[%s3870_s9] sm:$0xff] %v2026_v55  ;;  %v1800_v24 = vadd.f32 %v1706_v23, %v1640_v32  ;;  %v4318_v23 = vld [vmem:[#allocation24_spill] sm:$0xff]  ;;  %v4319_v54 = vld [vmem:[#allocation5_spill] sm:$0xff] }
 0x1ef   : > { %2386 = vmatmul.msk.f32.gmra.mxu1 %vm383_vm2, %v3464_v26  ;;  %v1868_v58 = vpop.f32.mrf.mxu0 }
 0x1f0   : > { %v1959_v22 = vadd.f32 %v1865_v49, %v1800_v24  ;;  %2420 = vmatmul.msk.f32.gmra.mxu2 %vm383_vm2, %v2584_v16 }
 0x1f1   : > { %2454 = vmatmul.msk.f32.gmra.mxu3 %vm383_vm2, %v4253_v17 }
 0x1f2   : > { %v1995_v63 = vadd.f32 %v3856_v12, %v1959_v22  ;;  %2488 = vmatmul.msk.f32.gmra.mxu0 %vm383_vm2, %v3495_v57 }
 0x1f3   : > { %v1549_v7 = vpop.f32.mrf.mxu2 }
 0x1f4   : > { %v1709_v47 = vpop.f32.mrf.mxu3  ;;  %v2027_v19 = vmax.f32 %v1995_v63, 0.0  ;;  %v1641_v26 = vadd.f32 %v1549_v7, %v1485_v62  ;;  %v1396_v28 = vpop.f32.mrf.mxu1  ;;  %v2587_v7 = vld [vmem:[%s2779_s19 + $0x128] sm:$0xff] }
 0x1f5   : > { %v1486_v43 = vadd.f32 %v1396_v28, %v4317_v48 }
 0x1f6   : > { %2059 = vst [vmem:[%s3870_s9 + $0x8] sm:$0xff] %v2027_v19  ;;  %v1801_v2 = vadd.f32 %v1709_v47, %v1641_v26  ;;  %v4320_v47 = vld [vmem:[#allocation12_spill] sm:$0xff] }
 0x1f7   : > { %2387 = vmatmul.msk.f32.gmra.mxu1 %vm383_vm2, %v3479_v10  ;;  %v1871_v45 = vpop.f32.mrf.mxu0  ;;  %v4321_v19 = vld [vmem:[#allocation32_spill] sm:$0xff] }
 0x1f8   : > { %v1960_v17 = vadd.f32 %v1868_v58, %v1801_v2  ;;  %2421 = vmatmul.msk.f32.gmra.mxu2 %vm383_vm2, %v2585_v29 }
 0x1f9   : > { %2455 = vmatmul.msk.f32.gmra.mxu3 %vm383_vm2, %v3127_v13 }
 0x1fa   : > { %v1996_v0 = vadd.f32 %v3856_v12, %v1960_v17  ;;  %2489 = vmatmul.msk.f32.gmra.mxu0 %vm383_vm2, %v3510_v51 }
 0x1fb   : > { %v1552_v36 = vpop.f32.mrf.mxu2 }
 0x1fc   : > { %v1712_v49 = vpop.f32.mrf.mxu3  ;;  %v2028_v18 = vmax.f32 %v1996_v0, 0.0  ;;  %v1642_v10 = vadd.f32 %v1552_v36, %v1486_v43  ;;  %v1399_v60 = vpop.f32.mrf.mxu1  ;;  %v2588_v36 = vld [vmem:[%s2779_s19 + $0x138] sm:$0xff] }
 0x1fd   : > { %v1487_v55 = vadd.f32 %v1399_v60, %v4318_v23  ;;  %v4323_v60 = vld [vmem:[#allocation6_spill] sm:$0xff] }
 0x1fe   : > { %2060 = vst [vmem:[%s3870_s9 + $0x10] sm:$0xff] %v2028_v18  ;;  %v1802_v40 = vadd.f32 %v1712_v49, %v1642_v10  ;;  %v4322_v49 = vld [vmem:[#allocation28_spill] sm:$0xff] }
 0x1ff   : > { %2388 = vmatmul.msk.f32.gmra.mxu1 %vm383_vm2, %v3495_v57  ;;  %v1874_v61 = vpop.f32.mrf.mxu0 }
 0x200   : > { %v1961_v13 = vadd.f32 %v1871_v45, %v1802_v40  ;;  %2422 = vmatmul.msk.f32.gmra.mxu2 %vm383_vm2, %v2586_v1 }
 0x201   : > { %2456 = vmatmul.msk.f32.gmra.mxu3 %vm383_vm2, %v4259_v34 }
 0x202   : > { %v1997_v32 = vadd.f32 %v3856_v12, %v1961_v13  ;;  %2490 = vmatmul.msk.f32.gmra.mxu0 %vm383_vm2, %v4319_v54 }
 0x203   : > { %v1555_v24 = vpop.f32.mrf.mxu2 }
 0x204   : > { %v1715_v58 = vpop.f32.mrf.mxu3  ;;  %v2029_v22 = vmax.f32 %v1997_v32, 0.0  ;;  %v1643_v57 = vadd.f32 %v1555_v24, %v1487_v55  ;;  %v1402_v16 = vpop.f32.mrf.mxu1  ;;  %v4324_v24 = vld [vmem:[#allocation19_spill] sm:$0xff] }
 0x205   : > { %v1488_v26 = vadd.f32 %v1402_v16, %v4321_v19 }
 0x206   : > { %2061 = vst [vmem:[%s3870_s9 + $0x18] sm:$0xff] %v2029_v22  ;;  %v1803_v62 = vadd.f32 %v1715_v58, %v1643_v57  ;;  %v4325_v58 = vld [vmem:[#allocation34_spill] sm:$0xff] }
 0x207   : > { %2389 = vmatmul.msk.f32.gmra.mxu1 %vm383_vm2, %v3510_v51  ;;  %v1877_v63 = vpop.f32.mrf.mxu0 }
 0x208   : > { %v1962_v34 = vadd.f32 %v1874_v61, %v1803_v62  ;;  %2423 = vmatmul.msk.f32.gmra.mxu2 %vm383_vm2, %v2587_v7 }
 0x209   : > { %2457 = vmatmul.msk.f32.gmra.mxu3 %vm383_vm2, %v4320_v47 }
 0x20a   : > { %v1998_v28 = vadd.f32 %v3856_v12, %v1962_v34  ;;  %2491 = vmatmul.msk.f32.gmra.mxu0 %vm383_vm2, %v3541_v39 }
 0x20b   : > { %v1558_v2 = vpop.f32.mrf.mxu2 }
 0x20c   : > { %v1718_v45 = vpop.f32.mrf.mxu3  ;;  %v2030_v17 = vmax.f32 %v1998_v28, 0.0  ;;  %v1644_v51 = vadd.f32 %v1558_v2, %v1488_v26  ;;  %v1405_v29 = vpop.f32.mrf.mxu1  ;;  %v2590_v26 = vld [vmem:[%s2779_s19 + $0x150] sm:$0xff]  ;;  %v4326_v28 = vld [vmem:[#allocation8_spill] sm:$0xff] }
 0x20d   : > { %v1489_v18 = vadd.f32 %v1405_v29, %v4322_v49 }
 0x20e   : > { %2062 = vst [vmem:[%s3870_s9 + $0x20] sm:$0xff] %v2030_v17  ;;  %v1804_v48 = vadd.f32 %v1718_v45, %v1644_v51  ;;  %v4327_v17 = vld [vmem:[#allocation16_spill] sm:$0xff] }
 0x20f   : > { %2390 = vmatmul.msk.f32.gmra.mxu1 %vm383_vm2, %v4319_v54  ;;  %v1880_v43 = vpop.f32.mrf.mxu0  ;;  %v2589_v54 = vld [vmem:[%s2779_s19 + $0x140] sm:$0xff] }
 0x210   : > { %v1963_v0 = vadd.f32 %v1877_v63, %v1804_v48  ;;  %2424 = vmatmul.msk.f32.gmra.mxu2 %vm383_vm2, %v2588_v36 }
 0x211   : > { %2458 = vmatmul.msk.f32.gmra.mxu3 %vm383_vm2, %v4267_v21 }
 0x212   : > { %v1999_v10 = vadd.f32 %v3856_v12, %v1963_v0  ;;  %2492 = vmatmul.msk.f32.gmra.mxu0 %vm383_vm2, %v4323_v60 }
 0x213   : > { %v1561_v40 = vpop.f32.mrf.mxu2 }
 0x214   : > { %v1721_v61 = vpop.f32.mrf.mxu3  ;;  %v2031_v13 = vmax.f32 %v1999_v10, 0.0  ;;  %v1645_v1 = vadd.f32 %v1561_v40, %v1489_v18  ;;  %v1408_v23 = vpop.f32.mrf.mxu1  ;;  %v2591_v18 = vld [vmem:[%s2779_s19 + $0x158] sm:$0xff]  ;;  %v4328_v10 = vld [vmem:[#allocation27_spill] sm:$0xff] }
 0x215   : > { %v1490_v22 = vadd.f32 %v1408_v23, %v4325_v58  ;;  %v4330_v58 = vld [vmem:[#allocation33_spill] sm:$0xff] }
 0x216   : > { %2063 = vst [vmem:[%s3870_s9 + $0x28] sm:$0xff] %v2031_v13  ;;  %v1805_v55 = vadd.f32 %v1721_v61, %v1645_v1 }
 0x217   : > { %2391 = vmatmul.msk.f32.gmra.mxu1 %vm383_vm2, %v3541_v39  ;;  %v1883_v32 = vpop.f32.mrf.mxu0 }
 0x218   : > { %v1964_v21 = vadd.f32 %v1880_v43, %v1805_v55  ;;  %2425 = vmatmul.msk.f32.gmra.mxu2 %vm383_vm2, %v2589_v54 }
 0x219   : > { %2459 = vmatmul.msk.f32.gmra.mxu3 %vm383_vm2, %v4324_v24  ;;  %v2592_v24 = vld [vmem:[%s2779_s19 + $0x168] sm:$0xff] }
 0x21a   : > { %v2000_v57 = vadd.f32 %v3856_v12, %v1964_v21  ;;  %2493 = vmatmul.msk.f32.gmra.mxu0 %vm383_vm2, %v3572_v20 }
 0x21b   : > { %v1564_v16 = vpop.f32.mrf.mxu2 }
 0x21c   : > { %v1724_v62 = vpop.f32.mrf.mxu3  ;;  %v2032_v63 = vmax.f32 %v2000_v57, 0.0  ;;  %v1646_v39 = vadd.f32 %v1564_v16, %v1490_v22  ;;  %v1411_v34 = vpop.f32.mrf.mxu1  ;;  %v4331_v22 = vld [vmem:[#allocation9_spill] sm:$0xff] }
 0x21d   : > { %v1491_v2 = vadd.f32 %v1411_v34, %v4326_v28  ;;  %v2593_v28 = vld [vmem:[%s2779_s19 + $0x170] sm:$0xff] }
 0x21e   : > { %2064 = vst [vmem:[%s3870_s9 + $0x30] sm:$0xff] %v2032_v63  ;;  %v1806_v7 = vadd.f32 %v1724_v62, %v1646_v39 }
 0x21f   : > { %2392 = vmatmul.msk.f32.gmra.mxu1 %vm383_vm2, %v4323_v60  ;;  %v1886_v47 = vpop.f32.mrf.mxu0  ;;  %v4329_v60 = vld [vmem:[#allocation13_spill] sm:$0xff] }
 0x220   : > { %v1965_v19 = vadd.f32 %v1883_v32, %v1806_v7  ;;  %2426 = vmatmul.msk.f32.gmra.mxu2 %vm383_vm2, %v2590_v26 }
 0x221   : > { %2460 = vmatmul.msk.f32.gmra.mxu3 %vm383_vm2, %v4275_v50 }
 0x222   : > { %v2001_v45 = vadd.f32 %v3856_v12, %v1965_v19  ;;  %2494 = vmatmul.msk.f32.gmra.mxu0 %vm383_vm2, %v4327_v17 }
 0x223   : > { %v1567_v51 = vpop.f32.mrf.mxu2 }
 0x224   : > { %v1727_v29 = vpop.f32.mrf.mxu3  ;;  %v2033_v48 = vmax.f32 %v2001_v45, 0.0  ;;  %v1647_v43 = vadd.f32 %v1567_v51, %v1491_v2  ;;  %v1414_v0 = vpop.f32.mrf.mxu1  ;;  %v4332_v2 = vld [vmem:[#allocation36_spill] sm:$0xff]  ;;  %v4333_v45 = vld [vmem:[#allocation14_spill] sm:$0xff] }
 0x225   : > { %v1492_v40 = vadd.f32 %v1414_v0, %v4329_v60 }
 0x226   : > { %2065 = vst [vmem:[%s3870_s9 + $0x38] sm:$0xff] %v2033_v48  ;;  %v1807_v36 = vadd.f32 %v1727_v29, %v1647_v43  ;;  %v4334_v29 = vld [vmem:[#allocation17_spill] sm:$0xff] }
 0x227   : > { %2393 = vmatmul.msk.f32.gmra.mxu1 %vm383_vm2, %v3572_v20  ;;  %v1889_v49 = vpop.f32.mrf.mxu0  ;;  %v1356_v48 = vrot.slane %v4334_v29, 2 }
 0x228   : > { %v1966_v50 = vadd.f32 %v1886_v47, %v1807_v36  ;;  %2427 = vmatmul.msk.f32.gmra.mxu2 %vm383_vm2, %v2591_v18 }
 0x229   : > { %2461 = vmatmul.msk.f32.gmra.mxu3 %vm383_vm2, %v4328_v10 }
 0x22a   : > { %v2002_v61 = vadd.f32 %v3856_v12, %v1966_v50  ;;  %2495 = vmatmul.msk.f32.gmra.mxu0 %vm383_vm2, %v3603_v41 }
 0x22b   : > { %v1570_v13 = vpop.f32.mrf.mxu2 }
 0x22c   : > { %v1730_v1 = vpop.f32.mrf.mxu3  ;;  %v2034_v23 = vmax.f32 %v2002_v61, 0.0  ;;  %v1648_v20 = vadd.f32 %v1570_v13, %v1492_v40  ;;  %v1417_v55 = vpop.f32.mrf.mxu1  ;;  %v4335_v61 = vld [vmem:[#allocation20_spill] sm:$0xff] }
 0x22d   : > { %v1493_v57 = vadd.f32 %v1417_v55, %v4331_v22 }
 0x22e   : > { %2066 = vst [vmem:[%s3870_s9 + $0x40] sm:$0xff] %v2034_v23  ;;  %v1808_v32 = vadd.f32 %v1730_v1, %v1648_v20  ;;  %v1359_v20 = vrot.slane %v3641_v14, 2 }
 0x22f   : > { %2394 = vmatmul.msk.f32.gmra.mxu1 %vm383_vm2, %v4327_v17  ;;  %v1892_v21 = vpop.f32.mrf.mxu0 }
 0x230   : > { %v1967_v54 = vadd.f32 %v1889_v49, %v1808_v32  ;;  %2428 = vmatmul.msk.f32.gmra.mxu2 %vm383_vm2, %v2592_v24  ;;  %v248_v24 = vld [vmem:[%s2779_s19 + $0x198] sm:$0xff] }
 0x231   : > { %2462 = vmatmul.msk.f32.gmra.mxu3 %vm383_vm2, %v4330_v58  ;;  %v249_v58 = vld [vmem:[%s2779_s19 + $0x1a0] sm:$0xff]  ;;  %v1672_v14 = vrot.slane %v248_v24, 1 }
 0x232   : > { %v2003_v16 = vadd.f32 %v3856_v12, %v1967_v54  ;;  %2496 = vmatmul.msk.f32.gmra.mxu0 %vm383_vm2, %v3627_v4 }
 0x233   : > { %v1573_v62 = vpop.f32.mrf.mxu2 }
 0x234   : > { %v1733_v63 = vpop.f32.mrf.mxu3  ;;  %v2035_v39 = vmax.f32 %v2003_v16, 0.0  ;;  %v1649_v34 = vadd.f32 %v1573_v62, %v1493_v57  ;;  %v1420_v7 = vpop.f32.mrf.mxu1  ;;  %v1673_v16 = vrot.slane %v249_v58, 1  ;;  %v4336_v62 = vld [vmem:[#allocation23_spill] sm:$0xff] }
 0x235   : > { %v1494_v17 = vadd.f32 %v1420_v7, %v4333_v45  ;;  %v1831_v7 = vrot.slane %v248_v24, 2 }
 0x236   : > { %2067 = vst [vmem:[%s3870_s9 + $0x48] sm:$0xff] %v2035_v39  ;;  %v1809_v47 = vadd.f32 %v1733_v63, %v1649_v34 }
 0x237   : > { %2395 = vmatmul.msk.f32.gmra.mxu1 %vm383_vm2, %v3603_v41  ;;  %v1895_v19 = vpop.f32.mrf.mxu0  ;;  %v1357_v41 = vrot.slane %v3614_v38, 2 }
 0x238   : > { %v1968_v26 = vadd.f32 %v1892_v21, %v1809_v47  ;;  %2429 = vmatmul.msk.f32.gmra.mxu2 %vm383_vm2, %v2593_v28  ;;  %v1832_v47 = vrot.slane %v249_v58, 2 }
 0x239   : > { %2463 = vmatmul.msk.f32.gmra.mxu3 %vm383_vm2, %v4332_v2  ;;  %v1358_v60 = vsel %vm745_vm3, %v1356_v48, %v1357_v41  ;;  %v1360_v22 = vsel %vm745_vm3, %v1357_v41, %v1359_v20  ;;  %v250_v2 = vld [vmem:[%s2779_s19 + $0x1a8] sm:$0x3]  ;;  %s2104_s19 = scalar_lea.hbm %s4121_s3, %s2507_s10 }
 0x23a   : > { %v2004_v51 = vadd.f32 %v3856_v12, %v1968_v26  ;;  %2497 = vmatmul.msk.f32.gmra.mxu0 %vm383_vm2, %v3649_v46  ;;  %s2107_s23 = sshll.u32 %s2104_s19, 4  ;;  %s2108_s23 = int_to_ptr.hbm [resolvable:$true] %s2107_s23 }
 0x23b   : > { %v1576_v43 = vpop.f32.mrf.mxu2  ;;  %s2608_s26 = sshra.s32 %s2108_s23, 4  ;;  %s2609_s26 = int_to_ptr.hbm [resolvable:$true] %s2608_s26 }
 0x23c   : > { %v1736_v0 = vpop.f32.mrf.mxu3  ;;  %v2036_v36 = vmax.f32 %v2004_v51, 0.0  ;;  %v1650_v49 = vadd.f32 %v1576_v43, %v1494_v17  ;;  %v1423_v50 = vpop.f32.mrf.mxu1  ;;  %v1833_v17 = vsel %vm745_vm3, %v1831_v7, %v1832_v47  ;;  %s2610_s27 = scalar_lea.hbm %s2609_s26, 256  ;;  %p2615_p1 = scmp.lt.s32.totalorder %s2609_s26, %s4121_s3 }
 0x23d   : > { %v1495_v13 = vadd.f32 %v1423_v50, %v4335_v61  ;;  %p2611_p12 = scmp.ne.s32.totalorder %s2609_s26, %s2610_s27  ;;  %p2616_p2 = scmp.lt.s32.totalorder %s2614_s30, %s2610_s27 }
 0x23e   : > { %2068 = vst [vmem:[%s3870_s9 + $0x50] sm:$0xff] %v2036_v36  ;;  %v1810_v18 = vadd.f32 %v1736_v0, %v1650_v49  ;;  %v1834_v36 = vrot.slane %v250_v2, 2 }
 0x23f   : > { %2396 = vmatmul.msk.f32.gmra.mxu1 %vm383_vm2, %v3627_v4  ;;  %v1898_v10 = vpop.f32.mrf.mxu0  ;;  %p2612_p13 = pnand %p2611_p12, %p2736_p4  ;;  %p2617_p3 = por %p2616_p2, %p2615_p1 }
 0x240   : > { %v1969_v40 = vadd.f32 %v1895_v19, %v1810_v18  ;;  %2430 = vmatmul.msk.f32.gmra.mxu2 %vm383_vm2, %v4334_v29  ;;  %v1675_v29 = vrot.slane %v250_v2, 1 }
 0x241   : > { %2464 = vmatmul.msk.f32.gmra.mxu3 %vm383_vm2, %v3632_v11  ;;  %p2613_p0 = pneg %p2612_p13 }
 0x242   : > { %v2005_v1 = vadd.f32 %v3856_v12, %v1969_v40  ;;  %2498 = vmatmul.msk.f32.gmra.mxu0 %vm383_vm2, %v1358_v60 }
 0x243   : > { %v1579_v23 = vpop.f32.mrf.mxu2  ;;  %p2618_p5 = pnand %p2617_p3, %p2613_p0 }
 0x244   : > { %v1739_v4 = vpop.f32.mrf.mxu3  ;;  %v2037_v55 = vmax.f32 %v2005_v1, 0.0  ;;  %v1651_v32 = vadd.f32 %v1579_v23, %v1495_v13  ;;  %v1426_v21 = vpop.f32.mrf.mxu1 }
 0x245   : > { %v1496_v63 = vadd.f32 %v1426_v21, %v4336_v62 }
 0x246   : > { %2069 = vst [vmem:[%s3870_s9 + $0x58] sm:$0xff] %v2037_v55  ;;  %v1811_v54 = vadd.f32 %v1739_v4, %v1651_v32 }
 0x247   : > { %2397 = vmatmul.msk.f32.gmra.mxu1 %vm383_vm2, %v3649_v46  ;;  %v1901_v11 = vpop.f32.mrf.mxu0 }
 0x248   : > { %v1970_v57 = vadd.f32 %v1898_v10, %v1811_v54  ;;  %2431 = vmatmul.msk.f32.gmra.mxu2 %vm383_vm2, %v3614_v38  ;;  %v1674_v38 = vsel %vm300_vm1, %v1672_v14, %v1673_v16  ;;  %v1676_v10 = vsel %vm300_vm1, %v1673_v16, %v1675_v29 }
 0x249   : > { %2465 = vmatmul.msk.f32.gmra.mxu3 %vm383_vm2, %v3654_v15 }
 0x24a   : > { %v2006_v39 = vadd.f32 %v3856_v12, %v1970_v57  ;;  %2499 = vmatmul.msk.f32.gmra.mxu0 %vm383_vm2, %v1360_v22 }
 0x24b   : > { %v1582_v46 = vpop.f32.mrf.mxu2 }
 0x24c   : > { %v1742_v34 = vpop.f32.mrf.mxu3  ;;  %v2038_v19 = vmax.f32 %v2006_v39, 0.0  ;;  %v1652_v26 = vadd.f32 %v1582_v46, %v1496_v63  ;;  %v1429_v28 = vpop.f32.mrf.mxu1 }
 0x24d   : > { %v1497_v48 = vadd.f32 %v1429_v28, %v3656_v8  ;;  %v1835_v8 = vsel %vm745_vm3, %v1832_v47, %v1834_v36 }
 0x24e   : > { %2070 = vst [vmem:[%s3870_s9 + $0x60] sm:$0xff] %v2038_v19  ;;  %v1812_v15 = vadd.f32 %v1742_v34, %v1652_v26 }
 0x24f   : > { %2398 = vmatmul.msk.f32.gmra.mxu1 %vm383_vm2, %v1358_v60  ;;  %v1904_v45 = vpop.f32.mrf.mxu0 }
 0x250   : > { %v1971_v51 = vadd.f32 %v1901_v11, %v1812_v15  ;;  %2432 = vmatmul.msk.f32.gmra.mxu2 %vm383_vm2, %v248_v24 }
 0x251   : > { %2466 = vmatmul.msk.f32.gmra.mxu3 %vm383_vm2, %v1674_v38 }
 0x252   : > { %v2007_v41 = vadd.f32 %v3856_v12, %v1971_v51  ;;  %2500 = vmatmul.msk.f32.gmra.mxu0 %vm383_vm2, %v1833_v17 }
 0x253   : > { %v1585_v43 = vpop.f32.mrf.mxu2 }
 0x254   : > { %v1745_v0 = vpop.f32.mrf.mxu3  ;;  %v2039_v49 = vmax.f32 %v2007_v41, 0.0  ;;  %v1653_v50 = vadd.f32 %v1585_v43, %v1497_v48  ;;  %v1432_v18 = vpop.f32.mrf.mxu1 }
 0x255   : > { %v1498_v13 = vadd.f32 %v1432_v18, %v3667_v31 }
 0x256   : > { %2071 = vst [vmem:[%s3870_s9 + $0x68] sm:$0xff] %v2039_v49  ;;  %v1813_v60 = vadd.f32 %v1745_v0, %v1653_v50 }
 0x257   : > { %2399 = vmatmul.msk.f32.gmra.mxu1 %vm383_vm2, %v1360_v22  ;;  %v1907_v40 = vpop.f32.mrf.mxu0 }
 0x258   : > { %v1972_v61 = vadd.f32 %v1904_v45, %v1813_v60  ;;  %2433 = vmatmul.msk.f32.gmra.mxu2 %vm383_vm2, %v249_v58 }
 0x259   : > { %2467 = vmatmul.msk.f32.gmra.mxu3 %vm383_vm2, %v1676_v10 }
 0x25a   : > { %v2008_v1 = vadd.f32 %v3856_v12, %v1972_v61  ;;  %2501 = vmatmul.msk.f32.gmra.mxu0 %vm383_vm2, %v1835_v8 }
 0x25b   : > { %v1588_v23 = vpop.f32.mrf.mxu2 }
 0x25c   : > { %v1748_v4 = vpop.f32.mrf.mxu3  ;;  %v2040_v20 = vmax.f32 %v2008_v1, 0.0  ;;  %v1654_v55 = vadd.f32 %v1588_v23, %v1498_v13  ;;  %v1435_v32 = vpop.f32.mrf.mxu1 }
 0x25d   : > { %v1499_v58 = vadd.f32 %v1435_v32, %v3678_v9 }
 0x25e   : > { %2072 = vst [vmem:[%s3870_s9 + $0x70] sm:$0xff] %v2040_v20  ;;  %v1814_v21 = vadd.f32 %v1748_v4, %v1654_v55 }
 0x25f   : > { %v1910_v54 = vpop.f32.mrf.mxu0 }
 0x260   : > { %v1973_v24 = vadd.f32 %v1907_v40, %v1814_v21 }
 0x262   : > { %v2009_v11 = vadd.f32 %v3856_v12, %v1973_v24 }
 0x263   : > { %v1591_v22 = vpop.f32.mrf.mxu2 }
 0x264   : > { %v1751_v31 = vpop.f32.mrf.mxu3  ;;  %v2041_v57 = vmax.f32 %v2009_v11, 0.0  ;;  %v1655_v14 = vadd.f32 %v1591_v22, %v1499_v58  ;;  %v1438_v16 = vpop.f32.mrf.mxu1 }
 0x265   : > { %v1500_v46 = vadd.f32 %v1438_v16, %v3689_v37 }
 0x266   : > { %2073 = vst [vmem:[%s3870_s9 + $0x78] sm:$0xff] %v2041_v57  ;;  %v1815_v62 = vadd.f32 %v1751_v31, %v1655_v14 }
 0x267   : > { %v1913_v63 = vpop.f32.mrf.mxu0 }
 0x268   : > { %v1974_v39 = vadd.f32 %v1910_v54, %v1815_v62 }
 0x26a   : > { %v2010_v34 = vadd.f32 %v3856_v12, %v1974_v39 }
 0x26b   : > { %v1594_v7 = vpop.f32.mrf.mxu2 }
 0x26c   : > { %v1754_v47 = vpop.f32.mrf.mxu3  ;;  %v2042_v9 = vmax.f32 %v2010_v34, 0.0  ;;  %v1656_v19 = vadd.f32 %v1594_v7, %v1500_v46  ;;  %v1441_v26 = vpop.f32.mrf.mxu1 }
 0x26d   : > { %v1501_v2 = vadd.f32 %v1441_v26, %v3700_v5 }
 0x26e   : > { %2074 = vst [vmem:[%s3870_s9 + $0x80] sm:$0xff] %v2042_v9  ;;  %v1816_v28 = vadd.f32 %v1754_v47, %v1656_v19 }
 0x26f   : > { %v1916_v38 = vpop.f32.mrf.mxu0 }
 0x270   : > { %v1975_v15 = vadd.f32 %v1913_v63, %v1816_v28 }
 0x272   : > { %v2011_v45 = vadd.f32 %v3856_v12, %v1975_v15 }
 0x273   : > { %v1597_v17 = vpop.f32.mrf.mxu2 }
 0x274   : > { %v1757_v51 = vpop.f32.mrf.mxu3  ;;  %v2043_v37 = vmax.f32 %v2011_v45, 0.0  ;;  %v1657_v29 = vadd.f32 %v1597_v17, %v1501_v2  ;;  %v1444_v48 = vpop.f32.mrf.mxu1 }
 0x275   : > { %v1502_v36 = vadd.f32 %v1444_v48, %v3711_v52 }
 0x276   : > { %2075 = vst [vmem:[%s3870_s9 + $0x88] sm:$0xff] %v2043_v37  ;;  %v1817_v41 = vadd.f32 %v1757_v51, %v1657_v29 }
 0x277   : > { %v1919_v43 = vpop.f32.mrf.mxu0 }
 0x278   : > { %v1976_v0 = vadd.f32 %v1916_v38, %v1817_v41 }
 0x27a   : > { %v2012_v49 = vadd.f32 %v3856_v12, %v1976_v0 }
 0x27b   : > { %v1600_v50 = vpop.f32.mrf.mxu2 }
 0x27c   : > { %v1760_v18 = vpop.f32.mrf.mxu3  ;;  %v2044_v5 = vmax.f32 %v2012_v49, 0.0  ;;  %v1658_v10 = vadd.f32 %v1600_v50, %v1502_v36  ;;  %v1447_v60 = vpop.f32.mrf.mxu1 }
 0x27d   : > { %v1503_v13 = vadd.f32 %v1447_v60, %v3722_v33 }
 0x27e   : > { %2076 = vst [vmem:[%s3870_s9 + $0x90] sm:$0xff] %v2044_v5  ;;  %v1818_v40 = vadd.f32 %v1760_v18, %v1658_v10 }
 0x27f   : > { %v1922_v8 = vpop.f32.mrf.mxu0 }
 0x280   : > { %v1977_v61 = vadd.f32 %v1919_v43, %v1818_v40 }
 0x282   : > { %v2013_v1 = vadd.f32 %v3856_v12, %v1977_v61 }
 0x283   : > { %v1603_v23 = vpop.f32.mrf.mxu2 }
 0x284   : > { %v1763_v4 = vpop.f32.mrf.mxu3  ;;  %v2045_v52 = vmax.f32 %v2013_v1, 0.0  ;;  %v1659_v20 = vadd.f32 %v1603_v23, %v1503_v13  ;;  %v1450_v55 = vpop.f32.mrf.mxu1 }
 0x285   : > { %v1504_v24 = vadd.f32 %v1450_v55, %v3733_v3 }
 0x286   : > { %2077 = vst [vmem:[%s3870_s9 + $0x98] sm:$0xff] %v2045_v52  ;;  %v1819_v32 = vadd.f32 %v1763_v4, %v1659_v20 }
 0x287   : > { %v1925_v21 = vpop.f32.mrf.mxu0 }
 0x288   : > { %v1978_v54 = vadd.f32 %v1922_v8, %v1819_v32 }
 0x28a   : > { %v2014_v58 = vadd.f32 %v3856_v12, %v1978_v54 }
 0x28b   : > { %v1606_v11 = vpop.f32.mrf.mxu2 }
 0x28c   : > { %v1766_v22 = vpop.f32.mrf.mxu3  ;;  %v2046_v33 = vmax.f32 %v2014_v58, 0.0  ;;  %v1660_v31 = vadd.f32 %v1606_v11, %v1504_v24  ;;  %v1453_v57 = vpop.f32.mrf.mxu1 }
 0x28d   : > { %v1505_v63 = vadd.f32 %v1453_v57, %v3744_v56 }
 0x28e   : > { %2078 = vst [vmem:[%s3870_s9 + $0xa0] sm:$0xff] %v2046_v33  ;;  %v1820_v14 = vadd.f32 %v1766_v22, %v1660_v31 }
 0x28f   : > { %v1928_v16 = vpop.f32.mrf.mxu0 }
 0x290   : > { %v1979_v62 = vadd.f32 %v1925_v21, %v1820_v14 }
 0x292   : > { %v2015_v39 = vadd.f32 %v3856_v12, %v1979_v62 }
 0x293   : > { %v1609_v46 = vpop.f32.mrf.mxu2 }
 0x294   : > { %v1769_v34 = vpop.f32.mrf.mxu3  ;;  %v2047_v3 = vmax.f32 %v2015_v39, 0.0  ;;  %v1661_v7 = vadd.f32 %v1609_v46, %v1505_v63  ;;  %v1456_v47 = vpop.f32.mrf.mxu1 }
 0x295   : > { %v1506_v28 = vadd.f32 %v1456_v47, %v3755_v25 }
 0x296   : > { %2079 = vst [vmem:[%s3870_s9 + $0xa8] sm:$0xff] %v2047_v3  ;;  %v1821_v9 = vadd.f32 %v1769_v34, %v1661_v7 }
 0x297   : > { %v1931_v19 = vpop.f32.mrf.mxu0 }
 0x298   : > { %v1980_v26 = vadd.f32 %v1928_v16, %v1821_v9 }
 0x29a   : > { %v2016_v38 = vadd.f32 %v3856_v12, %v1980_v26 }
 0x29b   : > { %v1612_v15 = vpop.f32.mrf.mxu2 }
 0x29c   : > { %v1772_v2 = vpop.f32.mrf.mxu3  ;;  %v2048_v56 = vmax.f32 %v2016_v38, 0.0  ;;  %v1662_v45 = vadd.f32 %v1612_v15, %v1506_v28  ;;  %v1459_v17 = vpop.f32.mrf.mxu1 }
 0x29d   : > { %v1507_v48 = vadd.f32 %v1459_v17, %v3766_v44 }
 0x29e   : > { %2080 = vst [vmem:[%s3870_s9 + $0xb0] sm:$0xff] %v2048_v56  ;;  %v1822_v51 = vadd.f32 %v1772_v2, %v1662_v45 }
 0x29f   : > { %v1934_v37 = vpop.f32.mrf.mxu0 }
 0x2a0   : > { %v1981_v29 = vadd.f32 %v1931_v19, %v1822_v51 }
 0x2a2   : > { %v2017_v41 = vadd.f32 %v3856_v12, %v1981_v29 }
 0x2a3   : > { %v1615_v43 = vpop.f32.mrf.mxu2 }
 0x2a4   : > { %v1775_v0 = vpop.f32.mrf.mxu3  ;;  %v2049_v25 = vmax.f32 %v2017_v41, 0.0  ;;  %v1663_v36 = vadd.f32 %v1615_v43, %v1507_v48  ;;  %v1462_v49 = vpop.f32.mrf.mxu1 }
 0x2a5   : > { %v1508_v10 = vadd.f32 %v1462_v49, %v3777_v35 }
 0x2a6   : > { %2081 = vst [vmem:[%s3870_s9 + $0xb8] sm:$0xff] %v2049_v25  ;;  %v1823_v50 = vadd.f32 %v1775_v0, %v1663_v36 }
 0x2a7   : > { %v1937_v18 = vpop.f32.mrf.mxu0 }
 0x2a8   : > { %v1982_v5 = vadd.f32 %v1934_v37, %v1823_v50 }
 0x2aa   : > { %v2018_v60 = vadd.f32 %v3856_v12, %v1982_v5 }
 0x2ab   : > { %v1618_v40 = vpop.f32.mrf.mxu2 }
 0x2ac   : > { %v1778_v8 = vpop.f32.mrf.mxu3  ;;  %v2050_v44 = vmax.f32 %v2018_v60, 0.0  ;;  %v1664_v61 = vadd.f32 %v1618_v40, %v1508_v10  ;;  %v1465_v13 = vpop.f32.mrf.mxu1 }
 0x2ad   : > { %v1509_v52 = vadd.f32 %v1465_v13, %v3788_v53 }
 0x2ae   : > { %2082 = vst [vmem:[%s3870_s9 + $0xc0] sm:$0xff] %v2050_v44  ;;  %v1824_v1 = vadd.f32 %v1778_v8, %v1664_v61 }
 0x2af   : > { %v1940_v23 = vpop.f32.mrf.mxu0 }
 0x2b0   : > { %v1983_v4 = vadd.f32 %v1937_v18, %v1824_v1 }
 0x2b2   : > { %v2019_v20 = vadd.f32 %v3856_v12, %v1983_v4 }
 0x2b3   : > { %v1621_v55 = vpop.f32.mrf.mxu2 }
 0x2b4   : > { %v1781_v32 = vpop.f32.mrf.mxu3  ;;  %v2051_v35 = vmax.f32 %v2019_v20, 0.0  ;;  %v1665_v21 = vadd.f32 %v1621_v55, %v1509_v52  ;;  %v1468_v54 = vpop.f32.mrf.mxu1 }
 0x2b5   : > { %v1510_v22 = vadd.f32 %v1468_v54, %v3799_v42 }
 0x2b6   : > { %2083 = vst [vmem:[%s3870_s9 + $0xc8] sm:$0xff] %v2051_v35  ;;  %v1825_v24 = vadd.f32 %v1781_v32, %v1665_v21 }
 0x2b7   : > { %v1943_v58 = vpop.f32.mrf.mxu0 }
 0x2b8   : > { %v1984_v11 = vadd.f32 %v1940_v23, %v1825_v24 }
 0x2ba   : > { %v2020_v33 = vadd.f32 %v3856_v12, %v1984_v11 }
 0x2bb   : > { %v1624_v31 = vpop.f32.mrf.mxu2 }
 0x2bc   : > { %v1784_v57 = vpop.f32.mrf.mxu3  ;;  %v2052_v53 = vmax.f32 %v2020_v33, 0.0  ;;  %v1666_v14 = vadd.f32 %v1624_v31, %v1510_v22  ;;  %v1471_v16 = vpop.f32.mrf.mxu1 }
 0x2bd   : > { %v1511_v46 = vadd.f32 %v1471_v16, %v3810_v30 }
 0x2be   : > { %2084 = vst [vmem:[%s3870_s9 + $0xd0] sm:$0xff] %v2052_v53  ;;  %v1826_v62 = vadd.f32 %v1784_v57, %v1666_v14 }
 0x2bf   : > { %v1946_v63 = vpop.f32.mrf.mxu0 }
 0x2c0   : > { %v1985_v39 = vadd.f32 %v1943_v58, %v1826_v62 }
 0x2c2   : > { %v2021_v34 = vadd.f32 %v3856_v12, %v1985_v39 }
 0x2c3   : > { %v1627_v3 = vpop.f32.mrf.mxu2 }
 0x2c4   : > { %v1787_v7 = vpop.f32.mrf.mxu3  ;;  %v2053_v42 = vmax.f32 %v2021_v34, 0.0  ;;  %v1667_v47 = vadd.f32 %v1627_v3, %v1511_v46  ;;  %v1474_v9 = vpop.f32.mrf.mxu1 }
 0x2c5   : > { %v1512_v38 = vadd.f32 %v1474_v9, %v3821_v59 }
 0x2c6   : > { %2085 = vst [vmem:[%s3870_s9 + $0xd8] sm:$0xff] %v2053_v42  ;;  %v1827_v19 = vadd.f32 %v1787_v7, %v1667_v47 }
 0x2c7   : > { %v1949_v28 = vpop.f32.mrf.mxu0 }
 0x2c8   : > { %v1986_v26 = vadd.f32 %v1946_v63, %v1827_v19 }
 0x2ca   : > { %v2022_v15 = vadd.f32 %v3856_v12, %v1986_v26 }
 0x2cb   : > { %v1630_v2 = vpop.f32.mrf.mxu2 }
 0x2cc   : > { %v1790_v56 = vpop.f32.mrf.mxu3  ;;  %v2054_v30 = vmax.f32 %v2022_v15, 0.0  ;;  %v1668_v45 = vadd.f32 %v1630_v2, %v1512_v38  ;;  %v1477_v17 = vpop.f32.mrf.mxu1 }
 0x2cd   : > { %v1513_v29 = vadd.f32 %v1477_v17, %v3832_v6 }
 0x2ce   : > { %2086 = vst [vmem:[%s3870_s9 + $0xe0] sm:$0xff] %v2054_v30  ;;  %v1828_v51 = vadd.f32 %v1790_v56, %v1668_v45 }
 0x2cf   : > { %v1952_v41 = vpop.f32.mrf.mxu0 }
 0x2d0   : > { %v1987_v37 = vadd.f32 %v1949_v28, %v1828_v51 }
 0x2d2   : > { %v2023_v48 = vadd.f32 %v3856_v12, %v1987_v37 }
 0x2d3   : > { %v1633_v43 = vpop.f32.mrf.mxu2 }
 0x2d4   : > { %v1793_v0 = vpop.f32.mrf.mxu3  ;;  %v2055_v59 = vmax.f32 %v2023_v48, 0.0  ;;  %v1669_v25 = vadd.f32 %v1633_v43, %v1513_v29  ;;  %v1480_v49 = vpop.f32.mrf.mxu1 }
 0x2d5   : > { %v1514_v18 = vadd.f32 %v1480_v49, %v3843_v27 }
 0x2d6   : > { %2087 = vst [vmem:[%s3870_s9 + $0xe8] sm:$0xff] %v2055_v59  ;;  %v1829_v36 = vadd.f32 %v1793_v0, %v1669_v25 }
 0x2d7   : > { %v1955_v8 = vpop.f32.mrf.mxu0 }
 0x2d8   : > { %v1988_v50 = vadd.f32 %v1952_v41, %v1829_v36 }
 0x2da   : > { %v2024_v5 = vadd.f32 %v3856_v12, %v1988_v50 }
 0x2db   : > { %v1636_v6 = vpop.f32.mrf.mxu2 }
 0x2dc   : > { %v1796_v10 = vpop.f32.mrf.mxu3  ;;  %v2056_v60 = vmax.f32 %v2024_v5, 0.0  ;;  %v1670_v40 = vadd.f32 %v1636_v6, %v1514_v18 }
 0x2de   : > { %2088 = vst [vmem:[%s3870_s9 + $0xf0] sm:$0xff] %v2056_v60  ;;  %v1830_v44 = vadd.f32 %v1796_v10, %v1670_v40 }
 0x2e0   : > { %v1989_v61 = vadd.f32 %v1955_v8, %v1830_v44 }
 0x2e2   : > { %v2025_v27 = vadd.f32 %v3856_v12, %v1989_v61 }
 0x2e4   : > { %v2057_v13 = vmax.f32 %v2025_v27, 0.0 }
 0x2e6   : > { %2089 = vst [vmem:[%s3870_s9 + $0xf8] sm:$0xff] %v2057_v13 }
 0x2e7   : > { %2621 = shalt.err (!%p2618_p5)
}
 0x2e8   : > { %s2674_s5 = smov 128   ;;  %s2675_s7 = smov 8  }
 0x2e9   : > { %2512 = dma.vmem_to_hbm [thread:$0]  (%p2736_p4), %s2106_s21, 4096, %s2108_s23, %s2091_s15, %s2674_s5, %s2674_s5, %s2675_s7  }
 0x2ea PF: > { %p2518_p6 = scmp.ge.s32.totalorder %s2672_s17, 2  ;;  %s2122_s8 = sand.u32 1, %s2652_s12  }
 0x2eb   : > { %s2123_s9 = scalar_lea.sflag [#allocation3], %s2122_s8 }
 0x2ec   : > { %p2515_p7 = pnand %p2518_p6, %p2743_p8 }
 0x2ee   : > { %p2516_p9 = pneg %p2515_p7 }
 0x2f0   : > { %2647 = dma.done.wait (%p2516_p9), %s2123_s9, 4096  }
 0x2f1   : > { %2649 = vsyncadd (%p2516_p9), %s2123_s9, 4294963200  ;;  %s16_s17 = sadd.s32 1, %s2672_s17   ;;  %s4337_s12 = smov %s2656_s13 }
 0x2f2   : > { %p13_p10 = scmp.ge.s32.totalorder %s16_s17, 4   ;;  %s4338_s13 = smov %s2660_s14 }
 0x2f3   : > { %s4339_s14 = smov %s2749_s25  ;;  %s4340_s15 = smov %s2668_s16 }
 0x2f4   : > { %s4341_s16 = smov %s4343_s20  ;;  %15 = sbr.rel (!%p13_p10) target bundleno = 4 (0x4), region = 75 }
 0x2f9   :  { %2129 = vsyncpa [#allocation3], 1 }
 0x2fa   :  { %2131 = vsyncpa [#allocation3 + $0x1], 1 }

</bundles_post_ra>
